<compile_context>
chip_gen: v5e
topology: v5e:2x2
jax: 0.10.0
libtpu: 0.0.40
codegen_flags: <defaults>
</compile_context>

<pallas_src>
import functools

import jax
import jax.numpy as jnp
from jax.experimental import pallas as pl
from jax.experimental.pallas import tpu as pltpu

_VMEM_LIMIT = 48 * 1024 * 1024  # explicit scoped-VMEM cap: fits v7x (64 MiB physical)


# ----------------------------------------------------------------------------
# Pallas kernels
# ----------------------------------------------------------------------------
def conv_mm_kernel(p_ref, w_ref, scale_ref, bias_ref, o_ref, acc_ref, *, act):
    """Tiled im2col-matmul with K-axis accumulation + folded BN affine + LeakyReLU(0.2).

    Grid = (M_tiles, K_tiles); K is the last ("arbitrary") axis. bf16 operands feed the
    MXU, accumulation and the epilogue run in f32 on a VMEM scratch accumulator.
    """
    k = pl.program_id(1)

    @pl.when(k == 0)
    def _():
        acc_ref[...] = jnp.zeros_like(acc_ref)

    acc_ref[...] += jnp.dot(p_ref[...], w_ref[...], preferred_element_type=jnp.float32)

    @pl.when(k == pl.num_programs(1) - 1)
    def _():
        y = acc_ref[...] * scale_ref[...] + bias_ref[...]   # broadcast (1, Cout)
        if act:
            y = jnp.where(y > 0, y, 0.2 * y)                # LeakyReLU(0.2)
        o_ref[...] = y.astype(o_ref.dtype)


def conv5_heads_kernel(p_ref, w5_ref, wa_ref, ba_ref, wd_ref, bd_ref, s_ref, c_ref):
    """Fused conv5 (1x1 spatial, no BN/act) + aux softmax head + disc sigmoid head."""
    # conv5: (TN, 16*8*ndf) @ (16*8*ndf, ndf) -> f32 feature, never leaves VMEM.
    feat = jnp.dot(p_ref[...], w5_ref[...], preferred_element_type=jnp.float32)

    # aux head: softmax(feat @ Wa + ba)  (softmax denom reciprocal on the EUP)
    logits = jnp.dot(feat, wa_ref[...], preferred_element_type=jnp.float32) + ba_ref[...]
    m = jnp.max(logits, axis=-1, keepdims=True)
    e = jnp.exp(logits - m)
    c_ref[...] = e * pl.reciprocal(jnp.sum(e, axis=-1, keepdims=True), approx=True)

    # disc head: numerically-stable sigmoid(feat @ Wd + bd)
    d = jnp.dot(feat, wd_ref[...], preferred_element_type=jnp.float32) + bd_ref[...]
    pos = pl.reciprocal(1.0 + jnp.exp(-d), approx=True)
    ed = jnp.exp(d)
    neg = ed * pl.reciprocal(1.0 + ed, approx=True)
    s_ref[...] = jnp.where(d >= 0, pos, neg)


# ----------------------------------------------------------------------------
# Plain-JAX glue: im2col (pad + strided slice + reshape only, stays in bf16)
# ----------------------------------------------------------------------------
def im2col(x_nhwc, kh, kw, stride, pad):
    if pad > 0:
        x_nhwc = jnp.pad(x_nhwc, ((0, 0), (pad, pad), (pad, pad), (0, 0)))
    n, h, w, c = x_nhwc.shape
    ho = (h - kh) // stride + 1
    wo = (w - kw) // stride + 1
    cols = []
    for i in range(kh):
        for j in range(kw):
            cols.append(
                x_nhwc[:, i : i + ho * stride : stride, j : j + wo * stride : stride, :]
            )
    # (N, Ho, Wo, kh*kw, C) -> (N*Ho*Wo, kh*kw*C)
    p = jnp.stack(cols, axis=3)
    return p.reshape(n * ho * wo, kh * kw * c), (n, ho, wo)


# ----------------------------------------------------------------------------
# Tile-size helpers (respect the (8,128) block constraint; bf16 -> 16-row quanta)
# ----------------------------------------------------------------------------
def _pick_m_tile(m, max_tile=512):
    if m <= max_tile:
        return m
    t = (max_tile // 16) * 16
    while t >= 16:
        if m % t == 0:
            return t
        t -= 16
    return (max_tile // 16) * 16  # partial last block; OOB rows are dropped on store


def _pick_k_tile(k, max_tile=2048):
    if k <= max_tile:
        return k
    t = (max_tile // 128) * 128
    while t >= 128:
        if k % t == 0:
            return t
        t -= 128
    return k  # fall back to untiled K (never read garbage into the reduction)


# ----------------------------------------------------------------------------
# One conv layer (4x4 kernel) + folded BN + optional LeakyReLU via Pallas
# ----------------------------------------------------------------------------
def conv_block(x_nhwc, w, scale, bias, *, stride, pad, act):
    patches, (n, ho, wo) = im2col(x_nhwc.astype(jnp.bfloat16), 4, 4, stride, pad)
    m, k = patches.shape
    cout = w.shape[-1]
    w_bf16 = w.astype(jnp.bfloat16)

    tm = _pick_m_tile(m)
    tk = _pick_k_tile(k)
    grid = (pl.cdiv(m, tm), pl.cdiv(k, tk))

    out = pl.pallas_call(
        functools.partial(conv_mm_kernel, act=act),
        out_shape=jax.ShapeDtypeStruct((m, cout), jnp.bfloat16),
        grid_spec=pltpu.PrefetchScalarGridSpec(
            num_scalar_prefetch=0,
            grid=grid,
            in_specs=[
                pl.BlockSpec((tm, tk), lambda i, kk: (i, kk)),     # patches tile
                pl.BlockSpec((tk, cout), lambda i, kk: (kk, 0)),   # weight K-tile
                pl.BlockSpec((1, cout), lambda i, kk: (0, 0)),     # bn scale (resident)
                pl.BlockSpec((1, cout), lambda i, kk: (0, 0)),     # bn bias  (resident)
            ],
            out_specs=pl.BlockSpec((tm, cout), lambda i, kk: (i, 0)),
            scratch_shapes=[pltpu.VMEM((tm, cout), jnp.float32)],
        ),
        compiler_params=pltpu.CompilerParams(
            dimension_semantics=("parallel", "arbitrary"),
            vmem_limit_bytes=_VMEM_LIMIT,
        ),
    )(patches, w_bf16, scale, bias)
    return out.reshape(n, ho, wo, cout)


# ----------------------------------------------------------------------------
# Parameters
# ----------------------------------------------------------------------------
def make_params(ndf, nc, nb_label, key):
    ks = jax.random.split(key, 12)

    def conv_w(k, cin, cout):
        # weights_init: Conv weight ~ N(0, 0.02); stored as (kh*kw*cin, cout)
        return 0.02 * jax.random.normal(k, (4 * 4 * cin, cout), jnp.float32)

    def bn(k, c):
        gamma = 1.0 + 0.02 * jax.random.normal(k, (1, c), jnp.float32)
        beta = jnp.zeros((1, c), jnp.float32)
        eps = 1e-5
        # fold eval-mode BN (running_mean=0, running_var=1) into scale/bias
        return gamma / jnp.sqrt(1.0 + eps), beta

    p = {}
    p["w1"] = conv_w(ks[0], nc, ndf)
    p["w2"] = conv_w(ks[1], ndf, ndf * 2)
    p["bn2"] = bn(ks[2], ndf * 2)
    p["w3"] = conv_w(ks[3], ndf * 2, ndf * 4)
    p["bn3"] = bn(ks[4], ndf * 4)
    p["w4"] = conv_w(ks[5], ndf * 4, ndf * 8)
    p["bn4"] = bn(ks[6], ndf * 8)
    p["w5"] = conv_w(ks[7], ndf * 8, ndf)
    p["id5"] = (jnp.ones((1, ndf), jnp.float32), jnp.zeros((1, ndf), jnp.float32))
    # Linear heads: PyTorch default init U(-1/sqrt(in), 1/sqrt(in))
    bound = 1.0 / (ndf ** 0.5)
    p["wa"] = jax.random.uniform(ks[8], (ndf, nb_label), jnp.float32, -bound, bound)
    p["ba"] = jax.random.uniform(ks[9], (1, nb_label), jnp.float32, -bound, bound)
    p["wd"] = jax.random.uniform(ks[10], (ndf, 1), jnp.float32, -bound, bound)
    p["bd"] = jax.random.uniform(ks[11], (1, 1), jnp.float32, -bound, bound)
    return p


# ----------------------------------------------------------------------------
# netD forward
# ----------------------------------------------------------------------------
@functools.partial(jax.jit, static_argnames=("ndf",))
def netD_forward(x_nchw, params, *, ndf):
    # NCHW (PyTorch) -> NHWC (kernel layout), bf16 feed for the MXU.
    x = jnp.transpose(x_nchw, (0, 2, 3, 1)).astype(jnp.bfloat16)
    p = params

    one = lambda c: (jnp.ones((1, c), jnp.float32), jnp.zeros((1, c), jnp.float32))

    # conv1 + LeakyReLU (Dropout1 = identity in eval)
    s1, b1 = one(p["w1"].shape[-1])
    x = conv_block(x, p["w1"], s1, b1, stride=2, pad=1, act=True)
    # conv2 + BN2 + LeakyReLU
    x = conv_block(x, p["w2"], p["bn2"][0], p["bn2"][1], stride=2, pad=1, act=True)
    # conv3 + BN3 + LeakyReLU (Dropout1 = identity)
    x = conv_block(x, p["w3"], p["bn3"][0], p["bn3"][1], stride=2, pad=1, act=True)
    # conv4 + BN4 + LeakyReLU (Dropout2 = identity)
    x = conv_block(x, p["w4"], p["bn4"][0], p["bn4"][1], stride=2, pad=1, act=True)

    # conv5 (4x4, stride 1, pad 0) collapses spatial to 1x1; fuse with both heads so the
    # (N, ndf) feature never hits HBM.
    patches5, (n, ho, wo) = im2col(x, 4, 4, 1, 0)
    assert ho == 1 and wo == 1, "DCGAN geometry requires 64x64 input"
    k5 = patches5.shape[-1]
    nb_label = p["wa"].shape[-1]

    tn = n if n <= 256 else 256
    s, c = pl.pallas_call(
        conv5_heads_kernel,
        out_shape=(
            jax.ShapeDtypeStruct((n, 1), jnp.float32),
            jax.ShapeDtypeStruct((n, nb_label), jnp.float32),
        ),
        grid_spec=pltpu.PrefetchScalarGridSpec(
            num_scalar_prefetch=0,
            grid=(pl.cdiv(n, tn),),
            in_specs=[
                pl.BlockSpec((tn, k5), lambda i: (i, 0)),          # conv5 patches tile
                pl.BlockSpec((k5, ndf), lambda i: (0, 0)),         # conv5 weight (resident)
                pl.BlockSpec((ndf, nb_label), lambda i: (0, 0)),   # aux weight
                pl.BlockSpec((1, nb_label), lambda i: (0, 0)),     # aux bias
                pl.BlockSpec((ndf, 1), lambda i: (0, 0)),          # disc weight
                pl.BlockSpec((1, 1), lambda i: (0, 0)),            # disc bias
            ],
            out_specs=(
                pl.BlockSpec((tn, 1), lambda i: (i, 0)),
                pl.BlockSpec((tn, nb_label), lambda i: (i, 0)),
            ),
        ),
        compiler_params=pltpu.CompilerParams(
            dimension_semantics=("parallel",),
            vmem_limit_bytes=_VMEM_LIMIT,
        ),
    )(patches5, p["w5"].astype(jnp.bfloat16), p["wa"], p["ba"], p["wd"], p["bd"])
    return s, c


# ----------------------------------------------------------------------------
if __name__ == "__main__":
    # DCGAN geometry requires 64x64 spatial input so conv5 lands on 1x1.
    batch, nc, ndf, nb_label, spatial = 2, 3, 8, 4, 64

    key = jax.random.PRNGKey(0)
    k_x, k_p = jax.random.split(key)
    x = jax.random.normal(k_x, (batch, nc, spatial, spatial), jnp.float32)  # NCHW
    params = make_params(ndf, nc, nb_label, k_p)

    s, c = netD_forward(x, params, ndf=ndf)
    jax.block_until_ready((s, c))

    assert s.shape == (batch, 1)
    assert c.shape == (batch, nb_label)
    # softmax rows sum to ~1 (approx-reciprocal tolerance), sigmoid strictly in (0,1)
    assert bool(jnp.all(jnp.abs(jnp.sum(c, axis=-1) - 1.0) < 2e-3))
    assert bool(jnp.all((s > 0.0) & (s < 1.0)))
    print("KERNEL_OK")
</pallas_src>

<mosaic_0001>
module attributes {stable_mosaic.version = 11 : i64} {
  func.func @conv_mm_kernel(%arg0: i32, %arg1: i32, %arg2: memref<512x48xbf16, #tpu.memory_space<vmem>>, %arg3: memref<48x8xbf16, #tpu.memory_space<vmem>>, %arg4: memref<1x8xf32, #tpu.memory_space<vmem>>, %arg5: memref<1x8xf32, #tpu.memory_space<vmem>>, %arg6: memref<512x8xbf16, #tpu.memory_space<vmem>>, %arg7: memref<512x8xf32, #tpu.memory_space<vmem>>) attributes {dimension_semantics = [#tpu.dimension_semantics<parallel>, #tpu.dimension_semantics<arbitrary>], iteration_bounds = array<i64: 4, 1>, scalar_prefetch = 0 : i64, scratch_operands = 1 : i64, tpu.core_type = #tpu.core_type<tc>, window_params = [{transform_indices = @transform_0, window_bounds = array<i64: 512, 48>}, {transform_indices = @transform_1, window_bounds = array<i64: 48, 8>}, {pipeline_mode = #tpu.pipeline_mode<synchronous>, transform_indices = @transform_2, window_bounds = array<i64: 1, 8>}, {pipeline_mode = #tpu.pipeline_mode<synchronous>, transform_indices = @transform_3, window_bounds = array<i64: 1, 8>}, {transform_indices = @transform_4, window_bounds = array<i64: 512, 8>}]} {
    %c0_i32 = arith.constant 0 : i32
    %0 = arith.cmpi eq, %arg1, %c0_i32 : i32
    %1 = arith.extui %0 : i1 to i32
    %c0_i32_0 = arith.constant 0 : i32
    %2 = arith.cmpi ne, %1, %c0_i32_0 : i32
    scf.if %2 {
      %cst_10 = arith.constant 0.000000e+00 : f32
      %12 = vector.broadcast %cst_10 : f32 to vector<512x8xf32>
      %c0_11 = arith.constant 0 : index
      %c0_12 = arith.constant 0 : index
      %13 = vector.load %arg7[%c0_11, %c0_12] : memref<512x8xf32, #tpu.memory_space<vmem>>, vector<512x8xf32>
      tpu.vector_store %arg7[%c0_11, %c0_12], %12 {strides = array<i32>} : memref<512x8xf32, #tpu.memory_space<vmem>>, vector<512x8xf32>,
    } else {
    }
    %c0 = arith.constant 0 : index
    %c0_1 = arith.constant 0 : index
    %3 = vector.load %arg7[%c0, %c0_1] : memref<512x8xf32, #tpu.memory_space<vmem>>, vector<512x8xf32>
    %c0_2 = arith.constant 0 : index
    %c0_3 = arith.constant 0 : index
    %4 = vector.load %arg2[%c0_2, %c0_3] : memref<512x48xbf16, #tpu.memory_space<vmem>>, vector<512x48xbf16>
    %c0_4 = arith.constant 0 : index
    %c0_5 = arith.constant 0 : index
    %5 = vector.load %arg3[%c0_4, %c0_5] : memref<48x8xbf16, #tpu.memory_space<vmem>>, vector<48x8xbf16>
    %cst = arith.constant dense<0.000000e+00> : vector<512x8xf32>
    %6 = tpu.matmul %4, %5, %cst {dimension_numbers = #tpu.dot_dimension_numbers<[1], [0], [0], [1], [0, 0, 1, 1], [], []>} : vector<512x48xbf16>, vector<48x8xbf16>, vector<512x8xf32> -> vector<512x8xf32>
    %7 = arith.addf %3, %6 : vector<512x8xf32>
    %c0_6 = arith.constant 0 : index
    %c0_7 = arith.constant 0 : index
    %8 = vector.load %arg7[%c0_6, %c0_7] : memref<512x8xf32, #tpu.memory_space<vmem>>, vector<512x8xf32>
    tpu.vector_store %arg7[%c0_6, %c0_7], %7 {strides = array<i32>} : memref<512x8xf32, #tpu.memory_space<vmem>>, vector<512x8xf32>,
    %c0_i32_8 = arith.constant 0 : i32
    %9 = arith.cmpi eq, %arg1, %c0_i32_8 : i32
    %10 = arith.extui %9 : i1 to i32
    %c0_i32_9 = arith.constant 0 : i32
    %11 = arith.cmpi ne, %10, %c0_i32_9 : i32
    scf.if %11 {
      %c0_10 = arith.constant 0 : index
      %c0_11 = arith.constant 0 : index
      %12 = vector.load %arg7[%c0_10, %c0_11] : memref<512x8xf32, #tpu.memory_space<vmem>>, vector<512x8xf32>
      %c0_12 = arith.constant 0 : index
      %c0_13 = arith.constant 0 : index
      %13 = vector.load %arg4[%c0_12, %c0_13] : memref<1x8xf32, #tpu.memory_space<vmem>>, vector<1x8xf32>
      %14 = vector.broadcast %13 : vector<1x8xf32> to vector<512x8xf32>
      %15 = arith.mulf %12, %14 : vector<512x8xf32>
      %c0_14 = arith.constant 0 : index
      %c0_15 = arith.constant 0 : index
      %16 = vector.load %arg5[%c0_14, %c0_15] : memref<1x8xf32, #tpu.memory_space<vmem>>, vector<1x8xf32>
      %17 = vector.broadcast %16 : vector<1x8xf32> to vector<512x8xf32>
      %18 = arith.addf %15, %17 : vector<512x8xf32>
      %cst_16 = arith.constant 0.000000e+00 : f32
      %19 = vector.broadcast %cst_16 : f32 to vector<512x8xf32>
      %20 = arith.cmpf ogt, %18, %19 : vector<512x8xf32>
      %cst_17 = arith.constant 2.000000e-01 : f32
      %21 = vector.broadcast %cst_17 : f32 to vector<512x8xf32>
      %22 = arith.mulf %21, %18 : vector<512x8xf32>
      %23 = arith.select %20, %18, %22 : vector<512x8xi1>, vector<512x8xf32>
      %24 = arith.truncf %23 : vector<512x8xf32> to vector<512x8xbf16>
      %c0_18 = arith.constant 0 : index
      %c0_19 = arith.constant 0 : index
      %25 = vector.load %arg6[%c0_18, %c0_19] : memref<512x8xbf16, #tpu.memory_space<vmem>>, vector<512x8xbf16>
      tpu.vector_store %arg6[%c0_18, %c0_19], %24 {strides = array<i32>} : memref<512x8xbf16, #tpu.memory_space<vmem>>, vector<512x8xbf16>,
    } else {
    }
    return
  }
  func.func @transform_0(%arg0: i32, %arg1: i32) -> (i32, i32) {
    %c0_i32 = arith.constant 0 : i32
    return %arg0, %arg1 : i32, i32
  }
  func.func @transform_1(%arg0: i32, %arg1: i32) -> (i32, i32) {
    %c0_i32 = arith.constant 0 : i32
    %c0_i32_0 = arith.constant 0 : i32
    return %arg1, %c0_i32 : i32, i32
  }
  func.func @transform_2(%arg0: i32, %arg1: i32) -> (i32, i32) {
    %c0_i32 = arith.constant 0 : i32
    %c0_i32_0 = arith.constant 0 : i32
    %c0_i32_1 = arith.constant 0 : i32
    return %c0_i32, %c0_i32_0 : i32, i32
  }
  func.func @transform_3(%arg0: i32, %arg1: i32) -> (i32, i32) {
    %c0_i32 = arith.constant 0 : i32
    %c0_i32_0 = arith.constant 0 : i32
    %c0_i32_1 = arith.constant 0 : i32
    return %c0_i32, %c0_i32_0 : i32, i32
  }
  func.func @transform_4(%arg0: i32, %arg1: i32) -> (i32, i32) {
    %c0_i32 = arith.constant 0 : i32
    %c0_i32_0 = arith.constant 0 : i32
    return %arg0, %c0_i32 : i32, i32
  }
}

module attributes {stable_mosaic.version = 11 : i64} {
  func.func @conv_mm_kernel(%arg0: i32, %arg1: i32, %arg2: memref<512x128xbf16, #tpu.memory_space<vmem>>, %arg3: memref<128x16xbf16, #tpu.memory_space<vmem>>, %arg4: memref<1x16xf32, #tpu.memory_space<vmem>>, %arg5: memref<1x16xf32, #tpu.memory_space<vmem>>, %arg6: memref<512x16xbf16, #tpu.memory_space<vmem>>, %arg7: memref<512x16xf32, #tpu.memory_space<vmem>>) attributes {dimension_semantics = [#tpu.dimension_semantics<parallel>, #tpu.dimension_semantics<arbitrary>], iteration_bounds = array<i64: 1, 1>, scalar_prefetch = 0 : i64, scratch_operands = 1 : i64, tpu.core_type = #tpu.core_type<tc>, window_params = [{transform_indices = @transform_0, window_bounds = array<i64: 512, 128>}, {transform_indices = @transform_1, window_bounds = array<i64: 128, 16>}, {pipeline_mode = #tpu.pipeline_mode<synchronous>, transform_indices = @transform_2, window_bounds = array<i64: 1, 16>}, {pipeline_mode = #tpu.pipeline_mode<synchronous>, transform_indices = @transform_3, window_bounds = array<i64: 1, 16>}, {transform_indices = @transform_4, window_bounds = array<i64: 512, 16>}]} {
    %c0_i32 = arith.constant 0 : i32
    %0 = arith.cmpi eq, %arg1, %c0_i32 : i32
    %1 = arith.extui %0 : i1 to i32
    %c0_i32_0 = arith.constant 0 : i32
    %2 = arith.cmpi ne, %1, %c0_i32_0 : i32
    scf.if %2 {
      %cst_10 = arith.constant 0.000000e+00 : f32
      %12 = vector.broadcast %cst_10 : f32 to vector<512x16xf32>
      %c0_11 = arith.constant 0 : index
      %c0_12 = arith.constant 0 : index
      %13 = vector.load %arg7[%c0_11, %c0_12] : memref<512x16xf32, #tpu.memory_space<vmem>>, vector<512x16xf32>
      tpu.vector_store %arg7[%c0_11, %c0_12], %12 {strides = array<i32>} : memref<512x16xf32, #tpu.memory_space<vmem>>, vector<512x16xf32>,
    } else {
    }
    %c0 = arith.constant 0 : index
    %c0_1 = arith.constant 0 : index
    %3 = vector.load %arg7[%c0, %c0_1] : memref<512x16xf32, #tpu.memory_space<vmem>>, vector<512x16xf32>
    %c0_2 = arith.constant 0 : index
    %c0_3 = arith.constant 0 : index
    %4 = vector.load %arg2[%c0_2, %c0_3] : memref<512x128xbf16, #tpu.memory_space<vmem>>, vector<512x128xbf16>
    %c0_4 = arith.constant 0 : index
    %c0_5 = arith.constant 0 : index
    %5 = vector.load %arg3[%c0_4, %c0_5] : memref<128x16xbf16, #tpu.memory_space<vmem>>, vector<128x16xbf16>
    %cst = arith.constant dense<0.000000e+00> : vector<512x16xf32>
    %6 = tpu.matmul %4, %5, %cst {dimension_numbers = #tpu.dot_dimension_numbers<[1], [0], [0], [1], [0, 0, 1, 1], [], []>} : vector<512x128xbf16>, vector<128x16xbf16>, vector<512x16xf32> -> vector<512x16xf32>
    %7 = arith.addf %3, %6 : vector<512x16xf32>
    %c0_6 = arith.constant 0 : index
    %c0_7 = arith.constant 0 : index
    %8 = vector.load %arg7[%c0_6, %c0_7] : memref<512x16xf32, #tpu.memory_space<vmem>>, vector<512x16xf32>
    tpu.vector_store %arg7[%c0_6, %c0_7], %7 {strides = array<i32>} : memref<512x16xf32, #tpu.memory_space<vmem>>, vector<512x16xf32>,
    %c0_i32_8 = arith.constant 0 : i32
    %9 = arith.cmpi eq, %arg1, %c0_i32_8 : i32
    %10 = arith.extui %9 : i1 to i32
    %c0_i32_9 = arith.constant 0 : i32
    %11 = arith.cmpi ne, %10, %c0_i32_9 : i32
    scf.if %11 {
      %c0_10 = arith.constant 0 : index
      %c0_11 = arith.constant 0 : index
      %12 = vector.load %arg7[%c0_10, %c0_11] : memref<512x16xf32, #tpu.memory_space<vmem>>, vector<512x16xf32>
      %c0_12 = arith.constant 0 : index
      %c0_13 = arith.constant 0 : index
      %13 = vector.load %arg4[%c0_12, %c0_13] : memref<1x16xf32, #tpu.memory_space<vmem>>, vector<1x16xf32>
      %14 = vector.broadcast %13 : vector<1x16xf32> to vector<512x16xf32>
      %15 = arith.mulf %12, %14 : vector<512x16xf32>
      %c0_14 = arith.constant 0 : index
      %c0_15 = arith.constant 0 : index
      %16 = vector.load %arg5[%c0_14, %c0_15] : memref<1x16xf32, #tpu.memory_space<vmem>>, vector<1x16xf32>
      %17 = vector.broadcast %16 : vector<1x16xf32> to vector<512x16xf32>
      %18 = arith.addf %15, %17 : vector<512x16xf32>
      %cst_16 = arith.constant 0.000000e+00 : f32
      %19 = vector.broadcast %cst_16 : f32 to vector<512x16xf32>
      %20 = arith.cmpf ogt, %18, %19 : vector<512x16xf32>
      %cst_17 = arith.constant 2.000000e-01 : f32
      %21 = vector.broadcast %cst_17 : f32 to vector<512x16xf32>
      %22 = arith.mulf %21, %18 : vector<512x16xf32>
      %23 = arith.select %20, %18, %22 : vector<512x16xi1>, vector<512x16xf32>
      %24 = arith.truncf %23 : vector<512x16xf32> to vector<512x16xbf16>
      %c0_18 = arith.constant 0 : index
      %c0_19 = arith.constant 0 : index
      %25 = vector.load %arg6[%c0_18, %c0_19] : memref<512x16xbf16, #tpu.memory_space<vmem>>, vector<512x16xbf16>
      tpu.vector_store %arg6[%c0_18, %c0_19], %24 {strides = array<i32>} : memref<512x16xbf16, #tpu.memory_space<vmem>>, vector<512x16xbf16>,
    } else {
    }
    return
  }
  func.func @transform_0(%arg0: i32, %arg1: i32) -> (i32, i32) {
    %c0_i32 = arith.constant 0 : i32
    return %arg0, %arg1 : i32, i32
  }
  func.func @transform_1(%arg0: i32, %arg1: i32) -> (i32, i32) {
    %c0_i32 = arith.constant 0 : i32
    %c0_i32_0 = arith.constant 0 : i32
    return %arg1, %c0_i32 : i32, i32
  }
  func.func @transform_2(%arg0: i32, %arg1: i32) -> (i32, i32) {
    %c0_i32 = arith.constant 0 : i32
    %c0_i32_0 = arith.constant 0 : i32
    %c0_i32_1 = arith.constant 0 : i32
    return %c0_i32, %c0_i32_0 : i32, i32
  }
  func.func @transform_3(%arg0: i32, %arg1: i32) -> (i32, i32) {
    %c0_i32 = arith.constant 0 : i32
    %c0_i32_0 = arith.constant 0 : i32
    %c0_i32_1 = arith.constant 0 : i32
    return %c0_i32, %c0_i32_0 : i32, i32
  }
  func.func @transform_4(%arg0: i32, %arg1: i32) -> (i32, i32) {
    %c0_i32 = arith.constant 0 : i32
    %c0_i32_0 = arith.constant 0 : i32
    return %arg0, %c0_i32 : i32, i32
  }
}

module attributes {stable_mosaic.version = 11 : i64} {
  func.func @conv_mm_kernel(%arg0: i32, %arg1: i32, %arg2: memref<128x256xbf16, #tpu.memory_space<vmem>>, %arg3: memref<256x32xbf16, #tpu.memory_space<vmem>>, %arg4: memref<1x32xf32, #tpu.memory_space<vmem>>, %arg5: memref<1x32xf32, #tpu.memory_space<vmem>>, %arg6: memref<128x32xbf16, #tpu.memory_space<vmem>>, %arg7: memref<128x32xf32, #tpu.memory_space<vmem>>) attributes {dimension_semantics = [#tpu.dimension_semantics<parallel>, #tpu.dimension_semantics<arbitrary>], iteration_bounds = array<i64: 1, 1>, scalar_prefetch = 0 : i64, scratch_operands = 1 : i64, tpu.core_type = #tpu.core_type<tc>, window_params = [{transform_indices = @transform_0, window_bounds = array<i64: 128, 256>}, {transform_indices = @transform_1, window_bounds = array<i64: 256, 32>}, {pipeline_mode = #tpu.pipeline_mode<synchronous>, transform_indices = @transform_2, window_bounds = array<i64: 1, 32>}, {pipeline_mode = #tpu.pipeline_mode<synchronous>, transform_indices = @transform_3, window_bounds = array<i64: 1, 32>}, {transform_indices = @transform_4, window_bounds = array<i64: 128, 32>}]} {
    %c0_i32 = arith.constant 0 : i32
    %0 = arith.cmpi eq, %arg1, %c0_i32 : i32
    %1 = arith.extui %0 : i1 to i32
    %c0_i32_0 = arith.constant 0 : i32
    %2 = arith.cmpi ne, %1, %c0_i32_0 : i32
    scf.if %2 {
      %cst_10 = arith.constant 0.000000e+00 : f32
      %12 = vector.broadcast %cst_10 : f32 to vector<128x32xf32>
      %c0_11 = arith.constant 0 : index
      %c0_12 = arith.constant 0 : index
      %13 = vector.load %arg7[%c0_11, %c0_12] : memref<128x32xf32, #tpu.memory_space<vmem>>, vector<128x32xf32>
      tpu.vector_store %arg7[%c0_11, %c0_12], %12 {strides = array<i32>} : memref<128x32xf32, #tpu.memory_space<vmem>>, vector<128x32xf32>,
    } else {
    }
    %c0 = arith.constant 0 : index
    %c0_1 = arith.constant 0 : index
    %3 = vector.load %arg7[%c0, %c0_1] : memref<128x32xf32, #tpu.memory_space<vmem>>, vector<128x32xf32>
    %c0_2 = arith.constant 0 : index
    %c0_3 = arith.constant 0 : index
    %4 = vector.load %arg2[%c0_2, %c0_3] : memref<128x256xbf16, #tpu.memory_space<vmem>>, vector<128x256xbf16>
    %c0_4 = arith.constant 0 : index
    %c0_5 = arith.constant 0 : index
    %5 = vector.load %arg3[%c0_4, %c0_5] : memref<256x32xbf16, #tpu.memory_space<vmem>>, vector<256x32xbf16>
    %cst = arith.constant dense<0.000000e+00> : vector<128x32xf32>
    %6 = tpu.matmul %4, %5, %cst {dimension_numbers = #tpu.dot_dimension_numbers<[1], [0], [0], [1], [0, 0, 1, 1], [], []>} : vector<128x256xbf16>, vector<256x32xbf16>, vector<128x32xf32> -> vector<128x32xf32>
    %7 = arith.addf %3, %6 : vector<128x32xf32>
    %c0_6 = arith.constant 0 : index
    %c0_7 = arith.constant 0 : index
    %8 = vector.load %arg7[%c0_6, %c0_7] : memref<128x32xf32, #tpu.memory_space<vmem>>, vector<128x32xf32>
    tpu.vector_store %arg7[%c0_6, %c0_7], %7 {strides = array<i32>} : memref<128x32xf32, #tpu.memory_space<vmem>>, vector<128x32xf32>,
    %c0_i32_8 = arith.constant 0 : i32
    %9 = arith.cmpi eq, %arg1, %c0_i32_8 : i32
    %10 = arith.extui %9 : i1 to i32
    %c0_i32_9 = arith.constant 0 : i32
    %11 = arith.cmpi ne, %10, %c0_i32_9 : i32
    scf.if %11 {
      %c0_10 = arith.constant 0 : index
      %c0_11 = arith.constant 0 : index
      %12 = vector.load %arg7[%c0_10, %c0_11] : memref<128x32xf32, #tpu.memory_space<vmem>>, vector<128x32xf32>
      %c0_12 = arith.constant 0 : index
      %c0_13 = arith.constant 0 : index
      %13 = vector.load %arg4[%c0_12, %c0_13] : memref<1x32xf32, #tpu.memory_space<vmem>>, vector<1x32xf32>
      %14 = vector.broadcast %13 : vector<1x32xf32> to vector<128x32xf32>
      %15 = arith.mulf %12, %14 : vector<128x32xf32>
      %c0_14 = arith.constant 0 : index
      %c0_15 = arith.constant 0 : index
      %16 = vector.load %arg5[%c0_14, %c0_15] : memref<1x32xf32, #tpu.memory_space<vmem>>, vector<1x32xf32>
      %17 = vector.broadcast %16 : vector<1x32xf32> to vector<128x32xf32>
      %18 = arith.addf %15, %17 : vector<128x32xf32>
      %cst_16 = arith.constant 0.000000e+00 : f32
      %19 = vector.broadcast %cst_16 : f32 to vector<128x32xf32>
      %20 = arith.cmpf ogt, %18, %19 : vector<128x32xf32>
      %cst_17 = arith.constant 2.000000e-01 : f32
      %21 = vector.broadcast %cst_17 : f32 to vector<128x32xf32>
      %22 = arith.mulf %21, %18 : vector<128x32xf32>
      %23 = arith.select %20, %18, %22 : vector<128x32xi1>, vector<128x32xf32>
      %24 = arith.truncf %23 : vector<128x32xf32> to vector<128x32xbf16>
      %c0_18 = arith.constant 0 : index
      %c0_19 = arith.constant 0 : index
      %25 = vector.load %arg6[%c0_18, %c0_19] : memref<128x32xbf16, #tpu.memory_space<vmem>>, vector<128x32xbf16>
      tpu.vector_store %arg6[%c0_18, %c0_19], %24 {strides = array<i32>} : memref<128x32xbf16, #tpu.memory_space<vmem>>, vector<128x32xbf16>,
    } else {
    }
    return
  }
  func.func @transform_0(%arg0: i32, %arg1: i32) -> (i32, i32) {
    %c0_i32 = arith.constant 0 : i32
    return %arg0, %arg1 : i32, i32
  }
  func.func @transform_1(%arg0: i32, %arg1: i32) -> (i32, i32) {
    %c0_i32 = arith.constant 0 : i32
    %c0_i32_0 = arith.constant 0 : i32
    return %arg1, %c0_i32 : i32, i32
  }
  func.func @transform_2(%arg0: i32, %arg1: i32) -> (i32, i32) {
    %c0_i32 = arith.constant 0 : i32
    %c0_i32_0 = arith.constant 0 : i32
    %c0_i32_1 = arith.constant 0 : i32
    return %c0_i32, %c0_i32_0 : i32, i32
  }
  func.func @transform_3(%arg0: i32, %arg1: i32) -> (i32, i32) {
    %c0_i32 = arith.constant 0 : i32
    %c0_i32_0 = arith.constant 0 : i32
    %c0_i32_1 = arith.constant 0 : i32
    return %c0_i32, %c0_i32_0 : i32, i32
  }
  func.func @transform_4(%arg0: i32, %arg1: i32) -> (i32, i32) {
    %c0_i32 = arith.constant 0 : i32
    %c0_i32_0 = arith.constant 0 : i32
    return %arg0, %c0_i32 : i32, i32
  }
}

module attributes {stable_mosaic.version = 11 : i64} {
  func.func @conv_mm_kernel(%arg0: i32, %arg1: i32, %arg2: memref<32x512xbf16, #tpu.memory_space<vmem>>, %arg3: memref<512x64xbf16, #tpu.memory_space<vmem>>, %arg4: memref<1x64xf32, #tpu.memory_space<vmem>>, %arg5: memref<1x64xf32, #tpu.memory_space<vmem>>, %arg6: memref<32x64xbf16, #tpu.memory_space<vmem>>, %arg7: memref<32x64xf32, #tpu.memory_space<vmem>>) attributes {dimension_semantics = [#tpu.dimension_semantics<parallel>, #tpu.dimension_semantics<arbitrary>], iteration_bounds = array<i64: 1, 1>, scalar_prefetch = 0 : i64, scratch_operands = 1 : i64, tpu.core_type = #tpu.core_type<tc>, window_params = [{transform_indices = @transform_0, window_bounds = array<i64: 32, 512>}, {transform_indices = @transform_1, window_bounds = array<i64: 512, 64>}, {pipeline_mode = #tpu.pipeline_mode<synchronous>, transform_indices = @transform_2, window_bounds = array<i64: 1, 64>}, {pipeline_mode = #tpu.pipeline_mode<synchronous>, transform_indices = @transform_3, window_bounds = array<i64: 1, 64>}, {transform_indices = @transform_4, window_bounds = array<i64: 32, 64>}]} {
    %c0_i32 = arith.constant 0 : i32
    %0 = arith.cmpi eq, %arg1, %c0_i32 : i32
    %1 = arith.extui %0 : i1 to i32
    %c0_i32_0 = arith.constant 0 : i32
    %2 = arith.cmpi ne, %1, %c0_i32_0 : i32
    scf.if %2 {
      %cst_10 = arith.constant 0.000000e+00 : f32
      %12 = vector.broadcast %cst_10 : f32 to vector<32x64xf32>
      %c0_11 = arith.constant 0 : index
      %c0_12 = arith.constant 0 : index
      %13 = vector.load %arg7[%c0_11, %c0_12] : memref<32x64xf32, #tpu.memory_space<vmem>>, vector<32x64xf32>
      tpu.vector_store %arg7[%c0_11, %c0_12], %12 {strides = array<i32>} : memref<32x64xf32, #tpu.memory_space<vmem>>, vector<32x64xf32>,
    } else {
    }
    %c0 = arith.constant 0 : index
    %c0_1 = arith.constant 0 : index
    %3 = vector.load %arg7[%c0, %c0_1] : memref<32x64xf32, #tpu.memory_space<vmem>>, vector<32x64xf32>
    %c0_2 = arith.constant 0 : index
    %c0_3 = arith.constant 0 : index
    %4 = vector.load %arg2[%c0_2, %c0_3] : memref<32x512xbf16, #tpu.memory_space<vmem>>, vector<32x512xbf16>
    %c0_4 = arith.constant 0 : index
    %c0_5 = arith.constant 0 : index
    %5 = vector.load %arg3[%c0_4, %c0_5] : memref<512x64xbf16, #tpu.memory_space<vmem>>, vector<512x64xbf16>
    %cst = arith.constant dense<0.000000e+00> : vector<32x64xf32>
    %6 = tpu.matmul %4, %5, %cst {dimension_numbers = #tpu.dot_dimension_numbers<[1], [0], [0], [1], [0, 0, 1, 1], [], []>} : vector<32x512xbf16>, vector<512x64xbf16>, vector<32x64xf32> -> vector<32x64xf32>
    %7 = arith.addf %3, %6 : vector<32x64xf32>
    %c0_6 = arith.constant 0 : index
    %c0_7 = arith.constant 0 : index
    %8 = vector.load %arg7[%c0_6, %c0_7] : memref<32x64xf32, #tpu.memory_space<vmem>>, vector<32x64xf32>
    tpu.vector_store %arg7[%c0_6, %c0_7], %7 {strides = array<i32>} : memref<32x64xf32, #tpu.memory_space<vmem>>, vector<32x64xf32>,
    %c0_i32_8 = arith.constant 0 : i32
    %9 = arith.cmpi eq, %arg1, %c0_i32_8 : i32
    %10 = arith.extui %9 : i1 to i32
    %c0_i32_9 = arith.constant 0 : i32
    %11 = arith.cmpi ne, %10, %c0_i32_9 : i32
    scf.if %11 {
      %c0_10 = arith.constant 0 : index
      %c0_11 = arith.constant 0 : index
      %12 = vector.load %arg7[%c0_10, %c0_11] : memref<32x64xf32, #tpu.memory_space<vmem>>, vector<32x64xf32>
      %c0_12 = arith.constant 0 : index
      %c0_13 = arith.constant 0 : index
      %13 = vector.load %arg4[%c0_12, %c0_13] : memref<1x64xf32, #tpu.memory_space<vmem>>, vector<1x64xf32>
      %14 = vector.broadcast %13 : vector<1x64xf32> to vector<32x64xf32>
      %15 = arith.mulf %12, %14 : vector<32x64xf32>
      %c0_14 = arith.constant 0 : index
      %c0_15 = arith.constant 0 : index
      %16 = vector.load %arg5[%c0_14, %c0_15] : memref<1x64xf32, #tpu.memory_space<vmem>>, vector<1x64xf32>
      %17 = vector.broadcast %16 : vector<1x64xf32> to vector<32x64xf32>
      %18 = arith.addf %15, %17 : vector<32x64xf32>
      %cst_16 = arith.constant 0.000000e+00 : f32
      %19 = vector.broadcast %cst_16 : f32 to vector<32x64xf32>
      %20 = arith.cmpf ogt, %18, %19 : vector<32x64xf32>
      %cst_17 = arith.constant 2.000000e-01 : f32
      %21 = vector.broadcast %cst_17 : f32 to vector<32x64xf32>
      %22 = arith.mulf %21, %18 : vector<32x64xf32>
      %23 = arith.select %20, %18, %22 : vector<32x64xi1>, vector<32x64xf32>
      %24 = arith.truncf %23 : vector<32x64xf32> to vector<32x64xbf16>
      %c0_18 = arith.constant 0 : index
      %c0_19 = arith.constant 0 : index
      %25 = vector.load %arg6[%c0_18, %c0_19] : memref<32x64xbf16, #tpu.memory_space<vmem>>, vector<32x64xbf16>
      tpu.vector_store %arg6[%c0_18, %c0_19], %24 {strides = array<i32>} : memref<32x64xbf16, #tpu.memory_space<vmem>>, vector<32x64xbf16>,
    } else {
    }
    return
  }
  func.func @transform_0(%arg0: i32, %arg1: i32) -> (i32, i32) {
    %c0_i32 = arith.constant 0 : i32
    return %arg0, %arg1 : i32, i32
  }
  func.func @transform_1(%arg0: i32, %arg1: i32) -> (i32, i32) {
    %c0_i32 = arith.constant 0 : i32
    %c0_i32_0 = arith.constant 0 : i32
    return %arg1, %c0_i32 : i32, i32
  }
  func.func @transform_2(%arg0: i32, %arg1: i32) -> (i32, i32) {
    %c0_i32 = arith.constant 0 : i32
    %c0_i32_0 = arith.constant 0 : i32
    %c0_i32_1 = arith.constant 0 : i32
    return %c0_i32, %c0_i32_0 : i32, i32
  }
  func.func @transform_3(%arg0: i32, %arg1: i32) -> (i32, i32) {
    %c0_i32 = arith.constant 0 : i32
    %c0_i32_0 = arith.constant 0 : i32
    %c0_i32_1 = arith.constant 0 : i32
    return %c0_i32, %c0_i32_0 : i32, i32
  }
  func.func @transform_4(%arg0: i32, %arg1: i32) -> (i32, i32) {
    %c0_i32 = arith.constant 0 : i32
    %c0_i32_0 = arith.constant 0 : i32
    return %arg0, %c0_i32 : i32, i32
  }
}

module attributes {stable_mosaic.version = 11 : i64} {
  func.func @conv5_heads_kernel(%arg0: i32, %arg1: memref<2x1024xbf16, #tpu.memory_space<vmem>>, %arg2: memref<1024x8xbf16, #tpu.memory_space<vmem>>, %arg3: memref<8x4xf32, #tpu.memory_space<vmem>>, %arg4: memref<1x4xf32, #tpu.memory_space<vmem>>, %arg5: memref<8x1xf32, #tpu.memory_space<vmem>>, %arg6: memref<1x1xf32, #tpu.memory_space<vmem>>, %arg7: memref<2x1xf32, #tpu.memory_space<vmem>>, %arg8: memref<2x4xf32, #tpu.memory_space<vmem>>) attributes {dimension_semantics = [#tpu.dimension_semantics<parallel>], iteration_bounds = array<i64: 1>, scalar_prefetch = 0 : i64, scratch_operands = 0 : i64, tpu.core_type = #tpu.core_type<tc>, window_params = [{transform_indices = @transform_0, window_bounds = array<i64: 2, 1024>}, {pipeline_mode = #tpu.pipeline_mode<synchronous>, transform_indices = @transform_1, window_bounds = array<i64: 1024, 8>}, {pipeline_mode = #tpu.pipeline_mode<synchronous>, transform_indices = @transform_2, window_bounds = array<i64: 8, 4>}, {pipeline_mode = #tpu.pipeline_mode<synchronous>, transform_indices = @transform_3, window_bounds = array<i64: 1, 4>}, {pipeline_mode = #tpu.pipeline_mode<synchronous>, transform_indices = @transform_4, window_bounds = array<i64: 8, 1>}, {pipeline_mode = #tpu.pipeline_mode<synchronous>, transform_indices = @transform_5, window_bounds = array<i64: 1, 1>}, {transform_indices = @transform_6, window_bounds = array<i64: 2, 1>}, {transform_indices = @transform_7, window_bounds = array<i64: 2, 4>}]} {
    %c0 = arith.constant 0 : index
    %c0_0 = arith.constant 0 : index
    %0 = vector.load %arg1[%c0, %c0_0] : memref<2x1024xbf16, #tpu.memory_space<vmem>>, vector<2x1024xbf16>
    %c0_1 = arith.constant 0 : index
    %c0_2 = arith.constant 0 : index
    %1 = vector.load %arg2[%c0_1, %c0_2] : memref<1024x8xbf16, #tpu.memory_space<vmem>>, vector<1024x8xbf16>
    %cst = arith.constant dense<0.000000e+00> : vector<2x8xf32>
    %2 = tpu.matmul %0, %1, %cst {dimension_numbers = #tpu.dot_dimension_numbers<[1], [0], [0], [1], [0, 0, 1, 1], [], []>} : vector<2x1024xbf16>, vector<1024x8xbf16>, vector<2x8xf32> -> vector<2x8xf32>
    %c0_3 = arith.constant 0 : index
    %c0_4 = arith.constant 0 : index
    %3 = vector.load %arg3[%c0_3, %c0_4] : memref<8x4xf32, #tpu.memory_space<vmem>>, vector<8x4xf32>
    %cst_5 = arith.constant dense<0.000000e+00> : vector<2x4xf32>
    %4 = tpu.matmul %2, %3, %cst_5 {dimension_numbers = #tpu.dot_dimension_numbers<[1], [0], [0], [1], [0, 0, 1, 1], [], []>} : vector<2x8xf32>, vector<8x4xf32>, vector<2x4xf32> -> vector<2x4xf32>
    %c0_6 = arith.constant 0 : index
    %c0_7 = arith.constant 0 : index
    %5 = vector.load %arg4[%c0_6, %c0_7] : memref<1x4xf32, #tpu.memory_space<vmem>>, vector<1x4xf32>
    %6 = vector.broadcast %5 : vector<1x4xf32> to vector<2x4xf32>
    %7 = arith.addf %4, %6 : vector<2x4xf32>
    %cst_8 = arith.constant dense<0xFF800000> : vector<2xf32>
    %8 = vector.multi_reduction <maximumf>, %7, %cst_8 [1] : vector<2x4xf32> to vector<2xf32>
    %9 = vector.shape_cast %8 : vector<2xf32> to vector<2x1xf32>
    %10 = vector.broadcast %9 : vector<2x1xf32> to vector<2x4xf32>
    %11 = arith.subf %7, %10 : vector<2x4xf32>
    %12 = math.exp %11 : vector<2x4xf32>
    %cst_9 = arith.constant dense<0.000000e+00> : vector<2xf32>
    %13 = vector.multi_reduction <add>, %12, %cst_9 [1] : vector<2x4xf32> to vector<2xf32>
    %14 = vector.shape_cast %13 : vector<2xf32> to vector<2x1xf32>
    %15 = tpu.reciprocal %14 {approx = true} : vector<2x1xf32> -> vector<2x1xf32>
    %16 = vector.broadcast %15 : vector<2x1xf32> to vector<2x4xf32>
    %17 = arith.mulf %12, %16 : vector<2x4xf32>
    %c0_10 = arith.constant 0 : index
    %c0_11 = arith.constant 0 : index
    %18 = vector.load %arg8[%c0_10, %c0_11] : memref<2x4xf32, #tpu.memory_space<vmem>>, vector<2x4xf32>
    tpu.vector_store %arg8[%c0_10, %c0_11], %17 {strides = array<i32>} : memref<2x4xf32, #tpu.memory_space<vmem>>, vector<2x4xf32>,
    %c0_12 = arith.constant 0 : index
    %c0_13 = arith.constant 0 : index
    %19 = vector.load %arg5[%c0_12, %c0_13] : memref<8x1xf32, #tpu.memory_space<vmem>>, vector<8x1xf32>
    %cst_14 = arith.constant dense<0.000000e+00> : vector<2x1xf32>
    %20 = tpu.matmul %2, %19, %cst_14 {dimension_numbers = #tpu.dot_dimension_numbers<[1], [0], [0], [1], [0, 0, 1, 1], [], []>} : vector<2x8xf32>, vector<8x1xf32>, vector<2x1xf32> -> vector<2x1xf32>
    %c0_15 = arith.constant 0 : index
    %c0_16 = arith.constant 0 : index
    %21 = vector.load %arg6[%c0_15, %c0_16] : memref<1x1xf32, #tpu.memory_space<vmem>>, vector<1x1xf32>
    %22 = vector.broadcast %21 : vector<1x1xf32> to vector<2x1xf32>
    %23 = arith.addf %20, %22 : vector<2x1xf32>
    %cst_17 = arith.constant 0.000000e+00 : f32
    %24 = vector.broadcast %cst_17 : f32 to vector<2x1xf32>
    %25 = arith.subf %24, %23 : vector<2x1xf32>
    %26 = math.exp %25 : vector<2x1xf32>
    %cst_18 = arith.constant 1.000000e+00 : f32
    %27 = vector.broadcast %cst_18 : f32 to vector<2x1xf32>
    %28 = arith.addf %27, %26 : vector<2x1xf32>
    %29 = tpu.reciprocal %28 {approx = true} : vector<2x1xf32> -> vector<2x1xf32>
    %30 = math.exp %23 : vector<2x1xf32>
    %cst_19 = arith.constant 1.000000e+00 : f32
    %31 = vector.broadcast %cst_19 : f32 to vector<2x1xf32>
    %32 = arith.addf %31, %30 : vector<2x1xf32>
    %33 = tpu.reciprocal %32 {approx = true} : vector<2x1xf32> -> vector<2x1xf32>
    %34 = arith.mulf %30, %33 : vector<2x1xf32>
    %cst_20 = arith.constant 0.000000e+00 : f32
    %35 = vector.broadcast %cst_20 : f32 to vector<2x1xf32>
    %36 = arith.cmpf oge, %23, %35 : vector<2x1xf32>
    %37 = arith.select %36, %29, %34 : vector<2x1xi1>, vector<2x1xf32>
    %c0_21 = arith.constant 0 : index
    %c0_22 = arith.constant 0 : index
    %38 = vector.load %arg7[%c0_21, %c0_22] : memref<2x1xf32, #tpu.memory_space<vmem>>, vector<2x1xf32>
    tpu.vector_store %arg7[%c0_21, %c0_22], %37 {strides = array<i32>} : memref<2x1xf32, #tpu.memory_space<vmem>>, vector<2x1xf32>,
    return
  }
  func.func @transform_0(%arg0: i32) -> (i32, i32) {
    %c0_i32 = arith.constant 0 : i32
    %c0_i32_0 = arith.constant 0 : i32
    return %arg0, %c0_i32 : i32, i32
  }
  func.func @transform_1(%arg0: i32) -> (i32, i32) {
    %c0_i32 = arith.constant 0 : i32
    %c0_i32_0 = arith.constant 0 : i32
    %c0_i32_1 = arith.constant 0 : i32
    return %c0_i32, %c0_i32_0 : i32, i32
  }
  func.func @transform_2(%arg0: i32) -> (i32, i32) {
    %c0_i32 = arith.constant 0 : i32
    %c0_i32_0 = arith.constant 0 : i32
    %c0_i32_1 = arith.constant 0 : i32
    return %c0_i32, %c0_i32_0 : i32, i32
  }
  func.func @transform_3(%arg0: i32) -> (i32, i32) {
    %c0_i32 = arith.constant 0 : i32
    %c0_i32_0 = arith.constant 0 : i32
    %c0_i32_1 = arith.constant 0 : i32
    return %c0_i32, %c0_i32_0 : i32, i32
  }
  func.func @transform_4(%arg0: i32) -> (i32, i32) {
    %c0_i32 = arith.constant 0 : i32
    %c0_i32_0 = arith.constant 0 : i32
    %c0_i32_1 = arith.constant 0 : i32
    return %c0_i32, %c0_i32_0 : i32, i32
  }
  func.func @transform_5(%arg0: i32) -> (i32, i32) {
    %c0_i32 = arith.constant 0 : i32
    %c0_i32_0 = arith.constant 0 : i32
    %c0_i32_1 = arith.constant 0 : i32
    return %c0_i32, %c0_i32_0 : i32, i32
  }
  func.func @transform_6(%arg0: i32) -> (i32, i32) {
    %c0_i32 = arith.constant 0 : i32
    %c0_i32_0 = arith.constant 0 : i32
    return %arg0, %c0_i32 : i32, i32
  }
  func.func @transform_7(%arg0: i32) -> (i32, i32) {
    %c0_i32 = arith.constant 0 : i32
    %c0_i32_0 = arith.constant 0 : i32
    return %arg0, %c0_i32 : i32, i32
  }
}

</mosaic_0001>

<bundles_post_ra>
// kernel: netD_forward.5
= control target key start
LH: loop header
LB: loop body
LE: loop exit
PB: predicated region body
PF: predicated region fallthrough
CT: control target
= control target key end

     0   :  { %s1937_s15 = smov 0   ;;  %s1939_s16 = smov 0   ;;  %s2577_s0 = inlined_call_operand.vmem [shape: bf16[2048,48], index: 0, kind: input, shape index: {}]   ;;  %s2578_s1 = inlined_call_operand.vmem [shape: bf16[48,8], index: 1, kind: input, shape index: {}]   ;;  %s2579_s2 = inlined_call_operand.vmem [shape: f32[1,8], index: 2, kind: input, shape index: {}]   ;;  %s2580_s3 = inlined_call_operand.vmem [shape: f32[1,8], index: 3, kind: input, shape index: {}]   ;;  %s2581_s4 = inlined_call_operand.vmem [shape: bf16[2048,8], index: 4, kind: output, shape index: {}]  }
   0x1   :  { %s1941_s17 = smov 0  }
   0x2 LB: > { %s26_s18 = sadd.s32 1, %s1905_s16  ;;  %p1635_p0 = scmp.ge.s32.totalorder %s1909_s17, 1  ;;  %s1909_s17 = sphi %s1941_s17, %s14_s17   ;;  %s1905_s16 = sphi %s1939_s16, %s2583_s16   ;;  %s1901_s15 = sphi %s1937_s15, %s2582_s15  }
   0x3   : > { %p28_p1 = scmp.ge.s32.totalorder %s26_s18, 4  ;;  %p191_p2 = scmp.lt.s32.totalorder %s1909_s17, 5 }
   0x5   : > { %s2585_s18 = smov (%p28_p1, %s26_s18), 0  ;;  %p192_p3 = pnand %p1635_p0, %p191_p2 }
   0x6   : > { %s1636_s21 = sshll.u32 (!%p192_p3), %s1901_s15, 6 }
   0x7   : > { %195 = sbr.rel (%p192_p3) target bundleno = 302 (0x12e), region = 36  ;;  %p226_p4 = scmp.lt.s32.totalorder (!%p192_p3), %s1636_s21, 255 }
   0xc   : > { %v1848_v0 = vld [vmem:[%s2578_s1 + $0x10] sm:$0xff]  ;;  %v1847_v1 = vld [vmem:[%s2578_s1 + $0x8] sm:$0xff]  ;;  %s2587_s21 = smov (!%p226_p4, %s1636_s21), 255  ;;  %v1846_v2 = vld [vmem:[%s2578_s1] sm:$0xff]  ;;  %vm628_vm0 = vcmask 392192   ;;  %vm251_vm1 = vcmask 64512  }
   0xd   : > { %730 = vmatpush.bf16.msra.mxu0 %v1848_v0  ;;  %1849 = vmatpush.bf16.msra.mxu1 %v1848_v0  ;;  %s1637_s24 = sshll.u32 %s2587_s21, 2  ;;  %v1911_v27 = vmov 0.0   ;;  %v2140_v40 = vld [vmem:[%s2579_s2] ss:$0 sm:$0xff]  ;;  %vm1482_vm3 = vcmask 60416  }
   0xe   : > { %1850 = vmatpush.bf16.msra.mxu2 %v1848_v0  ;;  %1851 = vmatpush.bf16.msra.mxu3 %v1848_v0  ;;  %s1972_s29 = scalar_lea.vmem %s2577_s0, %s1637_s24  ;;  %252 = vst.msk [vmem:[#allocation2] sm:$0xff] %vm251_vm1, %v1911_v27  ;;  %v2149_v45 = vld [vmem:[%s2580_s3] ss:$0 sm:$0xff]  ;;  %s2174_s10 = scalar_lea.vmem %s2581_s4, %s1637_s24 }
   0xf   : > { %v1814_v3 = vld [vmem:[%s1972_s29] sm:$0xff]  ;;  %v1815_v7 = vld [vmem:[%s1972_s29 + $0x8] sm:$0xff]  ;;  %v1816_v11 = vld [vmem:[%s1972_s29 + $0x10] sm:$0xff]  ;;  %253 = vst.msk [vmem:[#allocation2 + $0x8] sm:$0xff] %vm251_vm1, %v1911_v27 }
  0x10   : > { %v1822_v4 = vld [vmem:[%s1972_s29 + $0x40] sm:$0xff]  ;;  %v1823_v8 = vld [vmem:[%s1972_s29 + $0x48] sm:$0xff]  ;;  %v1824_v12 = vld [vmem:[%s1972_s29 + $0x50] sm:$0xff]  ;;  %254 = vst.msk [vmem:[#allocation2 + $0x10] sm:$0xff] %vm251_vm1, %v1911_v27 }
  0x11   : > { %731 = vmatpush.bf16.msra.mxu0 %v1847_v1  ;;  %1852 = vmatpush.bf16.msra.mxu1 %v1847_v1  ;;  %v1830_v5 = vld [vmem:[%s1972_s29 + $0x80] sm:$0xff]  ;;  %v1831_v9 = vld [vmem:[%s1972_s29 + $0x88] sm:$0xff]  ;;  %v1832_v13 = vld [vmem:[%s1972_s29 + $0x90] sm:$0xff]  ;;  %255 = vst.msk [vmem:[#allocation2 + $0x18] sm:$0xff] %vm251_vm1, %v1911_v27 }
  0x12   : > { %1853 = vmatpush.bf16.msra.mxu2 %v1847_v1  ;;  %1854 = vmatpush.bf16.msra.mxu3 %v1847_v1  ;;  %v1838_v6 = vld [vmem:[%s1972_s29 + $0xc0] sm:$0xff]  ;;  %v1839_v10 = vld [vmem:[%s1972_s29 + $0xc8] sm:$0xff]  ;;  %v1840_v14 = vld [vmem:[%s1972_s29 + $0xd0] sm:$0xff]  ;;  %256 = vst.msk [vmem:[#allocation2 + $0x20] sm:$0xff] %vm251_vm1, %v1911_v27 }
  0x13   : > { %v1817_v15 = vld [vmem:[%s1972_s29 + $0x18] sm:$0xff]  ;;  %v1818_v19 = vld [vmem:[%s1972_s29 + $0x20] sm:$0xff]  ;;  %v1819_v23 = vld [vmem:[%s1972_s29 + $0x28] sm:$0xff]  ;;  %257 = vst.msk [vmem:[#allocation2 + $0x28] sm:$0xff] %vm251_vm1, %v1911_v27 }
  0x14   : > { %v1825_v16 = vld [vmem:[%s1972_s29 + $0x58] sm:$0xff]  ;;  %v1826_v20 = vld [vmem:[%s1972_s29 + $0x60] sm:$0xff]  ;;  %v1827_v24 = vld [vmem:[%s1972_s29 + $0x68] sm:$0xff]  ;;  %258 = vst.msk [vmem:[#allocation2 + $0x30] sm:$0xff] %vm251_vm1, %v1911_v27 }
  0x15   : > { %732 = vmatpush.bf16.msra.mxu0 %v1846_v2  ;;  %1855 = vmatpush.bf16.msra.mxu1 %v1846_v2  ;;  %v1833_v17 = vld [vmem:[%s1972_s29 + $0x98] sm:$0xff]  ;;  %v1834_v21 = vld [vmem:[%s1972_s29 + $0xa0] sm:$0xff]  ;;  %v1835_v25 = vld [vmem:[%s1972_s29 + $0xa8] sm:$0xff]  ;;  %259 = vst.msk [vmem:[#allocation2 + $0x38] sm:$0xff] %vm251_vm1, %v1911_v27 }
  0x16   : > { %1856 = vmatpush.bf16.msra.mxu2 %v1846_v2  ;;  %1857 = vmatpush.bf16.msra.mxu3 %v1846_v2  ;;  %v1841_v18 = vld [vmem:[%s1972_s29 + $0xd8] sm:$0xff]  ;;  %v1842_v22 = vld [vmem:[%s1972_s29 + $0xe0] sm:$0xff]  ;;  %v1843_v26 = vld [vmem:[%s1972_s29 + $0xe8] sm:$0xff]  ;;  %260 = vst.msk [vmem:[#allocation2 + $0x40] sm:$0xff] %vm251_vm1, %v1911_v27 }
  0x17   : > { %261 = vst.msk [vmem:[#allocation2 + $0x48] sm:$0xff] %vm251_vm1, %v1911_v27  ;;  %v1820_v28 = vld [vmem:[%s1972_s29 + $0x30] sm:$0xff]  ;;  %v1821_v32 = vld [vmem:[%s1972_s29 + $0x38] sm:$0xff]  ;;  %v316_v36 = vld [vmem:[#allocation2] sm:$0xff] }
  0x18   : > { %1780 = vmatmul.msk.bf16.vlgmr.msra.gmra.mxu0 %vm628_vm0, %v1814_v3  ;;  %1788 = vmatmul.msk.bf16.vlgmr.msra.gmra.mxu1 %vm628_vm0, %v1822_v4  ;;  %v1828_v29 = vld [vmem:[%s1972_s29 + $0x70] sm:$0xff]  ;;  %262 = vst.msk [vmem:[#allocation2 + $0x50] sm:$0xff] %vm251_vm1, %v1911_v27  ;;  %v1829_v33 = vld [vmem:[%s1972_s29 + $0x78] sm:$0xff]  ;;  %v317_v60 = vld [vmem:[#allocation2 + $0x8] sm:$0xff] }
  0x19   : > { %1796 = vmatmul.msk.bf16.vlgmr.msra.gmra.mxu2 %vm628_vm0, %v1830_v5  ;;  %1804 = vmatmul.msk.bf16.vlgmr.msra.gmra.mxu3 %vm628_vm0, %v1838_v6  ;;  %v1836_v30 = vld [vmem:[%s1972_s29 + $0xb0] sm:$0xff]  ;;  %263 = vst.msk [vmem:[#allocation2 + $0x58] sm:$0xff] %vm251_vm1, %v1911_v27  ;;  %v1837_v34 = vld [vmem:[%s1972_s29 + $0xb8] sm:$0xff] }
  0x1a   : > { %v1844_v31 = vld [vmem:[%s1972_s29 + $0xf0] sm:$0xff]  ;;  %264 = vst.msk [vmem:[#allocation2 + $0x60] sm:$0xff] %vm251_vm1, %v1911_v27  ;;  %v1845_v35 = vld [vmem:[%s1972_s29 + $0xf8] sm:$0xff] }
  0x1b   : > { %265 = vst.msk [vmem:[#allocation2 + $0x68] sm:$0xff] %vm251_vm1, %v1911_v27  ;;  %v318_v4 = vld [vmem:[#allocation2 + $0x10] sm:$0xff] }
  0x1c   : > { %266 = vst.msk [vmem:[#allocation2 + $0x70] sm:$0xff] %vm251_vm1, %v1911_v27 }
  0x1d   : > { %267 = vst.msk [vmem:[#allocation2 + $0x78] sm:$0xff] %vm251_vm1, %v1911_v27 }
  0x1e   : > { %268 = vst.msk [vmem:[#allocation2 + $0x80] sm:$0xff] %vm251_vm1, %v1911_v27 }
  0x1f   : > { %269 = vst.msk [vmem:[#allocation2 + $0x88] sm:$0xff] %vm251_vm1, %v1911_v27 }
  0x20   : > { %270 = vst.msk [vmem:[#allocation2 + $0x90] sm:$0xff] %vm251_vm1, %v1911_v27 }
  0x21   : > { %271 = vst.msk [vmem:[#allocation2 + $0x98] sm:$0xff] %vm251_vm1, %v1911_v27 }
  0x22   : > { %272 = vst.msk [vmem:[#allocation2 + $0xa0] sm:$0xff] %vm251_vm1, %v1911_v27 }
  0x23   : > { %273 = vst.msk [vmem:[#allocation2 + $0xa8] sm:$0xff] %vm251_vm1, %v1911_v27 }
  0x24   : > { %274 = vst.msk [vmem:[#allocation2 + $0xb0] sm:$0xff] %vm251_vm1, %v1911_v27 }
  0x25   : > { %275 = vst.msk [vmem:[#allocation2 + $0xb8] sm:$0xff] %vm251_vm1, %v1911_v27  ;;  %v332_v52 = vld [vmem:[#allocation2 + $0x80] sm:$0xff] }
  0x26   : > { %276 = vst.msk [vmem:[#allocation2 + $0xc0] sm:$0xff] %vm251_vm1, %v1911_v27  ;;  %v333_v62 = vld [vmem:[#allocation2 + $0x88] sm:$0xff] }
  0x27   : > { %277 = vst.msk [vmem:[#allocation2 + $0xc8] sm:$0xff] %vm251_vm1, %v1911_v27 }
  0x28   : > { %1781 = vmatmul.msk.bf16.gmra.mxu0 %vm628_vm0, %v1815_v7  ;;  %1789 = vmatmul.msk.bf16.gmra.mxu1 %vm628_vm0, %v1823_v8  ;;  %278 = vst.msk [vmem:[#allocation2 + $0xd0] sm:$0xff] %vm251_vm1, %v1911_v27  ;;  %v334_v8 = vld [vmem:[#allocation2 + $0x90] sm:$0xff] }
  0x29   : > { %1797 = vmatmul.msk.bf16.gmra.mxu2 %vm628_vm0, %v1831_v9  ;;  %1805 = vmatmul.msk.bf16.gmra.mxu3 %vm628_vm0, %v1839_v10  ;;  %279 = vst.msk [vmem:[#allocation2 + $0xd8] sm:$0xff] %vm251_vm1, %v1911_v27 }
  0x2a   : > { %280 = vst.msk [vmem:[#allocation2 + $0xe0] sm:$0xff] %vm251_vm1, %v1911_v27 }
  0x2b   : > { %281 = vst.msk [vmem:[#allocation2 + $0xe8] sm:$0xff] %vm251_vm1, %v1911_v27 }
  0x2c   : > { %282 = vst.msk [vmem:[#allocation2 + $0xf0] sm:$0xff] %vm251_vm1, %v1911_v27 }
  0x2d   : > { %283 = vst.msk [vmem:[#allocation2 + $0xf8] sm:$0xff] %vm251_vm1, %v1911_v27 }
  0x2e   : > { %284 = vst.msk [vmem:[#allocation2 + $0x100] sm:$0xff] %vm251_vm1, %v1911_v27 }
  0x2f   : > { %285 = vst.msk [vmem:[#allocation2 + $0x108] sm:$0xff] %vm251_vm1, %v1911_v27 }
  0x30   : > { %286 = vst.msk [vmem:[#allocation2 + $0x110] sm:$0xff] %vm251_vm1, %v1911_v27 }
  0x31   : > { %287 = vst.msk [vmem:[#allocation2 + $0x118] sm:$0xff] %vm251_vm1, %v1911_v27 }
  0x32   : > { %288 = vst.msk [vmem:[#allocation2 + $0x120] sm:$0xff] %vm251_vm1, %v1911_v27 }
  0x33   : > { %289 = vst.msk [vmem:[#allocation2 + $0x128] sm:$0xff] %vm251_vm1, %v1911_v27 }
  0x34   : > { %290 = vst.msk [vmem:[#allocation2 + $0x130] sm:$0xff] %vm251_vm1, %v1911_v27 }
  0x35   : > { %291 = vst.msk [vmem:[#allocation2 + $0x138] sm:$0xff] %vm251_vm1, %v1911_v27  ;;  %v348_v56 = vld [vmem:[#allocation2 + $0x100] sm:$0xff] }
  0x36   : > { %292 = vst.msk [vmem:[#allocation2 + $0x140] sm:$0xff] %vm251_vm1, %v1911_v27  ;;  %v349_v0 = vld [vmem:[#allocation2 + $0x108] sm:$0xff] }
  0x37   : > { %293 = vst.msk [vmem:[#allocation2 + $0x148] sm:$0xff] %vm251_vm1, %v1911_v27 }
  0x38   : > { %1782 = vmatmul.msk.bf16.gmra.mxu0 %vm628_vm0, %v1816_v11  ;;  %1790 = vmatmul.msk.bf16.gmra.mxu1 %vm628_vm0, %v1824_v12  ;;  %294 = vst.msk [vmem:[#allocation2 + $0x150] sm:$0xff] %vm251_vm1, %v1911_v27  ;;  %v350_v12 = vld [vmem:[#allocation2 + $0x110] sm:$0xff] }
  0x39   : > { %1798 = vmatmul.msk.bf16.gmra.mxu2 %vm628_vm0, %v1832_v13  ;;  %1806 = vmatmul.msk.bf16.gmra.mxu3 %vm628_vm0, %v1840_v14  ;;  %295 = vst.msk [vmem:[#allocation2 + $0x158] sm:$0xff] %vm251_vm1, %v1911_v27 }
  0x3a   : > { %296 = vst.msk [vmem:[#allocation2 + $0x160] sm:$0xff] %vm251_vm1, %v1911_v27 }
  0x3b   : > { %297 = vst.msk [vmem:[#allocation2 + $0x168] sm:$0xff] %vm251_vm1, %v1911_v27 }
  0x3c   : > { %298 = vst.msk [vmem:[#allocation2 + $0x170] sm:$0xff] %vm251_vm1, %v1911_v27 }
  0x3d   : > { %299 = vst.msk [vmem:[#allocation2 + $0x178] sm:$0xff] %vm251_vm1, %v1911_v27 }
  0x3e   : > { %300 = vst.msk [vmem:[#allocation2 + $0x180] sm:$0xff] %vm251_vm1, %v1911_v27 }
  0x3f   : > { %301 = vst.msk [vmem:[#allocation2 + $0x188] sm:$0xff] %vm251_vm1, %v1911_v27 }
  0x40   : > { %302 = vst.msk [vmem:[#allocation2 + $0x190] sm:$0xff] %vm251_vm1, %v1911_v27 }
  0x41   : > { %303 = vst.msk [vmem:[#allocation2 + $0x198] sm:$0xff] %vm251_vm1, %v1911_v27 }
  0x42   : > { %304 = vst.msk [vmem:[#allocation2 + $0x1a0] sm:$0xff] %vm251_vm1, %v1911_v27 }
  0x43   : > { %305 = vst.msk [vmem:[#allocation2 + $0x1a8] sm:$0xff] %vm251_vm1, %v1911_v27 }
  0x44   : > { %306 = vst.msk [vmem:[#allocation2 + $0x1b0] sm:$0xff] %vm251_vm1, %v1911_v27 }
  0x45   : > { %307 = vst.msk [vmem:[#allocation2 + $0x1b8] sm:$0xff] %vm251_vm1, %v1911_v27  ;;  %v364_v58 = vld [vmem:[#allocation2 + $0x180] sm:$0xff] }
  0x46   : > { %308 = vst.msk [vmem:[#allocation2 + $0x1c0] sm:$0xff] %vm251_vm1, %v1911_v27  ;;  %v365_v2 = vld [vmem:[#allocation2 + $0x188] sm:$0xff] }
  0x47   : > { %309 = vst.msk [vmem:[#allocation2 + $0x1c8] sm:$0xff] %vm251_vm1, %v1911_v27  ;;  %v366_v14 = vld [vmem:[#allocation2 + $0x190] sm:$0xff] }
  0x48   : > { %1783 = vmatmul.msk.bf16.gmra.mxu0 %vm628_vm0, %v1817_v15  ;;  %1791 = vmatmul.msk.bf16.gmra.mxu1 %vm628_vm0, %v1825_v16  ;;  %310 = vst.msk [vmem:[#allocation2 + $0x1d0] sm:$0xff] %vm251_vm1, %v1911_v27  ;;  %v319_v16 = vld [vmem:[#allocation2 + $0x18] sm:$0xff] }
  0x49   : > { %1799 = vmatmul.msk.bf16.gmra.mxu2 %vm628_vm0, %v1833_v17  ;;  %1807 = vmatmul.msk.bf16.gmra.mxu3 %vm628_vm0, %v1841_v18  ;;  %311 = vst.msk [vmem:[#allocation2 + $0x1d8] sm:$0xff] %vm251_vm1, %v1911_v27  ;;  %v335_v18 = vld [vmem:[#allocation2 + $0x98] sm:$0xff] }
  0x4a   : > { %312 = vst.msk [vmem:[#allocation2 + $0x1e0] sm:$0xff] %vm251_vm1, %v1911_v27 }
  0x4b   : > { %313 = vst.msk [vmem:[#allocation2 + $0x1e8] sm:$0xff] %vm251_vm1, %v1911_v27 }
  0x4c   : > { %314 = vst.msk [vmem:[#allocation2 + $0x1f0] sm:$0xff] %vm251_vm1, %v1911_v27 }
  0x4d   : > { %315 = vst.msk [vmem:[#allocation2 + $0x1f8] sm:$0xff] %vm251_vm1, %v1911_v27 }
  0x58   : > { %1784 = vmatmul.msk.bf16.gmra.mxu0 %vm628_vm0, %v1818_v19  ;;  %1792 = vmatmul.msk.bf16.gmra.mxu1 %vm628_vm0, %v1826_v20  ;;  %v351_v20 = vld [vmem:[#allocation2 + $0x118] sm:$0xff] }
  0x59   : > { %1800 = vmatmul.msk.bf16.gmra.mxu2 %vm628_vm0, %v1834_v21  ;;  %1808 = vmatmul.msk.bf16.gmra.mxu3 %vm628_vm0, %v1842_v22 }
  0x68   : > { %1785 = vmatmul.msk.bf16.gmra.mxu0 %vm628_vm0, %v1819_v23  ;;  %1793 = vmatmul.msk.bf16.gmra.mxu1 %vm628_vm0, %v1827_v24  ;;  %v367_v23 = vld [vmem:[#allocation2 + $0x198] sm:$0xff] }
  0x69   : > { %1801 = vmatmul.msk.bf16.gmra.mxu2 %vm628_vm0, %v1835_v25  ;;  %1809 = vmatmul.msk.bf16.gmra.mxu3 %vm628_vm0, %v1843_v26 }
  0x78   : > { %1786 = vmatmul.msk.bf16.gmra.mxu0 %vm628_vm0, %v1820_v28  ;;  %1794 = vmatmul.msk.bf16.gmra.mxu1 %vm628_vm0, %v1828_v29  ;;  %v320_v29 = vld [vmem:[#allocation2 + $0x20] sm:$0xff] }
  0x79   : > { %1802 = vmatmul.msk.bf16.gmra.mxu2 %vm628_vm0, %v1836_v30  ;;  %1810 = vmatmul.msk.bf16.gmra.mxu3 %vm628_vm0, %v1844_v31  ;;  %v336_v30 = vld [vmem:[#allocation2 + $0xa0] sm:$0xff] }
  0x88   : > { %1787 = vmatmul.msk.bf16.gmra.mxu0 %vm628_vm0, %v1821_v32  ;;  %1795 = vmatmul.msk.bf16.gmra.mxu1 %vm628_vm0, %v1829_v33 }
  0x89   : > { %1803 = vmatmul.msk.bf16.gmra.mxu2 %vm628_vm0, %v1837_v34  ;;  %1811 = vmatmul.msk.bf16.gmra.mxu3 %vm628_vm0, %v1845_v35 }
  0x95   : > { %v734_v37 = vpop.f32.mrf.mxu0  ;;  %v774_v38 = vpop.f32.mrf.mxu1 }
  0x96   : > { %v894_v39 = vadd.f32 %v734_v37, %v316_v36  ;;  %v910_v59 = vadd.f32 %v774_v38, %v332_v52 }
  0x98   : > { %959 = vst.msk [vmem:[#allocation2] sm:$0xff] %vm251_vm1, %v894_v39 }
  0x99   : > { %975 = vst.msk [vmem:[#allocation2 + $0x80] sm:$0xff] %vm251_vm1, %v910_v59 }
  0x9c   : > { %v814_v41 = vpop.f32.mrf.mxu2  ;;  %v854_v42 = vpop.f32.mrf.mxu3 }
  0x9d   : > { %v736_v43 = vpop.f32.mrf.mxu0  ;;  %v776_v44 = vpop.f32.mrf.mxu1  ;;  %v926_v61 = vadd.f32 %v814_v41, %v348_v56  ;;  %v942_v63 = vadd.f32 %v854_v42, %v364_v58 }
  0x9e   : > { %v895_v1 = vadd.f32 %v736_v43, %v317_v60  ;;  %v911_v3 = vadd.f32 %v776_v44, %v333_v62 }
  0x9f   : > { %v1026_v46 = vld [vmem:[#allocation2] sm:$0xff]  ;;  %991 = vst.msk [vmem:[#allocation2 + $0x100] sm:$0xff] %vm251_vm1, %v926_v61 }
  0xa0   : > { %v1094_v47 = vmul.f32 %v2140_v40, %v1026_v46  ;;  %1007 = vst.msk [vmem:[#allocation2 + $0x180] sm:$0xff] %vm251_vm1, %v942_v63  ;;  %v1042_v21 = vld [vmem:[#allocation2 + $0x80] sm:$0xff] }
  0xa1   : > { %960 = vst.msk [vmem:[#allocation2 + $0x8] sm:$0xff] %vm251_vm1, %v895_v1  ;;  %v1110_v24 = vmul.f32 %v2140_v40, %v1042_v21 }
  0xa2   : > { %v1162_v48 = vadd.f32 %v2149_v45, %v1094_v47  ;;  %976 = vst.msk [vmem:[#allocation2 + $0x88] sm:$0xff] %vm251_vm1, %v911_v3 }
  0xa3   : > { %v1178_v36 = vadd.f32 %v2149_v45, %v1110_v24 }
  0xa4   : > { %vm1226_vm2 = vcmp.gt.f32.partialorder %v1162_v48, 0.0  ;;  %v1290_v49 = vmul.f32 0.2, %v1162_v48  ;;  %v816_v50 = vpop.f32.mrf.mxu2  ;;  %v856_v51 = vpop.f32.mrf.mxu3 }
  0xa5   : > { %v739_v53 = vpop.f32.mrf.mxu0  ;;  %v779_v54 = vpop.f32.mrf.mxu1  ;;  %v927_v7 = vadd.f32 %v816_v50, %v349_v0  ;;  %v943_v11 = vadd.f32 %v856_v51, %v365_v2  ;;  %vm1242_vm4 = vcmp.gt.f32.partialorder %v1178_v36, 0.0  ;;  %v1306_v47 = vmul.f32 0.2, %v1178_v36 }
  0xa6   : > { %v1354_v55 = vsel %vm1226_vm2, %v1162_v48, %v1290_v49  ;;  %v896_v13 = vadd.f32 %v739_v53, %v318_v4  ;;  %v912_v15 = vadd.f32 %v779_v54, %v334_v8  ;;  %v1058_v25 = vld [vmem:[#allocation2 + $0x100] sm:$0xff] }
  0xa7   : > { %v1418_v57 = vpack.c.bf16 %v1354_v55, %v1354_v55  ;;  %992 = vst.msk [vmem:[#allocation2 + $0x108] sm:$0xff] %vm251_vm1, %v927_v7  ;;  %v1126_v31 = vmul.f32 %v2140_v40, %v1058_v25  ;;  %v1074_v32 = vld [vmem:[#allocation2 + $0x180] sm:$0xff]  ;;  %v1370_v54 = vsel %vm1242_vm4, %v1178_v36, %v1306_v47 }
  0xa8   : > { %1008 = vst.msk [vmem:[#allocation2 + $0x188] sm:$0xff] %vm251_vm1, %v943_v11  ;;  %v1142_v37 = vmul.f32 %v2140_v40, %v1074_v32  ;;  %v1027_v38 = vld [vmem:[#allocation2 + $0x8] sm:$0xff]  ;;  %v1434_v58 = vpack.c.bf16 %v1370_v54, %v1370_v54 }
  0xa9   : > { %1483 = vst.msk [vmem:[%s2174_s10] sm:$0xf] %vm1482_vm3, %v1418_v57  ;;  %v1194_v41 = vadd.f32 %v2149_v45, %v1126_v31  ;;  %v1095_v42 = vmul.f32 %v2140_v40, %v1027_v38  ;;  %v1043_v43 = vld [vmem:[#allocation2 + $0x88] sm:$0xff] }
  0xaa   : > { %961 = vst.msk [vmem:[#allocation2 + $0x10] sm:$0xff] %vm251_vm1, %v896_v13  ;;  %v1210_v48 = vadd.f32 %v2149_v45, %v1142_v37  ;;  %v1111_v49 = vmul.f32 %v2140_v40, %v1043_v43 }
  0xab   : > { %977 = vst.msk [vmem:[#allocation2 + $0x90] sm:$0xff] %vm251_vm1, %v912_v15  ;;  %vm1258_vm5 = vcmp.gt.f32.partialorder %v1194_v41, 0.0  ;;  %v1322_v51 = vmul.f32 0.2, %v1194_v41  ;;  %v1163_v52 = vadd.f32 %v2149_v45, %v1095_v42 }
  0xac   : > { %v819_v5 = vpop.f32.mrf.mxu2  ;;  %v859_v6 = vpop.f32.mrf.mxu3  ;;  %vm1274_vm6 = vcmp.gt.f32.partialorder %v1210_v48, 0.0  ;;  %v1338_v55 = vmul.f32 0.2, %v1210_v48  ;;  %v1179_v56 = vadd.f32 %v2149_v45, %v1111_v49  ;;  %1499 = vst.msk [vmem:[%s2174_s10 + $0x40] sm:$0xf] %vm1482_vm3, %v1434_v58 }
  0xad   : > { %v741_v9 = vpop.f32.mrf.mxu0  ;;  %v781_v10 = vpop.f32.mrf.mxu1  ;;  %v928_v17 = vadd.f32 %v819_v5, %v350_v12  ;;  %v944_v19 = vadd.f32 %v859_v6, %v366_v14  ;;  %v1386_v59 = vsel %vm1258_vm5, %v1194_v41, %v1322_v51  ;;  %vm1227_vm7 = vcmp.gt.f32.partialorder %v1163_v52, 0.0 }
  0xae   : > { %v897_v22 = vadd.f32 %v741_v9, %v319_v16  ;;  %v913_v26 = vadd.f32 %v781_v10, %v335_v18  ;;  %v1059_v50 = vld [vmem:[#allocation2 + $0x108] sm:$0xff]  ;;  %v1291_v60 = vmul.f32 0.2, %v1163_v52  ;;  %v1450_v63 = vpack.c.bf16 %v1386_v59, %v1386_v59 }
  0xaf   : > { %993 = vst.msk [vmem:[#allocation2 + $0x110] sm:$0xff] %vm251_vm1, %v928_v17  ;;  %v1127_v53 = vmul.f32 %v2140_v40, %v1059_v50  ;;  %v1075_v57 = vld [vmem:[#allocation2 + $0x188] sm:$0xff]  ;;  %v1402_v0 = vsel %vm1274_vm6, %v1210_v48, %v1338_v55  ;;  %vm1243_vm8 = vcmp.gt.f32.partialorder %v1179_v56, 0.0  ;;  %v1307_v1 = vmul.f32 0.2, %v1179_v56 }
  0xb0   : > { %1009 = vst.msk [vmem:[#allocation2 + $0x190] sm:$0xff] %vm251_vm1, %v944_v19  ;;  %v1466_v4 = vpack.c.bf16 %v1402_v0, %v1402_v0  ;;  %v1355_v5 = vsel %vm1227_vm7, %v1163_v52, %v1291_v60  ;;  %v1143_v7 = vmul.f32 %v2140_v40, %v1075_v57 }
  0xb1   : > { %962 = vst.msk [vmem:[#allocation2 + $0x18] sm:$0xff] %vm251_vm1, %v897_v22  ;;  %v1028_v61 = vld [vmem:[#allocation2 + $0x10] sm:$0xff]  ;;  %v1195_v6 = vadd.f32 %v2149_v45, %v1127_v53  ;;  %v1419_v12 = vpack.c.bf16 %v1355_v5, %v1355_v5  ;;  %v1371_v13 = vsel %vm1243_vm8, %v1179_v56, %v1307_v1 }
  0xb2   : > { %978 = vst.msk [vmem:[#allocation2 + $0x98] sm:$0xff] %vm251_vm1, %v913_v26  ;;  %v1044_v62 = vld [vmem:[#allocation2 + $0x90] sm:$0xff]  ;;  %v1096_v14 = vmul.f32 %v2140_v40, %v1028_v61  ;;  %v1435_v17 = vpack.c.bf16 %v1371_v13, %v1371_v13  ;;  %v1211_v19 = vadd.f32 %v2149_v45, %v1143_v7  ;;  %v352_v61 = vld [vmem:[#allocation2 + $0x120] sm:$0xff] }
  0xb3   : > { %1515 = vst.msk [vmem:[%s2174_s10 + $0x80] sm:$0xf] %vm1482_vm3, %v1450_v63  ;;  %v1112_v15 = vmul.f32 %v2140_v40, %v1044_v62  ;;  %vm1259_vm9 = vcmp.gt.f32.partialorder %v1195_v6, 0.0  ;;  %v1323_v18 = vmul.f32 0.2, %v1195_v6  ;;  %v368_v62 = vld [vmem:[#allocation2 + $0x1a0] sm:$0xff] }
  0xb4   : > { %v821_v27 = vpop.f32.mrf.mxu2  ;;  %v861_v28 = vpop.f32.mrf.mxu3  ;;  %1531 = vst.msk [vmem:[%s2174_s10 + $0xc0] sm:$0xf] %vm1482_vm3, %v1466_v4  ;;  %vm1275_vm10 = vcmp.gt.f32.partialorder %v1211_v19, 0.0  ;;  %v1339_v25 = vmul.f32 0.2, %v1211_v19 }
  0xb5   : > { %v929_v33 = vadd.f32 %v821_v27, %v351_v20  ;;  %v744_v34 = vpop.f32.mrf.mxu0  ;;  %v784_v35 = vpop.f32.mrf.mxu1  ;;  %v945_v39 = vadd.f32 %v861_v28, %v367_v23  ;;  %1484 = vst.msk [vmem:[%s2174_s10 + $0x4] sm:$0xf] %vm1482_vm3, %v1419_v12  ;;  %v1164_v20 = vadd.f32 %v2149_v45, %v1096_v14  ;;  %v1180_v21 = vadd.f32 %v2149_v45, %v1112_v15  ;;  %v321_v14 = vld [vmem:[#allocation2 + $0x28] sm:$0xff] }
  0xb6   : > { %v898_v44 = vadd.f32 %v744_v34, %v320_v29  ;;  %v914_v46 = vadd.f32 %v784_v35, %v336_v30  ;;  %v1060_v8 = vld [vmem:[#allocation2 + $0x110] sm:$0xff]  ;;  %1500 = vst.msk [vmem:[%s2174_s10 + $0x44] sm:$0xf] %vm1482_vm3, %v1435_v17  ;;  %v1387_v24 = vsel %vm1259_vm9, %v1195_v6, %v1323_v18  ;;  %v1403_v30 = vsel %vm1275_vm10, %v1211_v19, %v1339_v25  ;;  %v337_v15 = vld [vmem:[#allocation2 + $0xa8] sm:$0xff] }
  0xb7   : > { %994 = vst.msk [vmem:[#allocation2 + $0x118] sm:$0xff] %vm251_vm1, %v929_v33  ;;  %v1076_v9 = vld [vmem:[#allocation2 + $0x190] sm:$0xff]  ;;  %v1128_v22 = vmul.f32 %v2140_v40, %v1060_v8  ;;  %v1451_v28 = vpack.c.bf16 %v1387_v24, %v1387_v24  ;;  %vm1228_vm11 = vcmp.gt.f32.partialorder %v1164_v20, 0.0  ;;  %v1292_v29 = vmul.f32 0.2, %v1164_v20 }
  0xb8   : > { %1010 = vst.msk [vmem:[#allocation2 + $0x198] sm:$0xff] %vm251_vm1, %v945_v39  ;;  %v1029_v16 = vld [vmem:[#allocation2 + $0x18] sm:$0xff]  ;;  %v1144_v23 = vmul.f32 %v2140_v40, %v1076_v9  ;;  %vm1244_vm12 = vcmp.gt.f32.partialorder %v1180_v21, 0.0  ;;  %v1308_v31 = vmul.f32 0.2, %v1180_v21  ;;  %v1467_v34 = vpack.c.bf16 %v1403_v30, %v1403_v30 }
  0xb9   : > { %963 = vst.msk [vmem:[#allocation2 + $0x20] sm:$0xff] %vm251_vm1, %v898_v44  ;;  %v1097_v26 = vmul.f32 %v2140_v40, %v1029_v16  ;;  %v1045_v27 = vld [vmem:[#allocation2 + $0x98] sm:$0xff]  ;;  %v1196_v32 = vadd.f32 %v2149_v45, %v1128_v22  ;;  %v1356_v35 = vsel %vm1228_vm11, %v1164_v20, %v1292_v29 }
  0xba   : > { %979 = vst.msk [vmem:[#allocation2 + $0xa0] sm:$0xff] %vm251_vm1, %v914_v46  ;;  %v1212_v33 = vadd.f32 %v2149_v45, %v1144_v23  ;;  %v1113_v37 = vmul.f32 %v2140_v40, %v1045_v27  ;;  %v1420_v42 = vpack.c.bf16 %v1356_v35, %v1356_v35  ;;  %v1372_v43 = vsel %vm1244_vm12, %v1180_v21, %v1308_v31 }
  0xbb   : > { %1516 = vst.msk [vmem:[%s2174_s10 + $0x84] sm:$0xf] %vm1482_vm3, %v1451_v28  ;;  %v1165_v36 = vadd.f32 %v2149_v45, %v1097_v26  ;;  %vm1260_vm13 = vcmp.gt.f32.partialorder %v1196_v32, 0.0  ;;  %v1324_v44 = vmul.f32 0.2, %v1196_v32  ;;  %v1436_v50 = vpack.c.bf16 %v1372_v43, %v1372_v43  ;;  %v353_v28 = vld [vmem:[#allocation2 + $0x128] sm:$0xff] }
  0xbc   : > { %v2216_v2 = vpop.f32.mrf.mxu2  ;;  %v2218_v3 = vpop.f32.mrf.mxu3  ;;  %1532 = vst.msk [vmem:[%s2174_s10 + $0xc4] sm:$0xf] %vm1482_vm3, %v1467_v34  ;;  %vm1276_vm14 = vcmp.gt.f32.partialorder %v1212_v33, 0.0  ;;  %v1340_v51 = vmul.f32 0.2, %v1212_v33  ;;  %v1181_v54 = vadd.f32 %v2149_v45, %v1113_v37 }
  0xbd   : > { %v2224_v10 = vpop.f32.mrf.mxu0  ;;  %v2226_v11 = vpop.f32.mrf.mxu1  ;;  %vm1229_vm15 = vcmp.gt.f32.partialorder %v1165_v36, 0.0  ;;  %1485 = vst.msk [vmem:[%s2174_s10 + $0x8] sm:$0xf] %vm1482_vm3, %v1420_v42  ;;  %v1388_v52 = vsel %vm1260_vm13, %v1196_v32, %v1324_v44  ;;  %v1293_v53 = vmul.f32 0.2, %v1165_v36  ;;  %v930_v12 = vadd.f32 %v2216_v2, %v352_v61  ;;  %v354_v42 = vld [vmem:[#allocation2 + $0x130] sm:$0xff] }
  0xbe   : > { %v1061_v38 = vld [vmem:[#allocation2 + $0x118] sm:$0xff]  ;;  %1501 = vst.msk [vmem:[%s2174_s10 + $0x48] sm:$0xf] %vm1482_vm3, %v1436_v50  ;;  %v1452_v56 = vpack.c.bf16 %v1388_v52, %v1388_v52  ;;  %v1404_v57 = vsel %vm1276_vm14, %v1212_v33, %v1340_v51  ;;  %vm1245_vm0 = vcmp.gt.f32.partialorder %v1181_v54, 0.0  ;;  %v1309_v1 = vmul.f32 0.2, %v1181_v54 }
  0xbf   : > { %v1077_v46 = vld [vmem:[#allocation2 + $0x198] sm:$0xff]  ;;  %v1129_v55 = vmul.f32 %v2140_v40, %v1061_v38  ;;  %v1468_v63 = vpack.c.bf16 %v1404_v57, %v1404_v57  ;;  %v1357_v0 = vsel %vm1229_vm15, %v1165_v36, %v1293_v53  ;;  %v946_v13 = vadd.f32 %v2218_v3, %v368_v62  ;;  %995 = vst.msk [vmem:[#allocation2 + $0x120] sm:$0xff] %vm251_vm1, %v930_v12  ;;  %v369_v33 = vld [vmem:[#allocation2 + $0x1a8] sm:$0xff]  ;;  %v338_v36 = vld [vmem:[#allocation2 + $0xb0] sm:$0xff] }
  0xc0   : > { %v1030_v47 = vld [vmem:[#allocation2 + $0x20] sm:$0xff]  ;;  %v1145_v58 = vmul.f32 %v2140_v40, %v1077_v46  ;;  %1517 = vst.msk [vmem:[%s2174_s10 + $0x88] sm:$0xf] %vm1482_vm3, %v1452_v56  ;;  %v1421_v4 = vpack.c.bf16 %v1357_v0, %v1357_v0  ;;  %v1373_v8 = vsel %vm1245_vm0, %v1181_v54, %v1309_v1  ;;  %v899_v24 = vadd.f32 %v2224_v10, %v321_v14  ;;  %v322_v10 = vld [vmem:[#allocation2 + $0x30] sm:$0xff]  ;;  %v323_v51 = vld [vmem:[#allocation2 + $0x38] sm:$0xff] }
  0xc1   : > { %v1098_v59 = vmul.f32 %v2140_v40, %v1030_v47  ;;  %v1046_v60 = vld [vmem:[#allocation2 + $0xa0] sm:$0xff]  ;;  %v1197_v5 = vadd.f32 %v2149_v45, %v1129_v55  ;;  %1533 = vst.msk [vmem:[%s2174_s10 + $0xc8] sm:$0xf] %vm1482_vm3, %v1468_v63  ;;  %v1437_v16 = vpack.c.bf16 %v1373_v8, %v1373_v8  ;;  %v915_v32 = vadd.f32 %v2226_v11, %v337_v15  ;;  %v370_v44 = vld [vmem:[#allocation2 + $0x1b0] sm:$0xff]  ;;  %v339_v55 = vld [vmem:[#allocation2 + $0xb8] sm:$0xff] }
  0xc2   : > { %v1213_v6 = vadd.f32 %v2149_v45, %v1145_v58  ;;  %v1114_v9 = vmul.f32 %v2140_v40, %v1046_v60  ;;  %1486 = vst.msk [vmem:[%s2174_s10 + $0xc] sm:$0xf] %vm1482_vm3, %v1421_v4  ;;  %v355_v60 = vld [vmem:[#allocation2 + $0x138] sm:$0xff]  ;;  %v324_v4 = vld [vmem:[#allocation2 + $0x40] sm:$0xff] }
  0xc3   : > { %v1166_v7 = vadd.f32 %v2149_v45, %v1098_v59  ;;  %vm1261_vm2 = vcmp.gt.f32.partialorder %v1197_v5, 0.0  ;;  %v1325_v17 = vmul.f32 0.2, %v1197_v5  ;;  %1502 = vst.msk [vmem:[%s2174_s10 + $0x4c] sm:$0xf] %vm1482_vm3, %v1437_v16  ;;  %v371_v1 = vld [vmem:[#allocation2 + $0x1b8] sm:$0xff] }
  0xc4   : > { %v2251_v39 = vpop.f32.mrf.mxu2  ;;  %v2253_v41 = vpop.f32.mrf.mxu3  ;;  %vm1277_vm4 = vcmp.gt.f32.partialorder %v1213_v6, 0.0  ;;  %v1341_v20 = vmul.f32 0.2, %v1213_v6  ;;  %v1182_v22 = vadd.f32 %v2149_v45, %v1114_v9  ;;  %1011 = vst.msk [vmem:[#allocation2 + $0x1a0] sm:$0xff] %vm251_vm1, %v946_v13  ;;  %v356_v15 = vld [vmem:[#allocation2 + $0x140] sm:$0xff] }
  0xc5   : > { %v2255_v48 = vpop.f32.mrf.mxu0  ;;  %v2257_v49 = vpop.f32.mrf.mxu1  ;;  %vm1230_vm5 = vcmp.gt.f32.partialorder %v1166_v7, 0.0  ;;  %v1294_v21 = vmul.f32 0.2, %v1166_v7  ;;  %v1389_v23 = vsel %vm1261_vm2, %v1197_v5, %v1325_v17  ;;  %964 = vst.msk [vmem:[#allocation2 + $0x28] sm:$0xff] %vm251_vm1, %v899_v24  ;;  %v931_v35 = vadd.f32 %v2251_v39, %v353_v28  ;;  %v340_v5 = vld [vmem:[#allocation2 + $0xc0] sm:$0xff] }
  0xc6   : > { %v1453_v25 = vpack.c.bf16 %v1389_v23, %v1389_v23  ;;  %v1405_v26 = vsel %vm1277_vm4, %v1213_v6, %v1341_v20  ;;  %vm1246_vm6 = vcmp.gt.f32.partialorder %v1182_v22, 0.0  ;;  %v1310_v31 = vmul.f32 0.2, %v1182_v22  ;;  %v1062_v43 = vld [vmem:[#allocation2 + $0x120] sm:$0xff]  ;;  %980 = vst.msk [vmem:[#allocation2 + $0xa8] sm:$0xff] %vm251_vm1, %v915_v32 }
  0xc7   : > { %v1358_v27 = vsel %vm1230_vm5, %v1166_v7, %v1294_v21  ;;  %v1469_v29 = vpack.c.bf16 %v1405_v26, %v1405_v26  ;;  %v947_v38 = vadd.f32 %v2253_v41, %v369_v33  ;;  %v900_v11 = vadd.f32 %v2255_v48, %v322_v10  ;;  %996 = vst.msk [vmem:[#allocation2 + $0x128] sm:$0xff] %vm251_vm1, %v931_v35  ;;  %v372_v17 = vld [vmem:[#allocation2 + $0x1c0] sm:$0xff] }
  0xc8   : > { %v1422_v30 = vpack.c.bf16 %v1358_v27, %v1358_v27  ;;  %1518 = vst.msk [vmem:[%s2174_s10 + $0x8c] sm:$0xf] %vm1482_vm3, %v1453_v25  ;;  %v1374_v34 = vsel %vm1246_vm6, %v1182_v22, %v1310_v31  ;;  %v1130_v50 = vmul.f32 %v2140_v40, %v1062_v43  ;;  %v916_v39 = vadd.f32 %v2257_v49, %v338_v36 }
  0xc9   : > { %1534 = vst.msk [vmem:[%s2174_s10 + $0xcc] sm:$0xf] %vm1482_vm3, %v1469_v29  ;;  %v1438_v37 = vpack.c.bf16 %v1374_v34, %v1374_v34  ;;  %v325_v29 = vld [vmem:[#allocation2 + $0x48] sm:$0xff] }
  0xca   : > { %1487 = vst.msk [vmem:[%s2174_s10 + $0x10] sm:$0xf] %vm1482_vm3, %v1422_v30  ;;  %v1198_v56 = vadd.f32 %v2149_v45, %v1130_v50  ;;  %v341_v30 = vld [vmem:[#allocation2 + $0xc8] sm:$0xff] }
  0xcb   : > { %1503 = vst.msk [vmem:[%s2174_s10 + $0x50] sm:$0xf] %vm1482_vm3, %v1438_v37  ;;  %v1078_v54 = vld [vmem:[#allocation2 + $0x1a0] sm:$0xff] }
  0xcc   : > { %v829_v18 = vpop.f32.mrf.mxu2  ;;  %v869_v19 = vpop.f32.mrf.mxu3  ;;  %v1146_v48 = vmul.f32 %v2140_v40, %v1078_v54  ;;  %v1031_v57 = vld [vmem:[#allocation2 + $0x28] sm:$0xff]  ;;  %1012 = vst.msk [vmem:[#allocation2 + $0x1a8] sm:$0xff] %vm251_vm1, %v947_v38  ;;  %vm1262_vm7 = vcmp.gt.f32.partialorder %v1198_v56, 0.0  ;;  %v1326_v61 = vmul.f32 0.2, %v1198_v56 }
  0xcd   : > { %v751_v2 = vpop.f32.mrf.mxu0  ;;  %v791_v3 = vpop.f32.mrf.mxu1  ;;  %v932_v41 = vadd.f32 %v829_v18, %v354_v42  ;;  %v948_v58 = vadd.f32 %v869_v19, %v370_v44  ;;  %v1099_v59 = vmul.f32 %v2140_v40, %v1031_v57  ;;  %965 = vst.msk [vmem:[#allocation2 + $0x30] sm:$0xff] %vm251_vm1, %v900_v11  ;;  %v1047_v8 = vld [vmem:[#allocation2 + $0xa8] sm:$0xff] }
  0xce   : > { %v901_v49 = vadd.f32 %v751_v2, %v323_v51  ;;  %v1214_v62 = vadd.f32 %v2149_v45, %v1146_v48  ;;  %981 = vst.msk [vmem:[#allocation2 + $0xb0] sm:$0xff] %vm251_vm1, %v916_v39  ;;  %v917_v63 = vadd.f32 %v791_v3, %v339_v55  ;;  %v1390_v6 = vsel %vm1262_vm7, %v1198_v56, %v1326_v61  ;;  %v1063_v20 = vld [vmem:[#allocation2 + $0x128] sm:$0xff] }
  0xcf   : > { %v1167_v0 = vadd.f32 %v2149_v45, %v1099_v59  ;;  %997 = vst.msk [vmem:[#allocation2 + $0x130] sm:$0xff] %vm251_vm1, %v932_v41  ;;  %v1454_v12 = vpack.c.bf16 %v1390_v6, %v1390_v6  ;;  %v1115_v14 = vmul.f32 %v2140_v40, %v1047_v8  ;;  %v1131_v27 = vmul.f32 %v2140_v40, %v1063_v20  ;;  %v357_v6 = vld [vmem:[#allocation2 + $0x148] sm:$0xff] }
  0xd0   : > { %vm1278_vm8 = vcmp.gt.f32.partialorder %v1214_v62, 0.0  ;;  %v1342_v7 = vmul.f32 0.2, %v1214_v62  ;;  %1013 = vst.msk [vmem:[#allocation2 + $0x1b0] sm:$0xff] %vm251_vm1, %v948_v58 }
  0xd1   : > { %vm1231_vm9 = vcmp.gt.f32.partialorder %v1167_v0, 0.0  ;;  %v1295_v13 = vmul.f32 0.2, %v1167_v0  ;;  %966 = vst.msk [vmem:[#allocation2 + $0x38] sm:$0xff] %vm251_vm1, %v901_v49  ;;  %v1183_v26 = vadd.f32 %v2149_v45, %v1115_v14  ;;  %v1199_v36 = vadd.f32 %v2149_v45, %v1131_v27 }
  0xd2   : > { %v1406_v19 = vsel %vm1278_vm8, %v1214_v62, %v1342_v7  ;;  %982 = vst.msk [vmem:[#allocation2 + $0xb8] sm:$0xff] %vm251_vm1, %v917_v63 }
  0xd3   : > { %1519 = vst.msk [vmem:[%s2174_s10 + $0x90] sm:$0xf] %vm1482_vm3, %v1454_v12  ;;  %v1470_v24 = vpack.c.bf16 %v1406_v19, %v1406_v19  ;;  %v1359_v25 = vsel %vm1231_vm9, %v1167_v0, %v1295_v13  ;;  %v1079_v28 = vld [vmem:[#allocation2 + $0x1a8] sm:$0xff]  ;;  %vm1247_vm10 = vcmp.gt.f32.partialorder %v1183_v26, 0.0  ;;  %v1311_v35 = vmul.f32 0.2, %v1183_v26 }
  0xd4   : > { %v831_v46 = vpop.f32.mrf.mxu2  ;;  %v871_v47 = vpop.f32.mrf.mxu3  ;;  %v1423_v31 = vpack.c.bf16 %v1359_v25, %v1359_v25  ;;  %v1147_v32 = vmul.f32 %v2140_v40, %v1079_v28  ;;  %v1032_v33 = vld [vmem:[#allocation2 + $0x30] sm:$0xff]  ;;  %vm1263_vm11 = vcmp.gt.f32.partialorder %v1199_v36, 0.0  ;;  %v1327_v50 = vmul.f32 0.2, %v1199_v36 }
  0xd5   : > { %v754_v52 = vpop.f32.mrf.mxu0  ;;  %v794_v53 = vpop.f32.mrf.mxu1  ;;  %v933_v9 = vadd.f32 %v831_v46, %v355_v60  ;;  %v949_v21 = vadd.f32 %v871_v47, %v371_v1  ;;  %1535 = vst.msk [vmem:[%s2174_s10 + $0xd0] sm:$0xf] %vm1482_vm3, %v1470_v24  ;;  %v1100_v37 = vmul.f32 %v2140_v40, %v1032_v33  ;;  %v1048_v38 = vld [vmem:[#allocation2 + $0xb0] sm:$0xff]  ;;  %v1375_v47 = vsel %vm1247_vm10, %v1183_v26, %v1311_v35 }
  0xd6   : > { %v902_v22 = vadd.f32 %v754_v52, %v324_v4  ;;  %v918_v2 = vadd.f32 %v794_v53, %v340_v5  ;;  %1488 = vst.msk [vmem:[%s2174_s10 + $0x14] sm:$0xf] %vm1482_vm3, %v1423_v31  ;;  %v1215_v42 = vadd.f32 %v2149_v45, %v1147_v32  ;;  %v1116_v43 = vmul.f32 %v2140_v40, %v1048_v38  ;;  %v1064_v11 = vld [vmem:[#allocation2 + $0x130] sm:$0xff] }
  0xd7   : > { %998 = vst.msk [vmem:[#allocation2 + $0x138] sm:$0xff] %vm251_vm1, %v933_v9  ;;  %v1168_v39 = vadd.f32 %v2149_v45, %v1100_v37  ;;  %v1439_v51 = vpack.c.bf16 %v1375_v47, %v1375_v47  ;;  %v1080_v54 = vld [vmem:[#allocation2 + $0x1b0] sm:$0xff]  ;;  %v1391_v41 = vsel %vm1263_vm11, %v1199_v36, %v1327_v50  ;;  %v1132_v56 = vmul.f32 %v2140_v40, %v1064_v11  ;;  %v373_v37 = vld [vmem:[#allocation2 + $0x1c8] sm:$0xff] }
  0xd8   : > { %1014 = vst.msk [vmem:[#allocation2 + $0x1b8] sm:$0xff] %vm251_vm1, %v949_v21  ;;  %vm1279_vm12 = vcmp.gt.f32.partialorder %v1215_v42, 0.0  ;;  %v1343_v52 = vmul.f32 0.2, %v1215_v42  ;;  %v1184_v53 = vadd.f32 %v2149_v45, %v1116_v43  ;;  %v1033_v48 = vld [vmem:[#allocation2 + $0x38] sm:$0xff]  ;;  %v1455_v49 = vpack.c.bf16 %v1391_v41, %v1391_v41 }
  0xd9   : > { %967 = vst.msk [vmem:[#allocation2 + $0x40] sm:$0xff] %vm251_vm1, %v902_v22  ;;  %vm1232_vm13 = vcmp.gt.f32.partialorder %v1168_v39, 0.0  ;;  %v1296_v55 = vmul.f32 0.2, %v1168_v39  ;;  %v1049_v57 = vld [vmem:[#allocation2 + $0xb8] sm:$0xff]  ;;  %v1200_v1 = vadd.f32 %v2149_v45, %v1132_v56  ;;  %v1148_v4 = vmul.f32 %v2140_v40, %v1080_v54 }
  0xda   : > { %983 = vst.msk [vmem:[#allocation2 + $0xc0] sm:$0xff] %vm251_vm1, %v918_v2  ;;  %v1407_v60 = vsel %vm1279_vm12, %v1215_v42, %v1343_v52  ;;  %vm1248_vm14 = vcmp.gt.f32.partialorder %v1184_v53, 0.0  ;;  %v1312_v61 = vmul.f32 0.2, %v1184_v53  ;;  %v1101_v9 = vmul.f32 %v2140_v40, %v1033_v48 }
  0xdb   : > { %1504 = vst.msk [vmem:[%s2174_s10 + $0x54] sm:$0xf] %vm1482_vm3, %v1439_v51  ;;  %v1471_v63 = vpack.c.bf16 %v1407_v60, %v1407_v60  ;;  %v1360_v0 = vsel %vm1232_vm13, %v1168_v39, %v1296_v55  ;;  %v1117_v12 = vmul.f32 %v2140_v40, %v1049_v57  ;;  %vm1264_vm15 = vcmp.gt.f32.partialorder %v1200_v1, 0.0 }
  0xdc   : > { %v834_v16 = vpop.f32.mrf.mxu2  ;;  %v874_v18 = vpop.f32.mrf.mxu3  ;;  %1520 = vst.msk [vmem:[%s2174_s10 + $0x94] sm:$0xf] %vm1482_vm3, %v1455_v49  ;;  %v1424_v7 = vpack.c.bf16 %v1360_v0, %v1360_v0  ;;  %v1376_v8 = vsel %vm1248_vm14, %v1184_v53, %v1312_v61  ;;  %v342_v0 = vld [vmem:[#allocation2 + $0xd0] sm:$0xff] }
  0xdd   : > { %v756_v3 = vpop.f32.mrf.mxu0  ;;  %v796_v23 = vpop.f32.mrf.mxu1  ;;  %v934_v10 = vadd.f32 %v834_v16, %v356_v15  ;;  %v2324_v34 = vadd.f32 %v874_v18, %v372_v17  ;;  %1536 = vst.msk [vmem:[%s2174_s10 + $0xd4] sm:$0xf] %vm1482_vm3, %v1471_v63  ;;  %v1440_v14 = vpack.c.bf16 %v1376_v8, %v1376_v8  ;;  %v1328_v15 = vmul.f32 0.2, %v1200_v1 }
  0xde   : > { %v2334_v44 = vadd.f32 %v756_v3, %v325_v29  ;;  %v2336_v46 = vadd.f32 %v796_v23, %v341_v30  ;;  %v1065_v5 = vld [vmem:[#allocation2 + $0x138] sm:$0xff]  ;;  %v1216_v16 = vadd.f32 %v2149_v45, %v1148_v4  ;;  %1489 = vst.msk [vmem:[%s2174_s10 + $0x18] sm:$0xf] %vm1482_vm3, %v1424_v7  ;;  %v1169_v17 = vadd.f32 %v2149_v45, %v1101_v9 }
  0xdf   : > { %999 = vst.msk [vmem:[#allocation2 + $0x140] sm:$0xff] %vm251_vm1, %v934_v10  ;;  %v1185_v18 = vadd.f32 %v2149_v45, %v1117_v12  ;;  %v1133_v19 = vmul.f32 %v2140_v40, %v1065_v5  ;;  %v1081_v20 = vld [vmem:[#allocation2 + $0x1b8] sm:$0xff]  ;;  %v1392_v22 = vsel %vm1264_vm15, %v1200_v1, %v1328_v15  ;;  %v358_v1 = vld [vmem:[#allocation2 + $0x150] sm:$0xff] }
  0xe0   : > { %1505 = vst.msk [vmem:[%s2174_s10 + $0x58] sm:$0xf] %vm1482_vm3, %v1440_v14  ;;  %vm1280_vm0 = vcmp.gt.f32.partialorder %v1216_v16, 0.0  ;;  %v1344_v2 = vmul.f32 0.2, %v1216_v16  ;;  %v1149_v3 = vmul.f32 %v2140_v40, %v1081_v20  ;;  %v1034_v23 = vld [vmem:[#allocation2 + $0x40] sm:$0xff]  ;;  %v1456_v24 = vpack.c.bf16 %v1392_v22, %v1392_v22 }
  0xe1   : > { %vm1233_vm2 = vcmp.gt.f32.partialorder %v1169_v17, 0.0  ;;  %v1297_v25 = vmul.f32 0.2, %v1169_v17  ;;  %vm1249_vm4 = vcmp.gt.f32.partialorder %v1185_v18, 0.0  ;;  %v1050_v26 = vld [vmem:[#allocation2 + $0xc0] sm:$0xff]  ;;  %1015 = vst.msk [vmem:[#allocation2 + $0x1c0] sm:$0xff] %vm251_vm1, %v2324_v34  ;;  %v1201_v29 = vadd.f32 %v2149_v45, %v1133_v19 }
  0xe2   : > { %v1408_v27 = vsel %vm1280_vm0, %v1216_v16, %v1344_v2  ;;  %v1313_v28 = vmul.f32 0.2, %v1185_v18  ;;  %v1217_v30 = vadd.f32 %v2149_v45, %v1149_v3  ;;  %968 = vst.msk [vmem:[#allocation2 + $0x48] sm:$0xff] %vm251_vm1, %v2334_v44  ;;  %v1102_v34 = vmul.f32 %v2140_v40, %v1034_v23  ;;  %v327_v3 = vld [vmem:[#allocation2 + $0x58] sm:$0xff] }
  0xe3   : > { %1521 = vst.msk [vmem:[%s2174_s10 + $0x98] sm:$0xf] %vm1482_vm3, %v1456_v24  ;;  %v1472_v33 = vpack.c.bf16 %v1408_v27, %v1408_v27  ;;  %v1361_v10 = vsel %vm1233_vm2, %v1169_v17, %v1297_v25  ;;  %v1118_v35 = vmul.f32 %v2140_v40, %v1050_v26  ;;  %vm1265_vm5 = vcmp.gt.f32.partialorder %v1201_v29, 0.0 }
  0xe4   : > { %v836_v58 = vpop.f32.mrf.mxu2  ;;  %v2344_v59 = vpop.f32.mrf.mxu3  ;;  %v1425_v38 = vpack.c.bf16 %v1361_v10, %v1361_v10  ;;  %v1377_v42 = vsel %vm1249_vm4, %v1185_v18, %v1313_v28  ;;  %v1329_v43 = vmul.f32 0.2, %v1201_v29  ;;  %984 = vst.msk [vmem:[#allocation2 + $0xc8] sm:$0xff] %vm251_vm1, %v2336_v46  ;;  %vm1281_vm6 = vcmp.gt.f32.partialorder %v1217_v30, 0.0  ;;  %v326_v46 = vld [vmem:[#allocation2 + $0x50] sm:$0xff] }
  0xe5   : > { %v2349_v62 = vpop.f32.mrf.mxu0  ;;  %v2358_v13 = vpop.f32.mrf.mxu1  ;;  %v935_v21 = vadd.f32 %v836_v58, %v357_v6  ;;  %1537 = vst.msk [vmem:[%s2174_s10 + $0xd8] sm:$0xf] %vm1482_vm3, %v1472_v33  ;;  %v1441_v44 = vpack.c.bf16 %v1377_v42, %v1377_v42  ;;  %v1345_v47 = vmul.f32 0.2, %v1217_v30  ;;  %v1170_v50 = vadd.f32 %v2149_v45, %v1102_v34  ;;  %v374_v18 = vld [vmem:[#allocation2 + $0x1d0] sm:$0xff]  ;;  %v359_v33 = vld [vmem:[#allocation2 + $0x158] sm:$0xff] }
  0xe6   : > { %v1066_v36 = vld [vmem:[#allocation2 + $0x140] sm:$0xff]  ;;  %1490 = vst.msk [vmem:[%s2174_s10 + $0x1c] sm:$0xf] %vm1482_vm3, %v1425_v38  ;;  %v1393_v39 = vsel %vm1265_vm5, %v1201_v29, %v1329_v43  ;;  %v1186_v51 = vadd.f32 %v2149_v45, %v1118_v35  ;;  %v951_v53 = vadd.f32 %v2344_v59, %v373_v37  ;;  %v904_v63 = vadd.f32 %v2349_v62, %v326_v46 }
  0xe7   : > { %v1134_v52 = vmul.f32 %v2140_v40, %v1066_v36  ;;  %1506 = vst.msk [vmem:[%s2174_s10 + $0x5c] sm:$0xf] %vm1482_vm3, %v1441_v44  ;;  %v1457_v54 = vpack.c.bf16 %v1393_v39, %v1393_v39  ;;  %v1409_v41 = vsel %vm1281_vm6, %v1217_v30, %v1345_v47  ;;  %vm1234_vm7 = vcmp.gt.f32.partialorder %v1170_v50, 0.0  ;;  %v343_v30 = vld [vmem:[#allocation2 + $0xd8] sm:$0xff] }
  0xe8   : > { %v1298_v55 = vmul.f32 0.2, %v1170_v50  ;;  %v1473_v48 = vpack.c.bf16 %v1409_v41, %v1409_v41  ;;  %vm1250_vm8 = vcmp.gt.f32.partialorder %v1186_v51, 0.0  ;;  %v1314_v57 = vmul.f32 0.2, %v1186_v51  ;;  %v1082_v49 = vld [vmem:[#allocation2 + $0x1c0] sm:$0xff] }
  0xe9   : > { %v1202_v58 = vadd.f32 %v2149_v45, %v1134_v52  ;;  %1000 = vst.msk [vmem:[#allocation2 + $0x148] sm:$0xff] %vm251_vm1, %v935_v21  ;;  %v1150_v60 = vmul.f32 %v2140_v40, %v1082_v49  ;;  %v1035_v61 = vld [vmem:[#allocation2 + $0x48] sm:$0xff]  ;;  %v920_v16 = vadd.f32 %v2358_v13, %v342_v0  ;;  %v375_v44 = vld [vmem:[#allocation2 + $0x1d8] sm:$0xff]  ;;  %v344_v41 = vld [vmem:[#allocation2 + $0xe0] sm:$0xff] }
  0xea   : > { %1522 = vst.msk [vmem:[%s2174_s10 + $0x9c] sm:$0xf] %vm1482_vm3, %v1457_v54  ;;  %v1362_v59 = vsel %vm1234_vm7, %v1170_v50, %v1298_v55  ;;  %v1378_v5 = vsel %vm1250_vm8, %v1186_v51, %v1314_v57  ;;  %v1103_v12 = vmul.f32 %v2140_v40, %v1035_v61  ;;  %v328_v51 = vld [vmem:[#allocation2 + $0x60] sm:$0xff] }
  0xeb   : > { %1538 = vst.msk [vmem:[%s2174_s10 + $0xdc] sm:$0xf] %vm1482_vm3, %v1473_v48  ;;  %v1426_v4 = vpack.c.bf16 %v1362_v59, %v1362_v59  ;;  %vm1266_vm9 = vcmp.gt.f32.partialorder %v1202_v58, 0.0  ;;  %v1330_v6 = vmul.f32 0.2, %v1202_v58  ;;  %v1442_v8 = vpack.c.bf16 %v1378_v5, %v1378_v5  ;;  %v1051_v14 = vld [vmem:[#allocation2 + $0xc8] sm:$0xff] }
  0xec   : > { %v839_v31 = vpop.f32.mrf.mxu2  ;;  %v2377_v32 = vpop.f32.mrf.mxu3  ;;  %v1218_v9 = vadd.f32 %v2149_v45, %v1150_v60  ;;  %1016 = vst.msk [vmem:[#allocation2 + $0x1c8] sm:$0xff] %vm251_vm1, %v951_v53  ;;  %v1119_v15 = vmul.f32 %v2140_v40, %v1051_v14  ;;  %v1171_v22 = vadd.f32 %v2149_v45, %v1103_v12  ;;  %v360_v55 = vld [vmem:[#allocation2 + $0x160] sm:$0xff] }
  0xed   : > { %v2386_v11 = vpop.f32.mrf.mxu0  ;;  %v2398_v56 = vpop.f32.mrf.mxu1  ;;  %1491 = vst.msk [vmem:[%s2174_s10 + $0x20] sm:$0xf] %vm1482_vm3, %v1426_v4  ;;  %v1394_v62 = vsel %vm1266_vm9, %v1202_v58, %v1330_v6  ;;  %v936_v17 = vadd.f32 %v839_v31, %v358_v1  ;;  %v952_v26 = vadd.f32 %v2377_v32, %v374_v18  ;;  %v2449_v49 = vld [vmem:[%s2580_s3] ss:$0 sm:$0xff] }
  0xee   : > { %1507 = vst.msk [vmem:[%s2174_s10 + $0x60] sm:$0xf] %vm1482_vm3, %v1442_v8  ;;  %v1458_v20 = vpack.c.bf16 %v1394_v62, %v1394_v62  ;;  %vm1282_vm10 = vcmp.gt.f32.partialorder %v1218_v9, 0.0  ;;  %v1346_v21 = vmul.f32 0.2, %v1218_v9  ;;  %v1187_v2 = vadd.f32 %v2149_v45, %v1119_v15  ;;  %v376_v6 = vld [vmem:[#allocation2 + $0x1e0] sm:$0xff] }
  0xef   : > { %969 = vst.msk [vmem:[#allocation2 + $0x50] sm:$0xff] %vm251_vm1, %v904_v63  ;;  %vm1235_vm11 = vcmp.gt.f32.partialorder %v1171_v22, 0.0  ;;  %v1299_v24 = vmul.f32 0.2, %v1171_v22  ;;  %v905_v37 = vadd.f32 %v2386_v11, %v327_v3  ;;  %v921_v43 = vadd.f32 %v2398_v56, %v343_v30  ;;  %v329_v15 = vld [vmem:[#allocation2 + $0x68] sm:$0xff] }
  0xf0   : > { %1523 = vst.msk [vmem:[%s2174_s10 + $0xa0] sm:$0xf] %vm1482_vm3, %v1458_v20  ;;  %v1410_v13 = vsel %vm1282_vm10, %v1218_v9, %v1346_v21  ;;  %v1067_v25 = vld [vmem:[#allocation2 + $0x148] sm:$0xff]  ;;  %vm1251_vm12 = vcmp.gt.f32.partialorder %v1187_v2, 0.0  ;;  %v1315_v28 = vmul.f32 0.2, %v1187_v2 }
  0xf1   : > { %v1474_v27 = vpack.c.bf16 %v1410_v13, %v1410_v13  ;;  %v1135_v29 = vmul.f32 %v2140_v40, %v1067_v25  ;;  %985 = vst.msk [vmem:[#allocation2 + $0xd0] sm:$0xff] %vm251_vm1, %v920_v16  ;;  %v1363_v31 = vsel %vm1235_vm11, %v1171_v22, %v1299_v24 }
  0xf2   : > { %1001 = vst.msk [vmem:[#allocation2 + $0x150] sm:$0xff] %vm251_vm1, %v936_v17  ;;  %v1427_v34 = vpack.c.bf16 %v1363_v31, %v1363_v31  ;;  %v1379_v35 = vsel %vm1251_vm12, %v1187_v2, %v1315_v28 }
  0xf3   : > { %1539 = vst.msk [vmem:[%s2174_s10 + $0xe0] sm:$0xf] %vm1482_vm3, %v1474_v27  ;;  %v1203_v32 = vadd.f32 %v2149_v45, %v1135_v29  ;;  %v1083_v36 = vld [vmem:[#allocation2 + $0x1c8] sm:$0xff]  ;;  %v1443_v38 = vpack.c.bf16 %v1379_v35, %v1379_v35 }
  0xf4   : > { %v841_v7 = vpop.f32.mrf.mxu2  ;;  %v881_v19 = vpop.f32.mrf.mxu3  ;;  %v1151_v42 = vmul.f32 %v2140_v40, %v1083_v36  ;;  %1017 = vst.msk [vmem:[#allocation2 + $0x1d0] sm:$0xff] %vm251_vm1, %v952_v26  ;;  %v2441_v40 = vld [vmem:[%s2579_s2] ss:$0 sm:$0xff]  ;;  %v345_v26 = vld [vmem:[#allocation2 + $0xe8] sm:$0xff] }
  0xf5   : > { %v764_v23 = vpop.f32.mrf.mxu0  ;;  %v804_v10 = vpop.f32.mrf.mxu1  ;;  %1492 = vst.msk [vmem:[%s2174_s10 + $0x24] sm:$0xf] %vm1482_vm3, %v1427_v34  ;;  %vm1267_vm13 = vcmp.gt.f32.partialorder %v1203_v32, 0.0  ;;  %v1331_v50 = vmul.f32 0.2, %v1203_v32  ;;  %v937_v39 = vadd.f32 %v841_v7, %v359_v33  ;;  %v953_v54 = vadd.f32 %v881_v19, %v375_v44  ;;  %v361_v27 = vld [vmem:[#allocation2 + $0x168] sm:$0xff] }
  0xf6   : > { %1508 = vst.msk [vmem:[%s2174_s10 + $0x64] sm:$0xf] %vm1482_vm3, %v1443_v38  ;;  %v1219_v52 = vadd.f32 %v2149_v45, %v1151_v42  ;;  %v1036_v11 = vld [vmem:[#allocation2 + $0x50] sm:$0xff]  ;;  %v906_v58 = vadd.f32 %v764_v23, %v328_v51  ;;  %v922_v4 = vadd.f32 %v804_v10, %v344_v41 }
  0xf7   : > { %v1395_v53 = vsel %vm1267_vm13, %v1203_v32, %v1331_v50  ;;  %v1104_v46 = vmul.f32 %v2441_v40, %v1036_v11  ;;  %970 = vst.msk [vmem:[#allocation2 + $0x58] sm:$0xff] %vm251_vm1, %v905_v37  ;;  %v377_v32 = vld [vmem:[#allocation2 + $0x1e8] sm:$0xff]  ;;  %v330_v44 = vld [vmem:[#allocation2 + $0x70] sm:$0xff] }
  0xf8   : > { %v1459_v48 = vpack.c.bf16 %v1395_v53, %v1395_v53  ;;  %vm1283_vm14 = vcmp.gt.f32.partialorder %v1219_v52, 0.0  ;;  %v1347_v57 = vmul.f32 0.2, %v1219_v52  ;;  %v1052_v45 = vld [vmem:[#allocation2 + $0xd0] sm:$0xff]  ;;  %986 = vst.msk [vmem:[#allocation2 + $0xd8] sm:$0xff] %vm251_vm1, %v921_v43 }
  0xf9   : > { %v1172_v59 = vadd.f32 %v2449_v49, %v1104_v46  ;;  %v1120_v60 = vmul.f32 %v2441_v40, %v1052_v45  ;;  %v1068_v61 = vld [vmem:[#allocation2 + $0x150] sm:$0xff]  ;;  %1002 = vst.msk [vmem:[#allocation2 + $0x158] sm:$0xff] %vm251_vm1, %v937_v39 }
  0xfa   : > { %1524 = vst.msk [vmem:[%s2174_s10 + $0xa4] sm:$0xf] %vm1482_vm3, %v1459_v48  ;;  %v1411_v0 = vsel %vm1283_vm14, %v1219_v52, %v1347_v57  ;;  %v1136_v1 = vmul.f32 %v2441_v40, %v1068_v61 }
  0xfb   : > { %v1475_v7 = vpack.c.bf16 %v1411_v0, %v1411_v0  ;;  %vm1236_vm15 = vcmp.gt.f32.partialorder %v1172_v59, 0.0  ;;  %v1300_v8 = vmul.f32 0.2, %v1172_v59  ;;  %v1188_v9 = vadd.f32 %v2449_v49, %v1120_v60  ;;  %v1084_v12 = vld [vmem:[#allocation2 + $0x1d0] sm:$0xff]  ;;  %1018 = vst.msk [vmem:[#allocation2 + $0x1d8] sm:$0xff] %vm251_vm1, %v953_v54 }
  0xfc   : > { %v844_v47 = vpop.f32.mrf.mxu2  ;;  %v884_v56 = vpop.f32.mrf.mxu3  ;;  %v1204_v14 = vadd.f32 %v2449_v49, %v1136_v1  ;;  %v1152_v62 = vmul.f32 %v2441_v40, %v1084_v12  ;;  %971 = vst.msk [vmem:[#allocation2 + $0x60] sm:$0xff] %vm251_vm1, %v906_v58 }
  0xfd   : > { %v766_v63 = vpop.f32.mrf.mxu0  ;;  %v938_v5 = vadd.f32 %v844_v47, %v360_v55  ;;  %v806_v16 = vpop.f32.mrf.mxu1  ;;  %1540 = vst.msk [vmem:[%s2174_s10 + $0xe4] sm:$0xf] %vm1482_vm3, %v1475_v7  ;;  %v1364_v17 = vsel %vm1236_vm15, %v1172_v59, %v1300_v8  ;;  %vm1252_vm0 = vcmp.gt.f32.partialorder %v1188_v9, 0.0  ;;  %v1316_v18 = vmul.f32 0.2, %v1188_v9 }
  0xfe   : > { %v954_v19 = vadd.f32 %v884_v56, %v376_v6  ;;  %v1428_v20 = vpack.c.bf16 %v1364_v17, %v1364_v17  ;;  %vm1268_vm2 = vcmp.gt.f32.partialorder %v1204_v14, 0.0  ;;  %v1332_v21 = vmul.f32 0.2, %v1204_v14  ;;  %v1037_v2 = vld [vmem:[#allocation2 + $0x58] sm:$0xff]  ;;  %987 = vst.msk [vmem:[#allocation2 + $0xe0] sm:$0xff] %vm251_vm1, %v922_v4  ;;  %v346_v4 = vld [vmem:[#allocation2 + $0xf0] sm:$0xff] }
  0xff   : > { %v1220_v22 = vadd.f32 %v2449_v49, %v1152_v62  ;;  %v1380_v23 = vsel %vm1252_vm0, %v1188_v9, %v1316_v18  ;;  %v1105_v13 = vmul.f32 %v2441_v40, %v1037_v2  ;;  %v1053_v24 = vld [vmem:[#allocation2 + $0xd8] sm:$0xff]  ;;  %1003 = vst.msk [vmem:[#allocation2 + $0x160] sm:$0xff] %vm251_vm1, %v938_v5  ;;  %v907_v25 = vadd.f32 %v766_v63, %v329_v15 }
 0x100   : > { %1493 = vst.msk [vmem:[%s2174_s10 + $0x28] sm:$0xf] %vm1482_vm3, %v1428_v20  ;;  %v1444_v28 = vpack.c.bf16 %v1380_v23, %v1380_v23  ;;  %v1396_v29 = vsel %vm1268_vm2, %v1204_v14, %v1332_v21  ;;  %v1069_v31 = vld [vmem:[#allocation2 + $0x158] sm:$0xff]  ;;  %v1121_v34 = vmul.f32 %v2441_v40, %v1053_v24  ;;  %v923_v42 = vadd.f32 %v806_v16, %v345_v26 }
 0x101   : > { %vm1284_vm4 = vcmp.gt.f32.partialorder %v1220_v22, 0.0  ;;  %v1348_v30 = vmul.f32 0.2, %v1220_v22  ;;  %v1460_v33 = vpack.c.bf16 %v1396_v29, %v1396_v29  ;;  %v1173_v10 = vadd.f32 %v2449_v49, %v1105_v13  ;;  %1019 = vst.msk [vmem:[#allocation2 + $0x1e0] sm:$0xff] %vm251_vm1, %v954_v19  ;;  %v362_v19 = vld [vmem:[#allocation2 + $0x170] sm:$0xff] }
 0x102   : > { %v1137_v35 = vmul.f32 %v2441_v40, %v1069_v31  ;;  %1509 = vst.msk [vmem:[%s2174_s10 + $0x68] sm:$0xf] %vm1482_vm3, %v1444_v28  ;;  %v1085_v38 = vld [vmem:[#allocation2 + $0x1d8] sm:$0xff]  ;;  %v1189_v39 = vadd.f32 %v2449_v49, %v1121_v34  ;;  %v378_v29 = vld [vmem:[#allocation2 + $0x1f0] sm:$0xff] }
 0x103   : > { %v1412_v37 = vsel %vm1284_vm4, %v1220_v22, %v1348_v30  ;;  %1525 = vst.msk [vmem:[%s2174_s10 + $0xa8] sm:$0xf] %vm1482_vm3, %v1460_v33  ;;  %vm1237_vm5 = vcmp.gt.f32.partialorder %v1173_v10, 0.0  ;;  %v1301_v50 = vmul.f32 0.2, %v1173_v10  ;;  %v1038_v51 = vld [vmem:[#allocation2 + $0x60] sm:$0xff]  ;;  %v1153_v53 = vmul.f32 %v2441_v40, %v1085_v38 }
 0x104   : > { %v846_v3 = vpop.f32.mrf.mxu2  ;;  %v886_v36 = vpop.f32.mrf.mxu3  ;;  %v1476_v47 = vpack.c.bf16 %v1412_v37, %v1412_v37  ;;  %v1205_v11 = vadd.f32 %v2449_v49, %v1137_v35  ;;  %v1106_v46 = vmul.f32 %v2441_v40, %v1038_v51  ;;  %972 = vst.msk [vmem:[#allocation2 + $0x68] sm:$0xff] %vm251_vm1, %v907_v25  ;;  %vm1253_vm6 = vcmp.gt.f32.partialorder %v1189_v39, 0.0  ;;  %v331_v30 = vld [vmem:[#allocation2 + $0x78] sm:$0xff] }
 0x105   : > { %v939_v43 = vadd.f32 %v846_v3, %v361_v27  ;;  %v769_v52 = vpop.f32.mrf.mxu0  ;;  %v955_v54 = vadd.f32 %v886_v36, %v377_v32  ;;  %v1365_v41 = vsel %vm1237_vm5, %v1173_v10, %v1301_v50  ;;  %v1317_v55 = vmul.f32 0.2, %v1189_v39  ;;  %v1054_v56 = vld [vmem:[#allocation2 + $0xe0] sm:$0xff]  ;;  %988 = vst.msk [vmem:[#allocation2 + $0xe8] sm:$0xff] %vm251_vm1, %v923_v42  ;;  %v809_v60 = vpop.f32.mrf.mxu1  ;;  %v347_v50 = vld [vmem:[#allocation2 + $0xf8] sm:$0xff] }
 0x106   : > { %1541 = vst.msk [vmem:[%s2174_s10 + $0xe8] sm:$0xf] %vm1482_vm3, %v1476_v47  ;;  %v908_v48 = vadd.f32 %v769_v52, %v330_v44  ;;  %v1429_v57 = vpack.c.bf16 %v1365_v41, %v1365_v41  ;;  %vm1269_vm7 = vcmp.gt.f32.partialorder %v1205_v11, 0.0  ;;  %v1333_v45 = vmul.f32 0.2, %v1205_v11  ;;  %v1070_v59 = vld [vmem:[#allocation2 + $0x160] sm:$0xff] }
 0x107   : > { %v1221_v58 = vadd.f32 %v2449_v49, %v1153_v53  ;;  %v1381_v61 = vsel %vm1253_vm6, %v1189_v39, %v1317_v55  ;;  %v1174_v63 = vadd.f32 %v2449_v49, %v1106_v46  ;;  %v1122_v0 = vmul.f32 %v2441_v40, %v1054_v56  ;;  %1004 = vst.msk [vmem:[#allocation2 + $0x168] sm:$0xff] %vm251_vm1, %v939_v43 }
 0x108   : > { %v1138_v1 = vmul.f32 %v2441_v40, %v1070_v59  ;;  %1494 = vst.msk [vmem:[%s2174_s10 + $0x2c] sm:$0xf] %vm1482_vm3, %v1429_v57  ;;  %v1445_v5 = vpack.c.bf16 %v1381_v61, %v1381_v61  ;;  %v1397_v6 = vsel %vm1269_vm7, %v1205_v11, %v1333_v45  ;;  %v1086_v8 = vld [vmem:[#allocation2 + $0x1e0] sm:$0xff]  ;;  %v924_v18 = vadd.f32 %v809_v60, %v346_v4 }
 0x109   : > { %vm1285_vm8 = vcmp.gt.f32.partialorder %v1221_v58, 0.0  ;;  %v1349_v7 = vmul.f32 0.2, %v1221_v58  ;;  %v1461_v12 = vpack.c.bf16 %v1397_v6, %v1397_v6  ;;  %vm1238_vm9 = vcmp.gt.f32.partialorder %v1174_v63, 0.0  ;;  %1020 = vst.msk [vmem:[#allocation2 + $0x1e8] sm:$0xff] %vm251_vm1, %v955_v54  ;;  %v363_v54 = vld [vmem:[#allocation2 + $0x178] sm:$0xff] }
 0x10a   : > { %v1302_v14 = vmul.f32 0.2, %v1174_v63  ;;  %v1190_v62 = vadd.f32 %v2449_v49, %v1122_v0  ;;  %1510 = vst.msk [vmem:[%s2174_s10 + $0x6c] sm:$0xf] %vm1482_vm3, %v1445_v5  ;;  %v1206_v16 = vadd.f32 %v2449_v49, %v1138_v1  ;;  %v1154_v17 = vmul.f32 %v2441_v40, %v1086_v8  ;;  %v379_v0 = vld [vmem:[#allocation2 + $0x1f8] sm:$0xff] }
 0x10b   : > { %v1413_v15 = vsel %vm1285_vm8, %v1221_v58, %v1349_v7  ;;  %1526 = vst.msk [vmem:[%s2174_s10 + $0xac] sm:$0xf] %vm1482_vm3, %v1461_v12  ;;  %v1039_v2 = vld [vmem:[#allocation2 + $0x68] sm:$0xff] }
 0x10c   : > { %v849_v9 = vpop.f32.mrf.mxu2  ;;  %v1477_v20 = vpack.c.bf16 %v1413_v15, %v1413_v15  ;;  %v1366_v21 = vsel %vm1238_vm9, %v1174_v63, %v1302_v14  ;;  %vm1254_vm10 = vcmp.gt.f32.partialorder %v1190_v62, 0.0  ;;  %v1318_v22 = vmul.f32 0.2, %v1190_v62  ;;  %v889_v3 = vpop.f32.mrf.mxu3  ;;  %973 = vst.msk [vmem:[#allocation2 + $0x70] sm:$0xff] %vm251_vm1, %v908_v48  ;;  %v1055_v27 = vld [vmem:[#allocation2 + $0xe8] sm:$0xff] }
 0x10d   : > { %v1430_v23 = vpack.c.bf16 %v1366_v21, %v1366_v21  ;;  %vm1270_vm11 = vcmp.gt.f32.partialorder %v1206_v16, 0.0  ;;  %v1334_v13 = vmul.f32 0.2, %v1206_v16  ;;  %v1222_v24 = vadd.f32 %v2449_v49, %v1154_v17  ;;  %v771_v31 = vpop.f32.mrf.mxu0  ;;  %989 = vst.msk [vmem:[#allocation2 + $0xf0] sm:$0xff] %vm251_vm1, %v924_v18  ;;  %v811_v39 = vpop.f32.mrf.mxu1 }
 0x10e   : > { %1542 = vst.msk [vmem:[%s2174_s10 + $0xec] sm:$0xf] %vm1482_vm3, %v1477_v20  ;;  %v1382_v25 = vsel %vm1254_vm10, %v1190_v62, %v1318_v22  ;;  %v1107_v26 = vmul.f32 %v2441_v40, %v1039_v2  ;;  %v940_v28 = vadd.f32 %v849_v9, %v362_v19  ;;  %v1071_v35 = vld [vmem:[#allocation2 + $0x168] sm:$0xff]  ;;  %v1123_v37 = vmul.f32 %v2441_v40, %v1055_v27 }
 0x10f   : > { %1495 = vst.msk [vmem:[%s2174_s10 + $0x30] sm:$0xf] %vm1482_vm3, %v1430_v23  ;;  %v1446_v33 = vpack.c.bf16 %v1382_v25, %v1382_v25  ;;  %v1398_v10 = vsel %vm1270_vm11, %v1206_v16, %v1334_v13  ;;  %vm1286_vm12 = vcmp.gt.f32.partialorder %v1222_v24, 0.0  ;;  %v1350_v34 = vmul.f32 0.2, %v1222_v24 }
 0x110   : > { %v1462_v32 = vpack.c.bf16 %v1398_v10, %v1398_v10  ;;  %v1175_v36 = vadd.f32 %v2449_v49, %v1107_v26  ;;  %v1139_v38 = vmul.f32 %v2441_v40, %v1071_v35  ;;  %v1087_v43 = vld [vmem:[#allocation2 + $0x1e8] sm:$0xff]  ;;  %v956_v44 = vadd.f32 %v889_v3, %v378_v29  ;;  %1005 = vst.msk [vmem:[#allocation2 + $0x170] sm:$0xff] %vm251_vm1, %v940_v28 }
 0x111   : > { %1511 = vst.msk [vmem:[%s2174_s10 + $0x70] sm:$0xf] %vm1482_vm3, %v1446_v33  ;;  %v1414_v42 = vsel %vm1286_vm12, %v1222_v24, %v1350_v34  ;;  %v909_v47 = vadd.f32 %v771_v31, %v331_v30  ;;  %v1191_v11 = vadd.f32 %v2449_v49, %v1123_v37  ;;  %v1155_v46 = vmul.f32 %v2441_v40, %v1087_v43 }
 0x112   : > { %1527 = vst.msk [vmem:[%s2174_s10 + $0xb0] sm:$0xf] %vm1482_vm3, %v1462_v32  ;;  %v1478_v51 = vpack.c.bf16 %v1414_v42, %v1414_v42  ;;  %vm1239_vm13 = vcmp.gt.f32.partialorder %v1175_v36, 0.0  ;;  %v1303_v52 = vmul.f32 0.2, %v1175_v36  ;;  %v1207_v53 = vadd.f32 %v2449_v49, %v1139_v38 }
 0x113   : > { %vm1255_vm14 = vcmp.gt.f32.partialorder %v1191_v11, 0.0  ;;  %v1319_v56 = vmul.f32 0.2, %v1191_v11  ;;  %v1040_v48 = vld [vmem:[#allocation2 + $0x70] sm:$0xff]  ;;  %v925_v57 = vadd.f32 %v811_v39, %v347_v50  ;;  %v1223_v59 = vadd.f32 %v2449_v49, %v1155_v46  ;;  %1021 = vst.msk [vmem:[#allocation2 + $0x1f0] sm:$0xff] %vm251_vm1, %v956_v44 }
 0x114   : > { %v851_v41 = vpop.f32.mrf.mxu2  ;;  %1543 = vst.msk [vmem:[%s2174_s10 + $0xf0] sm:$0xf] %vm1482_vm3, %v1478_v51  ;;  %v1367_v55 = vsel %vm1239_vm13, %v1175_v36, %v1303_v52  ;;  %vm1271_vm15 = vcmp.gt.f32.partialorder %v1207_v53, 0.0  ;;  %v1335_v58 = vmul.f32 0.2, %v1207_v53  ;;  %v1108_v61 = vmul.f32 %v2441_v40, %v1040_v48  ;;  %v891_v1 = vpop.f32.mrf.mxu3  ;;  %v1056_v7 = vld [vmem:[#allocation2 + $0xf0] sm:$0xff] }
 0x115   : > { %v1431_v45 = vpack.c.bf16 %v1367_v55, %v1367_v55  ;;  %v1383_v60 = vsel %vm1255_vm14, %v1191_v11, %v1319_v56  ;;  %974 = vst.msk [vmem:[#allocation2 + $0x78] sm:$0xff] %vm251_vm1, %v909_v47  ;;  %v941_v63 = vadd.f32 %v851_v41, %v363_v54  ;;  %vm1287_vm0 = vcmp.gt.f32.partialorder %v1223_v59, 0.0 }
 0x116   : > { %v1447_v4 = vpack.c.bf16 %v1383_v60, %v1383_v60  ;;  %v1399_v5 = vsel %vm1271_vm15, %v1207_v53, %v1335_v58  ;;  %v1351_v6 = vmul.f32 0.2, %v1223_v59  ;;  %v1176_v9 = vadd.f32 %v2449_v49, %v1108_v61  ;;  %990 = vst.msk [vmem:[#allocation2 + $0xf8] sm:$0xff] %vm251_vm1, %v925_v57 }
 0x117   : > { %1496 = vst.msk [vmem:[%s2174_s10 + $0x34] sm:$0xf] %vm1482_vm3, %v1431_v45  ;;  %v1463_v8 = vpack.c.bf16 %v1399_v5, %v1399_v5  ;;  %v1124_v12 = vmul.f32 %v2441_v40, %v1056_v7  ;;  %v957_v62 = vadd.f32 %v891_v1, %v379_v0  ;;  %v1072_v18 = vld [vmem:[#allocation2 + $0x170] sm:$0xff] }
 0x118   : > { %1512 = vst.msk [vmem:[%s2174_s10 + $0x74] sm:$0xf] %vm1482_vm3, %v1447_v4  ;;  %v1415_v14 = vsel %vm1287_vm0, %v1223_v59, %v1351_v6  ;;  %vm1240_vm2 = vcmp.gt.f32.partialorder %v1176_v9, 0.0  ;;  %v1304_v16 = vmul.f32 0.2, %v1176_v9  ;;  %v1140_v19 = vmul.f32 %v2441_v40, %v1072_v18 }
 0x119   : > { %1528 = vst.msk [vmem:[%s2174_s10 + $0xb4] sm:$0xf] %vm1482_vm3, %v1463_v8  ;;  %v1479_v15 = vpack.c.bf16 %v1415_v14, %v1415_v14  ;;  %v1192_v17 = vadd.f32 %v2449_v49, %v1124_v12 }
 0x11a   : > { %1006 = vst.msk [vmem:[#allocation2 + $0x178] sm:$0xff] %vm251_vm1, %v941_v63  ;;  %v1368_v20 = vsel %vm1240_vm2, %v1176_v9, %v1304_v16  ;;  %v1088_v22 = vld [vmem:[#allocation2 + $0x1f0] sm:$0xff]  ;;  %v1208_v3 = vadd.f32 %v2449_v49, %v1140_v19 }
 0x11b   : > { %1544 = vst.msk [vmem:[%s2174_s10 + $0xf4] sm:$0xf] %vm1482_vm3, %v1479_v15  ;;  %vm1256_vm4 = vcmp.gt.f32.partialorder %v1192_v17, 0.0  ;;  %v1320_v21 = vmul.f32 0.2, %v1192_v17  ;;  %v1432_v2 = vpack.c.bf16 %v1368_v20, %v1368_v20  ;;  %v1156_v23 = vmul.f32 %v2441_v40, %v1088_v22 }
 0x11c   : > { %v1041_v13 = vld [vmem:[#allocation2 + $0x78] sm:$0xff]  ;;  %1022 = vst.msk [vmem:[#allocation2 + $0x1f8] sm:$0xff] %vm251_vm1, %v957_v62  ;;  %vm1272_vm5 = vcmp.gt.f32.partialorder %v1208_v3, 0.0  ;;  %v1336_v27 = vmul.f32 0.2, %v1208_v3 }
 0x11d   : > { %v1384_v24 = vsel %vm1256_vm4, %v1192_v17, %v1320_v21  ;;  %v1109_v25 = vmul.f32 %v2441_v40, %v1041_v13  ;;  %1497 = vst.msk [vmem:[%s2174_s10 + $0x38] sm:$0xf] %vm1482_vm3, %v1432_v2  ;;  %v1224_v28 = vadd.f32 %v2449_v49, %v1156_v23  ;;  %v1057_v29 = vld [vmem:[#allocation2 + $0xf8] sm:$0xff] }
 0x11e   : > { %v1448_v26 = vpack.c.bf16 %v1384_v24, %v1384_v24  ;;  %v1125_v31 = vmul.f32 %v2441_v40, %v1057_v29  ;;  %v1400_v33 = vsel %vm1272_vm5, %v1208_v3, %v1336_v27 }
 0x11f   : > { %v1177_v30 = vadd.f32 %v2449_v49, %v1109_v25  ;;  %vm1288_vm1 = vcmp.gt.f32.partialorder %v1224_v28, 0.0  ;;  %v1352_v10 = vmul.f32 0.2, %v1224_v28  ;;  %v1464_v34 = vpack.c.bf16 %v1400_v33, %v1400_v33 }
 0x120   : > { %1513 = vst.msk [vmem:[%s2174_s10 + $0x78] sm:$0xf] %vm1482_vm3, %v1448_v26  ;;  %v1193_v32 = vadd.f32 %v2449_v49, %v1125_v31 }
 0x121   : > { %vm1241_vm6 = vcmp.gt.f32.partialorder %v1177_v30, 0.0  ;;  %v1305_v35 = vmul.f32 0.2, %v1177_v30  ;;  %v1073_v36 = vld [vmem:[#allocation2 + $0x178] sm:$0xff]  ;;  %v1416_v37 = vsel %vm1288_vm1, %v1224_v28, %v1352_v10  ;;  %1529 = vst.msk [vmem:[%s2174_s10 + $0xb8] sm:$0xf] %vm1482_vm3, %v1464_v34 }
 0x122   : > { %v1141_v38 = vmul.f32 %v2441_v40, %v1073_v36  ;;  %v1480_v42 = vpack.c.bf16 %v1416_v37, %v1416_v37  ;;  %vm1257_vm7 = vcmp.gt.f32.partialorder %v1193_v32, 0.0  ;;  %v1321_v44 = vmul.f32 0.2, %v1193_v32 }
 0x123   : > { %v1369_v43 = vsel %vm1241_vm6, %v1177_v30, %v1305_v35  ;;  %v1089_v47 = vld [vmem:[#allocation2 + $0x1f8] sm:$0xff] }
 0x124   : > { %v1433_v50 = vpack.c.bf16 %v1369_v43, %v1369_v43  ;;  %v1209_v39 = vadd.f32 %v2449_v49, %v1141_v38  ;;  %v1157_v51 = vmul.f32 %v2441_v40, %v1089_v47  ;;  %1545 = vst.msk [vmem:[%s2174_s10 + $0xf8] sm:$0xf] %vm1482_vm3, %v1480_v42  ;;  %v1385_v52 = vsel %vm1257_vm7, %v1193_v32, %v1321_v44 }
 0x125   : > { %v1449_v11 = vpack.c.bf16 %v1385_v52, %v1385_v52 }
 0x126   : > { %1498 = vst.msk [vmem:[%s2174_s10 + $0x3c] sm:$0xf] %vm1482_vm3, %v1433_v50  ;;  %vm1273_vm8 = vcmp.gt.f32.partialorder %v1209_v39, 0.0  ;;  %v1337_v53 = vmul.f32 0.2, %v1209_v39  ;;  %v1225_v46 = vadd.f32 %v2449_v49, %v1157_v51 }
 0x127   : > { %1514 = vst.msk [vmem:[%s2174_s10 + $0x7c] sm:$0xf] %vm1482_vm3, %v1449_v11 }
 0x128   : > { %v1401_v54 = vsel %vm1273_vm8, %v1209_v39, %v1337_v53  ;;  %vm1289_vm9 = vcmp.gt.f32.partialorder %v1225_v46, 0.0  ;;  %v1353_v41 = vmul.f32 0.2, %v1225_v46 }
 0x129   : > { %v1465_v55 = vpack.c.bf16 %v1401_v54, %v1401_v54 }
 0x12a   : > { %v1417_v56 = vsel %vm1289_vm9, %v1225_v46, %v1353_v41 }
 0x12b   : > { %1530 = vst.msk [vmem:[%s2174_s10 + $0xbc] sm:$0xf] %vm1482_vm3, %v1465_v55  ;;  %v1481_v40 = vpack.c.bf16 %v1417_v56, %v1417_v56 }
 0x12d   : > { %1546 = vst.msk [vmem:[%s2174_s10 + $0xfc] sm:$0xf] %vm1482_vm3, %v1481_v40 }
 0x12e PF: > { %s14_s17 = sadd.s32 1, %s1909_s17   ;;  %s2582_s15 = smov %s1905_s16 }
 0x12f   : > { %p11_p5 = scmp.ge.s32.totalorder %s14_s17, 6   ;;  %s2583_s16 = smov %s2585_s18 }
 0x131   :  { %13 = sbr.rel (!%p11_p5) target bundleno = 2 (0x2), region = 77 }

// kernel: netD_forward.6
= control target key start
LH: loop header
LB: loop body
LE: loop exit
PB: predicated region body
PF: predicated region fallthrough
CT: control target
= control target key end

     0   :  { %vm21_vm0 = vcmask 130048   ;;  %v1525_v32 = vmov 0.0   ;;  %vm1227_vm2 = vcmask 125952   ;;  %s2322_s1 = inlined_call_operand.vmem [shape: bf16[128,16], index: 1, kind: input, shape index: {}]   ;;  %s2323_s2 = inlined_call_operand.vmem [shape: f32[1,16], index: 2, kind: input, shape index: {}]   ;;  %s2324_s3 = inlined_call_operand.vmem [shape: f32[1,16], index: 3, kind: input, shape index: {}]   ;;  %s2325_s0 = inlined_call_operand.vmem [shape: bf16[512,128], index: 0, kind: input, shape index: {}]   ;;  %s2326_s4 = inlined_call_operand.vmem [shape: bf16[512,16], index: 4, kind: output, shape index: {}]  }
   0x1   :  { %v1495_v0 = vld [vmem:[%s2322_s1 + $0x38] sm:$0xff]  ;;  %v1494_v1 = vld [vmem:[%s2322_s1 + $0x30] sm:$0xff]  ;;  %v1493_v2 = vld [vmem:[%s2322_s1 + $0x28] sm:$0xff]  ;;  %22 = vst.msk [vmem:[#allocation2] sm:$0xff] %vm21_vm0, %v1525_v32 }
   0x2   :  { %470 = vmatpush.bf16.msra.mxu0 %v1495_v0  ;;  %1496 = vmatpush.bf16.msra.mxu1 %v1495_v0  ;;  %v1492_v3 = vld [vmem:[%s2322_s1 + $0x20] sm:$0xff]  ;;  %v1491_v4 = vld [vmem:[%s2322_s1 + $0x18] sm:$0xff]  ;;  %v1490_v5 = vld [vmem:[%s2322_s1 + $0x10] sm:$0xff]  ;;  %23 = vst.msk [vmem:[#allocation2 + $0x8] sm:$0xff] %vm21_vm0, %v1525_v32 }
   0x3   :  { %1497 = vmatpush.bf16.msra.mxu2 %v1495_v0  ;;  %1498 = vmatpush.bf16.msra.mxu3 %v1495_v0  ;;  %v1489_v6 = vld [vmem:[%s2322_s1 + $0x8] sm:$0xff]  ;;  %v1488_v7 = vld [vmem:[%s2322_s1] sm:$0xff]  ;;  %v1458_v16 = vld [vmem:[%s2325_s0 + $0x10] sm:$0xff]  ;;  %24 = vst.msk [vmem:[#allocation2 + $0x10] sm:$0xff] %vm21_vm0, %v1525_v32 }
   0x4   :  { %v1456_v8 = vld [vmem:[%s2325_s0] sm:$0xff]  ;;  %v1457_v12 = vld [vmem:[%s2325_s0 + $0x8] sm:$0xff]  ;;  %v1466_v17 = vld [vmem:[%s2325_s0 + $0x50] sm:$0xff]  ;;  %25 = vst.msk [vmem:[#allocation2 + $0x18] sm:$0xff] %vm21_vm0, %v1525_v32 }
   0x5   :  { %v1464_v9 = vld [vmem:[%s2325_s0 + $0x40] sm:$0xff]  ;;  %v1465_v13 = vld [vmem:[%s2325_s0 + $0x48] sm:$0xff]  ;;  %v1474_v18 = vld [vmem:[%s2325_s0 + $0x90] sm:$0xff]  ;;  %26 = vst.msk [vmem:[#allocation2 + $0x20] sm:$0xff] %vm21_vm0, %v1525_v32 }
   0x6   :  { %471 = vmatpush.bf16.msra.mxu0 %v1494_v1  ;;  %1499 = vmatpush.bf16.msra.mxu1 %v1494_v1  ;;  %v1472_v10 = vld [vmem:[%s2325_s0 + $0x80] sm:$0xff]  ;;  %v1473_v14 = vld [vmem:[%s2325_s0 + $0x88] sm:$0xff]  ;;  %v1482_v19 = vld [vmem:[%s2325_s0 + $0xd0] sm:$0xff]  ;;  %27 = vst.msk [vmem:[#allocation2 + $0x28] sm:$0xff] %vm21_vm0, %v1525_v32 }
   0x7   :  { %1500 = vmatpush.bf16.msra.mxu2 %v1494_v1  ;;  %1501 = vmatpush.bf16.msra.mxu3 %v1494_v1  ;;  %v1480_v11 = vld [vmem:[%s2325_s0 + $0xc0] sm:$0xff]  ;;  %v1481_v15 = vld [vmem:[%s2325_s0 + $0xc8] sm:$0xff]  ;;  %v1459_v20 = vld [vmem:[%s2325_s0 + $0x18] sm:$0xff]  ;;  %28 = vst.msk [vmem:[#allocation2 + $0x30] sm:$0xff] %vm21_vm0, %v1525_v32 }
   0x8   :  { %v1467_v21 = vld [vmem:[%s2325_s0 + $0x58] sm:$0xff]  ;;  %v1460_v24 = vld [vmem:[%s2325_s0 + $0x20] sm:$0xff]  ;;  %v1461_v28 = vld [vmem:[%s2325_s0 + $0x28] sm:$0xff]  ;;  %29 = vst.msk [vmem:[#allocation2 + $0x38] sm:$0xff] %vm21_vm0, %v1525_v32 }
   0x9   :  { %v1475_v22 = vld [vmem:[%s2325_s0 + $0x98] sm:$0xff]  ;;  %v1468_v25 = vld [vmem:[%s2325_s0 + $0x60] sm:$0xff]  ;;  %v1469_v29 = vld [vmem:[%s2325_s0 + $0x68] sm:$0xff]  ;;  %30 = vst.msk [vmem:[#allocation2 + $0x40] sm:$0xff] %vm21_vm0, %v1525_v32 }
   0xa   :  { %472 = vmatpush.bf16.msra.mxu0 %v1493_v2  ;;  %1502 = vmatpush.bf16.msra.mxu1 %v1493_v2  ;;  %v1483_v23 = vld [vmem:[%s2325_s0 + $0xd8] sm:$0xff]  ;;  %v1476_v26 = vld [vmem:[%s2325_s0 + $0xa0] sm:$0xff]  ;;  %v1477_v30 = vld [vmem:[%s2325_s0 + $0xa8] sm:$0xff]  ;;  %31 = vst.msk [vmem:[#allocation2 + $0x48] sm:$0xff] %vm21_vm0, %v1525_v32 }
   0xb   :  { %1503 = vmatpush.bf16.msra.mxu2 %v1493_v2  ;;  %1504 = vmatpush.bf16.msra.mxu3 %v1493_v2  ;;  %v1484_v27 = vld [vmem:[%s2325_s0 + $0xe0] sm:$0xff]  ;;  %v1485_v31 = vld [vmem:[%s2325_s0 + $0xe8] sm:$0xff]  ;;  %v1462_v33 = vld [vmem:[%s2325_s0 + $0x30] sm:$0xff]  ;;  %32 = vst.msk [vmem:[#allocation2 + $0x50] sm:$0xff] %vm21_vm0, %v1525_v32 }
   0xc   :  { %v1470_v34 = vld [vmem:[%s2325_s0 + $0x70] sm:$0xff]  ;;  %33 = vst.msk [vmem:[#allocation2 + $0x58] sm:$0xff] %vm21_vm0, %v1525_v32  ;;  %v1463_v37 = vld [vmem:[%s2325_s0 + $0x38] sm:$0xff]  ;;  %v86_v41 = vld [vmem:[#allocation2] sm:$0xff] }
   0xd   :  { %v1478_v35 = vld [vmem:[%s2325_s0 + $0xb0] sm:$0xff]  ;;  %34 = vst.msk [vmem:[#allocation2 + $0x60] sm:$0xff] %vm21_vm0, %v1525_v32  ;;  %v1471_v38 = vld [vmem:[%s2325_s0 + $0x78] sm:$0xff]  ;;  %v1773_v45 = vld [vmem:[%s2323_s2] ss:$0 sm:$0xff] }
   0xe   :  { %473 = vmatpush.bf16.msra.mxu0 %v1492_v3  ;;  %1505 = vmatpush.bf16.msra.mxu1 %v1492_v3  ;;  %v1486_v36 = vld [vmem:[%s2325_s0 + $0xf0] sm:$0xff]  ;;  %35 = vst.msk [vmem:[#allocation2 + $0x68] sm:$0xff] %vm21_vm0, %v1525_v32  ;;  %v1479_v39 = vld [vmem:[%s2325_s0 + $0xb8] sm:$0xff]  ;;  %v1782_v50 = vld [vmem:[%s2324_s3] ss:$0 sm:$0xff] }
   0xf   :  { %1506 = vmatpush.bf16.msra.mxu2 %v1492_v3  ;;  %1507 = vmatpush.bf16.msra.mxu3 %v1492_v3  ;;  %36 = vst.msk [vmem:[#allocation2 + $0x70] sm:$0xff] %vm21_vm0, %v1525_v32  ;;  %v1487_v40 = vld [vmem:[%s2325_s0 + $0xf8] sm:$0xff]  ;;  %v87_v1 = vld [vmem:[#allocation2 + $0x8] sm:$0xff] }
  0x10   :  { %37 = vst.msk [vmem:[#allocation2 + $0x78] sm:$0xff] %vm21_vm0, %v1525_v32 }
  0x11   :  { %38 = vst.msk [vmem:[#allocation2 + $0x80] sm:$0xff] %vm21_vm0, %v1525_v32 }
  0x12   :  { %474 = vmatpush.bf16.msra.mxu0 %v1491_v4  ;;  %1508 = vmatpush.bf16.msra.mxu1 %v1491_v4  ;;  %39 = vst.msk [vmem:[#allocation2 + $0x88] sm:$0xff] %vm21_vm0, %v1525_v32 }
  0x13   :  { %1509 = vmatpush.bf16.msra.mxu2 %v1491_v4  ;;  %1510 = vmatpush.bf16.msra.mxu3 %v1491_v4  ;;  %40 = vst.msk [vmem:[#allocation2 + $0x90] sm:$0xff] %vm21_vm0, %v1525_v32 }
  0x14   :  { %41 = vst.msk [vmem:[#allocation2 + $0x98] sm:$0xff] %vm21_vm0, %v1525_v32 }
  0x15   :  { %42 = vst.msk [vmem:[#allocation2 + $0xa0] sm:$0xff] %vm21_vm0, %v1525_v32 }
  0x16   :  { %475 = vmatpush.bf16.msra.mxu0 %v1490_v5  ;;  %1511 = vmatpush.bf16.msra.mxu1 %v1490_v5  ;;  %43 = vst.msk [vmem:[#allocation2 + $0xa8] sm:$0xff] %vm21_vm0, %v1525_v32 }
  0x17   :  { %1512 = vmatpush.bf16.msra.mxu2 %v1490_v5  ;;  %1513 = vmatpush.bf16.msra.mxu3 %v1490_v5  ;;  %44 = vst.msk [vmem:[#allocation2 + $0xb0] sm:$0xff] %vm21_vm0, %v1525_v32 }
  0x18   :  { %45 = vst.msk [vmem:[#allocation2 + $0xb8] sm:$0xff] %vm21_vm0, %v1525_v32  ;;  %v102_v57 = vld [vmem:[#allocation2 + $0x80] sm:$0xff] }
  0x19   :  { %46 = vst.msk [vmem:[#allocation2 + $0xc0] sm:$0xff] %vm21_vm0, %v1525_v32  ;;  %v103_v3 = vld [vmem:[#allocation2 + $0x88] sm:$0xff] }
  0x1a   :  { %476 = vmatpush.bf16.msra.mxu0 %v1489_v6  ;;  %1514 = vmatpush.bf16.msra.mxu1 %v1489_v6  ;;  %47 = vst.msk [vmem:[#allocation2 + $0xc8] sm:$0xff] %vm21_vm0, %v1525_v32 }
  0x1b   :  { %1515 = vmatpush.bf16.msra.mxu2 %v1489_v6  ;;  %1516 = vmatpush.bf16.msra.mxu3 %v1489_v6  ;;  %48 = vst.msk [vmem:[#allocation2 + $0xd0] sm:$0xff] %vm21_vm0, %v1525_v32 }
  0x1c   :  { %49 = vst.msk [vmem:[#allocation2 + $0xd8] sm:$0xff] %vm21_vm0, %v1525_v32 }
  0x1d   :  { %50 = vst.msk [vmem:[#allocation2 + $0xe0] sm:$0xff] %vm21_vm0, %v1525_v32 }
  0x1e   :  { %477 = vmatpush.bf16.msra.mxu0 %v1488_v7  ;;  %1517 = vmatpush.bf16.msra.mxu1 %v1488_v7  ;;  %51 = vst.msk [vmem:[#allocation2 + $0xe8] sm:$0xff] %vm21_vm0, %v1525_v32 }
  0x1f   :  { %1518 = vmatpush.bf16.msra.mxu2 %v1488_v7  ;;  %1519 = vmatpush.bf16.msra.mxu3 %v1488_v7  ;;  %52 = vst.msk [vmem:[#allocation2 + $0xf0] sm:$0xff] %vm21_vm0, %v1525_v32 }
  0x20   :  { %53 = vst.msk [vmem:[#allocation2 + $0xf8] sm:$0xff] %vm21_vm0, %v1525_v32 }
  0x21   :  { %478 = vmatmul.bf16.vlgmr.msra.gmra.mxu0 %v1456_v8  ;;  %518 = vmatmul.bf16.vlgmr.msra.gmra.mxu1 %v1464_v9  ;;  %54 = vst.msk [vmem:[#allocation2 + $0x100] sm:$0xff] %vm21_vm0, %v1525_v32  ;;  %v88_v9 = vld [vmem:[#allocation2 + $0x10] sm:$0xff] }
  0x22   :  { %558 = vmatmul.bf16.vlgmr.msra.gmra.mxu2 %v1472_v10  ;;  %598 = vmatmul.bf16.vlgmr.msra.gmra.mxu3 %v1480_v11  ;;  %55 = vst.msk [vmem:[#allocation2 + $0x108] sm:$0xff] %vm21_vm0, %v1525_v32 }
  0x23   :  { %56 = vst.msk [vmem:[#allocation2 + $0x110] sm:$0xff] %vm21_vm0, %v1525_v32 }
  0x24   :  { %57 = vst.msk [vmem:[#allocation2 + $0x118] sm:$0xff] %vm21_vm0, %v1525_v32 }
  0x25   :  { %58 = vst.msk [vmem:[#allocation2 + $0x120] sm:$0xff] %vm21_vm0, %v1525_v32 }
  0x26   :  { %59 = vst.msk [vmem:[#allocation2 + $0x128] sm:$0xff] %vm21_vm0, %v1525_v32 }
  0x27   :  { %60 = vst.msk [vmem:[#allocation2 + $0x130] sm:$0xff] %vm21_vm0, %v1525_v32 }
  0x28   :  { %61 = vst.msk [vmem:[#allocation2 + $0x138] sm:$0xff] %vm21_vm0, %v1525_v32  ;;  %v118_v61 = vld [vmem:[#allocation2 + $0x100] sm:$0xff] }
  0x29   :  { %62 = vst.msk [vmem:[#allocation2 + $0x140] sm:$0xff] %vm21_vm0, %v1525_v32  ;;  %v119_v5 = vld [vmem:[#allocation2 + $0x108] sm:$0xff] }
  0x2a   :  { %63 = vst.msk [vmem:[#allocation2 + $0x148] sm:$0xff] %vm21_vm0, %v1525_v32 }
  0x2b   :  { %64 = vst.msk [vmem:[#allocation2 + $0x150] sm:$0xff] %vm21_vm0, %v1525_v32 }
  0x2c   :  { %65 = vst.msk [vmem:[#allocation2 + $0x158] sm:$0xff] %vm21_vm0, %v1525_v32 }
  0x2d   :  { %66 = vst.msk [vmem:[#allocation2 + $0x160] sm:$0xff] %vm21_vm0, %v1525_v32 }
  0x2e   :  { %67 = vst.msk [vmem:[#allocation2 + $0x168] sm:$0xff] %vm21_vm0, %v1525_v32 }
  0x2f   :  { %68 = vst.msk [vmem:[#allocation2 + $0x170] sm:$0xff] %vm21_vm0, %v1525_v32 }
  0x30   :  { %69 = vst.msk [vmem:[#allocation2 + $0x178] sm:$0xff] %vm21_vm0, %v1525_v32 }
  0x31   :  { %483 = vmatmul.bf16.gmra.mxu0 %v1457_v12  ;;  %523 = vmatmul.bf16.gmra.mxu1 %v1465_v13  ;;  %70 = vst.msk [vmem:[#allocation2 + $0x180] sm:$0xff] %vm21_vm0, %v1525_v32  ;;  %v104_v13 = vld [vmem:[#allocation2 + $0x90] sm:$0xff] }
  0x32   :  { %563 = vmatmul.bf16.gmra.mxu2 %v1473_v14  ;;  %603 = vmatmul.bf16.gmra.mxu3 %v1481_v15  ;;  %71 = vst.msk [vmem:[#allocation2 + $0x188] sm:$0xff] %vm21_vm0, %v1525_v32 }
  0x33   :  { %72 = vst.msk [vmem:[#allocation2 + $0x190] sm:$0xff] %vm21_vm0, %v1525_v32 }
  0x34   :  { %73 = vst.msk [vmem:[#allocation2 + $0x198] sm:$0xff] %vm21_vm0, %v1525_v32 }
  0x35   :  { %74 = vst.msk [vmem:[#allocation2 + $0x1a0] sm:$0xff] %vm21_vm0, %v1525_v32 }
  0x36   :  { %75 = vst.msk [vmem:[#allocation2 + $0x1a8] sm:$0xff] %vm21_vm0, %v1525_v32 }
  0x37   :  { %76 = vst.msk [vmem:[#allocation2 + $0x1b0] sm:$0xff] %vm21_vm0, %v1525_v32 }
  0x38   :  { %77 = vst.msk [vmem:[#allocation2 + $0x1b8] sm:$0xff] %vm21_vm0, %v1525_v32  ;;  %v134_v63 = vld [vmem:[#allocation2 + $0x180] sm:$0xff] }
  0x39   :  { %78 = vst.msk [vmem:[#allocation2 + $0x1c0] sm:$0xff] %vm21_vm0, %v1525_v32  ;;  %v135_v7 = vld [vmem:[#allocation2 + $0x188] sm:$0xff] }
  0x3a   :  { %79 = vst.msk [vmem:[#allocation2 + $0x1c8] sm:$0xff] %vm21_vm0, %v1525_v32 }
  0x3b   :  { %80 = vst.msk [vmem:[#allocation2 + $0x1d0] sm:$0xff] %vm21_vm0, %v1525_v32 }
  0x3c   :  { %81 = vst.msk [vmem:[#allocation2 + $0x1d8] sm:$0xff] %vm21_vm0, %v1525_v32 }
  0x3d   :  { %82 = vst.msk [vmem:[#allocation2 + $0x1e0] sm:$0xff] %vm21_vm0, %v1525_v32 }
  0x3e   :  { %83 = vst.msk [vmem:[#allocation2 + $0x1e8] sm:$0xff] %vm21_vm0, %v1525_v32 }
  0x3f   :  { %84 = vst.msk [vmem:[#allocation2 + $0x1f0] sm:$0xff] %vm21_vm0, %v1525_v32 }
  0x40   :  { %85 = vst.msk [vmem:[#allocation2 + $0x1f8] sm:$0xff] %vm21_vm0, %v1525_v32 }
  0x41   :  { %488 = vmatmul.bf16.gmra.mxu0 %v1458_v16  ;;  %528 = vmatmul.bf16.gmra.mxu1 %v1466_v17  ;;  %v120_v17 = vld [vmem:[#allocation2 + $0x110] sm:$0xff] }
  0x42   :  { %568 = vmatmul.bf16.gmra.mxu2 %v1474_v18  ;;  %608 = vmatmul.bf16.gmra.mxu3 %v1482_v19  ;;  %v136_v19 = vld [vmem:[#allocation2 + $0x190] sm:$0xff] }
  0x51   :  { %493 = vmatmul.bf16.gmra.mxu0 %v1459_v20  ;;  %533 = vmatmul.bf16.gmra.mxu1 %v1467_v21  ;;  %v89_v21 = vld [vmem:[#allocation2 + $0x18] sm:$0xff] }
  0x52   :  { %573 = vmatmul.bf16.gmra.mxu2 %v1475_v22  ;;  %613 = vmatmul.bf16.gmra.mxu3 %v1483_v23  ;;  %v105_v23 = vld [vmem:[#allocation2 + $0x98] sm:$0xff] }
  0x61   :  { %498 = vmatmul.bf16.gmra.mxu0 %v1460_v24  ;;  %538 = vmatmul.bf16.gmra.mxu1 %v1468_v25  ;;  %v121_v25 = vld [vmem:[#allocation2 + $0x118] sm:$0xff] }
  0x62   :  { %578 = vmatmul.bf16.gmra.mxu2 %v1476_v26  ;;  %618 = vmatmul.bf16.gmra.mxu3 %v1484_v27 }
  0x71   :  { %503 = vmatmul.bf16.gmra.mxu0 %v1461_v28  ;;  %543 = vmatmul.bf16.gmra.mxu1 %v1469_v29  ;;  %v137_v28 = vld [vmem:[#allocation2 + $0x198] sm:$0xff] }
  0x72   :  { %583 = vmatmul.bf16.gmra.mxu2 %v1477_v30  ;;  %623 = vmatmul.bf16.gmra.mxu3 %v1485_v31 }
  0x81   :  { %508 = vmatmul.bf16.gmra.mxu0 %v1462_v33  ;;  %548 = vmatmul.bf16.gmra.mxu1 %v1470_v34  ;;  %v90_v34 = vld [vmem:[#allocation2 + $0x20] sm:$0xff] }
  0x82   :  { %588 = vmatmul.bf16.gmra.mxu2 %v1478_v35  ;;  %628 = vmatmul.bf16.gmra.mxu3 %v1486_v36  ;;  %v106_v35 = vld [vmem:[#allocation2 + $0xa0] sm:$0xff] }
  0x91   :  { %513 = vmatmul.bf16.gmra.mxu0 %v1463_v37  ;;  %553 = vmatmul.bf16.gmra.mxu1 %v1471_v38 }
  0x92   :  { %593 = vmatmul.bf16.gmra.mxu2 %v1479_v39  ;;  %633 = vmatmul.bf16.gmra.mxu3 %v1487_v40 }
  0x9e   :  { %v479_v42 = vpop.f32.mrf.mxu0  ;;  %v519_v43 = vpop.f32.mrf.mxu1 }
  0x9f   :  { %v639_v44 = vadd.f32 %v479_v42, %v86_v41  ;;  %v655_v0 = vadd.f32 %v519_v43, %v102_v57 }
  0xa1   :  { %704 = vst.msk [vmem:[#allocation2] sm:$0xff] %vm21_vm0, %v639_v44 }
  0xa2   :  { %720 = vst.msk [vmem:[#allocation2 + $0x80] sm:$0xff] %vm21_vm0, %v655_v0 }
  0xa5   :  { %v559_v46 = vpop.f32.mrf.mxu2  ;;  %v599_v47 = vpop.f32.mrf.mxu3 }
  0xa6   :  { %v481_v48 = vpop.f32.mrf.mxu0  ;;  %v521_v49 = vpop.f32.mrf.mxu1  ;;  %v671_v2 = vadd.f32 %v559_v46, %v118_v61  ;;  %v687_v4 = vadd.f32 %v599_v47, %v134_v63 }
  0xa7   :  { %v640_v6 = vadd.f32 %v481_v48, %v87_v1  ;;  %v656_v8 = vadd.f32 %v521_v49, %v103_v3 }
  0xa8   :  { %v771_v51 = vld [vmem:[#allocation2] sm:$0xff]  ;;  %736 = vst.msk [vmem:[#allocation2 + $0x100] sm:$0xff] %vm21_vm0, %v671_v2 }
  0xa9   :  { %v839_v52 = vmul.f32 %v1773_v45, %v771_v51  ;;  %752 = vst.msk [vmem:[#allocation2 + $0x180] sm:$0xff] %vm21_vm0, %v687_v4  ;;  %v787_v26 = vld [vmem:[#allocation2 + $0x80] sm:$0xff] }
  0xaa   :  { %705 = vst.msk [vmem:[#allocation2 + $0x8] sm:$0xff] %vm21_vm0, %v640_v6  ;;  %v855_v29 = vmul.f32 %v1773_v45, %v787_v26 }
  0xab   :  { %v907_v53 = vadd.f32 %v1782_v50, %v839_v52  ;;  %721 = vst.msk [vmem:[#allocation2 + $0x88] sm:$0xff] %vm21_vm0, %v656_v8 }
  0xac   :  { %v923_v41 = vadd.f32 %v1782_v50, %v855_v29 }
  0xad   :  { %vm971_vm1 = vcmp.gt.f32.partialorder %v907_v53, 0.0  ;;  %v1035_v54 = vmul.f32 0.2, %v907_v53  ;;  %v561_v55 = vpop.f32.mrf.mxu2  ;;  %v601_v56 = vpop.f32.mrf.mxu3 }
  0xae   :  { %v484_v58 = vpop.f32.mrf.mxu0  ;;  %v524_v59 = vpop.f32.mrf.mxu1  ;;  %v672_v12 = vadd.f32 %v561_v55, %v119_v5  ;;  %v688_v16 = vadd.f32 %v601_v56, %v135_v7  ;;  %vm987_vm3 = vcmp.gt.f32.partialorder %v923_v41, 0.0  ;;  %v1051_v52 = vmul.f32 0.2, %v923_v41 }
  0xaf   :  { %v1099_v60 = vsel %vm971_vm1, %v907_v53, %v1035_v54  ;;  %v641_v18 = vadd.f32 %v484_v58, %v88_v9  ;;  %v657_v20 = vadd.f32 %v524_v59, %v104_v13  ;;  %v803_v30 = vld [vmem:[#allocation2 + $0x100] sm:$0xff] }
  0xb0   :  { %v1163_v62 = vpack.c.bf16 %v1099_v60, %v1099_v60  ;;  %737 = vst.msk [vmem:[#allocation2 + $0x108] sm:$0xff] %vm21_vm0, %v672_v12  ;;  %v871_v36 = vmul.f32 %v1773_v45, %v803_v30  ;;  %v819_v37 = vld [vmem:[#allocation2 + $0x180] sm:$0xff]  ;;  %v1115_v59 = vsel %vm987_vm3, %v923_v41, %v1051_v52 }
  0xb1   :  { %753 = vst.msk [vmem:[#allocation2 + $0x188] sm:$0xff] %vm21_vm0, %v688_v16  ;;  %v887_v42 = vmul.f32 %v1773_v45, %v819_v37  ;;  %v772_v43 = vld [vmem:[#allocation2 + $0x8] sm:$0xff]  ;;  %v1179_v63 = vpack.c.bf16 %v1115_v59, %v1115_v59 }
  0xb2   :  { %1228 = vst.msk [vmem:[%s2326_s4] sm:$0xf] %vm1227_vm2, %v1163_v62  ;;  %v939_v46 = vadd.f32 %v1782_v50, %v871_v36  ;;  %v840_v47 = vmul.f32 %v1773_v45, %v772_v43  ;;  %v788_v48 = vld [vmem:[#allocation2 + $0x88] sm:$0xff] }
  0xb3   :  { %706 = vst.msk [vmem:[#allocation2 + $0x10] sm:$0xff] %vm21_vm0, %v641_v18  ;;  %v955_v53 = vadd.f32 %v1782_v50, %v887_v42  ;;  %v856_v54 = vmul.f32 %v1773_v45, %v788_v48 }
  0xb4   :  { %722 = vst.msk [vmem:[#allocation2 + $0x90] sm:$0xff] %vm21_vm0, %v657_v20  ;;  %vm1003_vm4 = vcmp.gt.f32.partialorder %v939_v46, 0.0  ;;  %v1067_v56 = vmul.f32 0.2, %v939_v46  ;;  %v908_v57 = vadd.f32 %v1782_v50, %v840_v47 }
  0xb5   :  { %v564_v10 = vpop.f32.mrf.mxu2  ;;  %v604_v11 = vpop.f32.mrf.mxu3  ;;  %vm1019_vm5 = vcmp.gt.f32.partialorder %v955_v53, 0.0  ;;  %v1083_v60 = vmul.f32 0.2, %v955_v53  ;;  %v924_v61 = vadd.f32 %v1782_v50, %v856_v54  ;;  %1244 = vst.msk [vmem:[%s2326_s4 + $0x40] sm:$0xf] %vm1227_vm2, %v1179_v63 }
  0xb6   :  { %v486_v14 = vpop.f32.mrf.mxu0  ;;  %v526_v15 = vpop.f32.mrf.mxu1  ;;  %v673_v22 = vadd.f32 %v564_v10, %v120_v17  ;;  %v689_v24 = vadd.f32 %v604_v11, %v136_v19  ;;  %v1131_v0 = vsel %vm1003_vm4, %v939_v46, %v1067_v56  ;;  %vm972_vm6 = vcmp.gt.f32.partialorder %v908_v57, 0.0 }
  0xb7   :  { %v642_v27 = vadd.f32 %v486_v14, %v89_v21  ;;  %v658_v31 = vadd.f32 %v526_v15, %v105_v23  ;;  %v804_v55 = vld [vmem:[#allocation2 + $0x108] sm:$0xff]  ;;  %v1036_v1 = vmul.f32 0.2, %v908_v57  ;;  %v1195_v4 = vpack.c.bf16 %v1131_v0, %v1131_v0 }
  0xb8   :  { %738 = vst.msk [vmem:[#allocation2 + $0x110] sm:$0xff] %vm21_vm0, %v673_v22  ;;  %v872_v58 = vmul.f32 %v1773_v45, %v804_v55  ;;  %v820_v62 = vld [vmem:[#allocation2 + $0x188] sm:$0xff]  ;;  %v1147_v5 = vsel %vm1019_vm5, %v955_v53, %v1083_v60  ;;  %vm988_vm7 = vcmp.gt.f32.partialorder %v924_v61, 0.0  ;;  %v1052_v6 = vmul.f32 0.2, %v924_v61 }
  0xb9   :  { %754 = vst.msk [vmem:[#allocation2 + $0x190] sm:$0xff] %vm21_vm0, %v689_v24  ;;  %v1211_v9 = vpack.c.bf16 %v1147_v5, %v1147_v5  ;;  %v1100_v10 = vsel %vm972_vm6, %v908_v57, %v1036_v1  ;;  %v888_v12 = vmul.f32 %v1773_v45, %v820_v62 }
  0xba   :  { %707 = vst.msk [vmem:[#allocation2 + $0x18] sm:$0xff] %vm21_vm0, %v642_v27  ;;  %v773_v2 = vld [vmem:[#allocation2 + $0x10] sm:$0xff]  ;;  %v940_v11 = vadd.f32 %v1782_v50, %v872_v58  ;;  %v1164_v17 = vpack.c.bf16 %v1100_v10, %v1100_v10  ;;  %v1116_v18 = vsel %vm988_vm7, %v924_v61, %v1052_v6 }
  0xbb   :  { %723 = vst.msk [vmem:[#allocation2 + $0x98] sm:$0xff] %vm21_vm0, %v658_v31  ;;  %v789_v3 = vld [vmem:[#allocation2 + $0x90] sm:$0xff]  ;;  %v841_v19 = vmul.f32 %v1773_v45, %v773_v2  ;;  %v1180_v22 = vpack.c.bf16 %v1116_v18, %v1116_v18  ;;  %v956_v24 = vadd.f32 %v1782_v50, %v888_v12  ;;  %v122_v2 = vld [vmem:[#allocation2 + $0x120] sm:$0xff] }
  0xbc   :  { %1260 = vst.msk [vmem:[%s2326_s4 + $0x80] sm:$0xf] %vm1227_vm2, %v1195_v4  ;;  %v857_v20 = vmul.f32 %v1773_v45, %v789_v3  ;;  %vm1004_vm8 = vcmp.gt.f32.partialorder %v940_v11, 0.0  ;;  %v1068_v23 = vmul.f32 0.2, %v940_v11  ;;  %v138_v3 = vld [vmem:[#allocation2 + $0x1a0] sm:$0xff] }
  0xbd   :  { %v566_v32 = vpop.f32.mrf.mxu2  ;;  %v606_v33 = vpop.f32.mrf.mxu3  ;;  %1276 = vst.msk [vmem:[%s2326_s4 + $0xc0] sm:$0xf] %vm1227_vm2, %v1211_v9  ;;  %vm1020_vm9 = vcmp.gt.f32.partialorder %v956_v24, 0.0  ;;  %v1084_v30 = vmul.f32 0.2, %v956_v24 }
  0xbe   :  { %v674_v38 = vadd.f32 %v566_v32, %v121_v25  ;;  %v489_v39 = vpop.f32.mrf.mxu0  ;;  %v529_v40 = vpop.f32.mrf.mxu1  ;;  %v690_v44 = vadd.f32 %v606_v33, %v137_v28  ;;  %1229 = vst.msk [vmem:[%s2326_s4 + $0x4] sm:$0xf] %vm1227_vm2, %v1164_v17  ;;  %v909_v25 = vadd.f32 %v1782_v50, %v841_v19  ;;  %v925_v26 = vadd.f32 %v1782_v50, %v857_v20  ;;  %v91_v19 = vld [vmem:[#allocation2 + $0x28] sm:$0xff] }
  0xbf   :  { %v643_v49 = vadd.f32 %v489_v39, %v90_v34  ;;  %v659_v51 = vadd.f32 %v529_v40, %v106_v35  ;;  %v805_v13 = vld [vmem:[#allocation2 + $0x110] sm:$0xff]  ;;  %1245 = vst.msk [vmem:[%s2326_s4 + $0x44] sm:$0xf] %vm1227_vm2, %v1180_v22  ;;  %v1132_v29 = vsel %vm1004_vm8, %v940_v11, %v1068_v23  ;;  %v1148_v35 = vsel %vm1020_vm9, %v956_v24, %v1084_v30  ;;  %v107_v20 = vld [vmem:[#allocation2 + $0xa8] sm:$0xff] }
  0xc0   :  { %739 = vst.msk [vmem:[#allocation2 + $0x118] sm:$0xff] %vm21_vm0, %v674_v38  ;;  %v821_v14 = vld [vmem:[#allocation2 + $0x190] sm:$0xff]  ;;  %v873_v27 = vmul.f32 %v1773_v45, %v805_v13  ;;  %v1196_v33 = vpack.c.bf16 %v1132_v29, %v1132_v29  ;;  %vm973_vm10 = vcmp.gt.f32.partialorder %v909_v25, 0.0  ;;  %v1037_v34 = vmul.f32 0.2, %v909_v25 }
  0xc1   :  { %755 = vst.msk [vmem:[#allocation2 + $0x198] sm:$0xff] %vm21_vm0, %v690_v44  ;;  %v774_v21 = vld [vmem:[#allocation2 + $0x18] sm:$0xff]  ;;  %v889_v28 = vmul.f32 %v1773_v45, %v821_v14  ;;  %vm989_vm11 = vcmp.gt.f32.partialorder %v925_v26, 0.0  ;;  %v1053_v36 = vmul.f32 0.2, %v925_v26  ;;  %v1212_v39 = vpack.c.bf16 %v1148_v35, %v1148_v35 }
  0xc2   :  { %708 = vst.msk [vmem:[#allocation2 + $0x20] sm:$0xff] %vm21_vm0, %v643_v49  ;;  %v842_v31 = vmul.f32 %v1773_v45, %v774_v21  ;;  %v790_v32 = vld [vmem:[#allocation2 + $0x98] sm:$0xff]  ;;  %v941_v37 = vadd.f32 %v1782_v50, %v873_v27  ;;  %v1101_v40 = vsel %vm973_vm10, %v909_v25, %v1037_v34 }
  0xc3   :  { %724 = vst.msk [vmem:[#allocation2 + $0xa0] sm:$0xff] %vm21_vm0, %v659_v51  ;;  %v957_v38 = vadd.f32 %v1782_v50, %v889_v28  ;;  %v858_v42 = vmul.f32 %v1773_v45, %v790_v32  ;;  %v1165_v47 = vpack.c.bf16 %v1101_v40, %v1101_v40  ;;  %v1117_v48 = vsel %vm989_vm11, %v925_v26, %v1053_v36 }
  0xc4   :  { %1261 = vst.msk [vmem:[%s2326_s4 + $0x84] sm:$0xf] %vm1227_vm2, %v1196_v33  ;;  %v910_v41 = vadd.f32 %v1782_v50, %v842_v31  ;;  %vm1005_vm12 = vcmp.gt.f32.partialorder %v941_v37, 0.0  ;;  %v1069_v49 = vmul.f32 0.2, %v941_v37  ;;  %v1181_v55 = vpack.c.bf16 %v1117_v48, %v1117_v48  ;;  %v123_v33 = vld [vmem:[#allocation2 + $0x128] sm:$0xff] }
  0xc5   :  { %v1844_v7 = vpop.f32.mrf.mxu2  ;;  %v1846_v8 = vpop.f32.mrf.mxu3  ;;  %1277 = vst.msk [vmem:[%s2326_s4 + $0xc4] sm:$0xf] %vm1227_vm2, %v1212_v39  ;;  %vm1021_vm13 = vcmp.gt.f32.partialorder %v957_v38, 0.0  ;;  %v1085_v56 = vmul.f32 0.2, %v957_v38  ;;  %v926_v59 = vadd.f32 %v1782_v50, %v858_v42 }
  0xc6   :  { %v1854_v15 = vpop.f32.mrf.mxu0  ;;  %v1856_v16 = vpop.f32.mrf.mxu1  ;;  %vm974_vm14 = vcmp.gt.f32.partialorder %v910_v41, 0.0  ;;  %1230 = vst.msk [vmem:[%s2326_s4 + $0x8] sm:$0xf] %vm1227_vm2, %v1165_v47  ;;  %v1133_v57 = vsel %vm1005_vm12, %v941_v37, %v1069_v49  ;;  %v1038_v58 = vmul.f32 0.2, %v910_v41  ;;  %v675_v17 = vadd.f32 %v1844_v7, %v122_v2  ;;  %v140_v49 = vld [vmem:[#allocation2 + $0x1b0] sm:$0xff] }
  0xc7   :  { %v806_v43 = vld [vmem:[#allocation2 + $0x118] sm:$0xff]  ;;  %1246 = vst.msk [vmem:[%s2326_s4 + $0x48] sm:$0xf] %vm1227_vm2, %v1181_v55  ;;  %v1197_v61 = vpack.c.bf16 %v1133_v57, %v1133_v57  ;;  %v1149_v62 = vsel %vm1021_vm13, %v957_v38, %v1085_v56  ;;  %vm990_vm15 = vcmp.gt.f32.partialorder %v926_v59, 0.0  ;;  %v1054_v6 = vmul.f32 0.2, %v926_v59 }
  0xc8   :  { %v822_v51 = vld [vmem:[#allocation2 + $0x198] sm:$0xff]  ;;  %v874_v60 = vmul.f32 %v1773_v45, %v806_v43  ;;  %v1213_v4 = vpack.c.bf16 %v1149_v62, %v1149_v62  ;;  %v1102_v5 = vsel %vm974_vm14, %v910_v41, %v1038_v58  ;;  %v691_v18 = vadd.f32 %v1846_v8, %v138_v3  ;;  %740 = vst.msk [vmem:[#allocation2 + $0x120] sm:$0xff] %vm21_vm0, %v675_v17  ;;  %v139_v38 = vld [vmem:[#allocation2 + $0x1a8] sm:$0xff]  ;;  %v108_v41 = vld [vmem:[#allocation2 + $0xb0] sm:$0xff] }
  0xc9   :  { %v775_v52 = vld [vmem:[#allocation2 + $0x20] sm:$0xff]  ;;  %v890_v63 = vmul.f32 %v1773_v45, %v822_v51  ;;  %1262 = vst.msk [vmem:[%s2326_s4 + $0x88] sm:$0xf] %vm1227_vm2, %v1197_v61  ;;  %v1166_v9 = vpack.c.bf16 %v1102_v5, %v1102_v5  ;;  %v1118_v13 = vsel %vm990_vm15, %v926_v59, %v1054_v6  ;;  %v644_v29 = vadd.f32 %v1854_v15, %v91_v19  ;;  %v92_v15 = vld [vmem:[#allocation2 + $0x30] sm:$0xff]  ;;  %v93_v56 = vld [vmem:[#allocation2 + $0x38] sm:$0xff] }
  0xca   :  { %v843_v0 = vmul.f32 %v1773_v45, %v775_v52  ;;  %v791_v1 = vld [vmem:[#allocation2 + $0xa0] sm:$0xff]  ;;  %v942_v10 = vadd.f32 %v1782_v50, %v874_v60  ;;  %1278 = vst.msk [vmem:[%s2326_s4 + $0xc8] sm:$0xf] %vm1227_vm2, %v1213_v4  ;;  %v1182_v21 = vpack.c.bf16 %v1118_v13, %v1118_v13  ;;  %v660_v37 = vadd.f32 %v1856_v16, %v107_v20  ;;  %v124_v43 = vld [vmem:[#allocation2 + $0x130] sm:$0xff]  ;;  %v141_v6 = vld [vmem:[#allocation2 + $0x1b8] sm:$0xff] }
  0xcb   :  { %v958_v11 = vadd.f32 %v1782_v50, %v890_v63  ;;  %v859_v14 = vmul.f32 %v1773_v45, %v791_v1  ;;  %1231 = vst.msk [vmem:[%s2326_s4 + $0xc] sm:$0xf] %vm1227_vm2, %v1166_v9  ;;  %v125_v1 = vld [vmem:[#allocation2 + $0x138] sm:$0xff]  ;;  %v94_v9 = vld [vmem:[#allocation2 + $0x40] sm:$0xff] }
  0xcc   :  { %v911_v12 = vadd.f32 %v1782_v50, %v843_v0  ;;  %vm1006_vm1 = vcmp.gt.f32.partialorder %v942_v10, 0.0  ;;  %v1070_v22 = vmul.f32 0.2, %v942_v10  ;;  %1247 = vst.msk [vmem:[%s2326_s4 + $0x4c] sm:$0xf] %vm1227_vm2, %v1182_v21  ;;  %v126_v20 = vld [vmem:[#allocation2 + $0x140] sm:$0xff] }
  0xcd   :  { %v1891_v44 = vpop.f32.mrf.mxu2  ;;  %v1893_v46 = vpop.f32.mrf.mxu3  ;;  %vm1022_vm3 = vcmp.gt.f32.partialorder %v958_v11, 0.0  ;;  %v1086_v25 = vmul.f32 0.2, %v958_v11  ;;  %v927_v7 = vadd.f32 %v1782_v50, %v859_v14  ;;  %756 = vst.msk [vmem:[#allocation2 + $0x1a0] sm:$0xff] %vm21_vm0, %v691_v18 }
  0xce   :  { %v1895_v53 = vpop.f32.mrf.mxu0  ;;  %v1897_v54 = vpop.f32.mrf.mxu1  ;;  %vm975_vm4 = vcmp.gt.f32.partialorder %v911_v12, 0.0  ;;  %v1039_v26 = vmul.f32 0.2, %v911_v12  ;;  %v1134_v28 = vsel %vm1006_vm1, %v942_v10, %v1070_v22  ;;  %709 = vst.msk [vmem:[#allocation2 + $0x28] sm:$0xff] %vm21_vm0, %v644_v29  ;;  %v676_v40 = vadd.f32 %v1891_v44, %v123_v33  ;;  %v110_v10 = vld [vmem:[#allocation2 + $0xc0] sm:$0xff] }
  0xcf   :  { %v1198_v30 = vpack.c.bf16 %v1134_v28, %v1134_v28  ;;  %v1150_v31 = vsel %vm1022_vm3, %v958_v11, %v1086_v25  ;;  %vm991_vm5 = vcmp.gt.f32.partialorder %v927_v7, 0.0  ;;  %v1055_v36 = vmul.f32 0.2, %v927_v7  ;;  %v807_v47 = vld [vmem:[#allocation2 + $0x120] sm:$0xff]  ;;  %725 = vst.msk [vmem:[#allocation2 + $0xa8] sm:$0xff] %vm21_vm0, %v660_v37 }
  0xd0   :  { %v1103_v32 = vsel %vm975_vm4, %v911_v12, %v1039_v26  ;;  %v1214_v34 = vpack.c.bf16 %v1150_v31, %v1150_v31  ;;  %v692_v42 = vadd.f32 %v1893_v46, %v139_v38  ;;  %v645_v48 = vadd.f32 %v1895_v53, %v92_v15  ;;  %741 = vst.msk [vmem:[#allocation2 + $0x128] sm:$0xff] %vm21_vm0, %v676_v40  ;;  %v109_v53 = vld [vmem:[#allocation2 + $0xb8] sm:$0xff]  ;;  %v142_v22 = vld [vmem:[#allocation2 + $0x1c0] sm:$0xff] }
  0xd1   :  { %v1167_v35 = vpack.c.bf16 %v1103_v32, %v1103_v32  ;;  %1263 = vst.msk [vmem:[%s2326_s4 + $0x8c] sm:$0xf] %vm1227_vm2, %v1198_v30  ;;  %v1119_v39 = vsel %vm991_vm5, %v927_v7, %v1055_v36  ;;  %v875_v44 = vmul.f32 %v1773_v45, %v807_v47  ;;  %v661_v55 = vadd.f32 %v1897_v54, %v108_v41 }
  0xd2   :  { %1279 = vst.msk [vmem:[%s2326_s4 + $0xcc] sm:$0xf] %vm1227_vm2, %v1214_v34  ;;  %v1183_v16 = vpack.c.bf16 %v1119_v39, %v1119_v39  ;;  %v95_v34 = vld [vmem:[#allocation2 + $0x48] sm:$0xff] }
  0xd3   :  { %1232 = vst.msk [vmem:[%s2326_s4 + $0x10] sm:$0xf] %vm1227_vm2, %v1167_v35  ;;  %v943_v60 = vadd.f32 %v1782_v50, %v875_v44  ;;  %v111_v35 = vld [vmem:[#allocation2 + $0xc8] sm:$0xff] }
  0xd4   :  { %1248 = vst.msk [vmem:[%s2326_s4 + $0x50] sm:$0xf] %vm1227_vm2, %v1183_v16  ;;  %v823_v58 = vld [vmem:[#allocation2 + $0x1a0] sm:$0xff] }
  0xd5   :  { %v574_v23 = vpop.f32.mrf.mxu2  ;;  %v614_v24 = vpop.f32.mrf.mxu3  ;;  %v891_v61 = vmul.f32 %v1773_v45, %v823_v58  ;;  %v776_v62 = vld [vmem:[#allocation2 + $0x28] sm:$0xff]  ;;  %757 = vst.msk [vmem:[#allocation2 + $0x1a8] sm:$0xff] %vm21_vm0, %v692_v42  ;;  %vm1007_vm6 = vcmp.gt.f32.partialorder %v943_v60, 0.0  ;;  %v1071_v2 = vmul.f32 0.2, %v943_v60 }
  0xd6   :  { %v496_v8 = vpop.f32.mrf.mxu0  ;;  %v536_v27 = vpop.f32.mrf.mxu1  ;;  %v677_v59 = vadd.f32 %v574_v23, %v124_v43  ;;  %v693_v63 = vadd.f32 %v614_v24, %v140_v49  ;;  %v844_v0 = vmul.f32 %v1773_v45, %v776_v62  ;;  %710 = vst.msk [vmem:[#allocation2 + $0x30] sm:$0xff] %vm21_vm0, %v645_v48  ;;  %v792_v13 = vld [vmem:[#allocation2 + $0xa8] sm:$0xff] }
  0xd7   :  { %v646_v54 = vadd.f32 %v496_v8, %v93_v56  ;;  %v959_v3 = vadd.f32 %v1782_v50, %v891_v61  ;;  %726 = vst.msk [vmem:[#allocation2 + $0xb0] sm:$0xff] %vm21_vm0, %v661_v55  ;;  %v662_v4 = vadd.f32 %v536_v27, %v109_v53  ;;  %v1135_v11 = vsel %vm1007_vm6, %v943_v60, %v1071_v2  ;;  %v808_v25 = vld [vmem:[#allocation2 + $0x128] sm:$0xff] }
  0xd8   :  { %v912_v5 = vadd.f32 %v1782_v50, %v844_v0  ;;  %742 = vst.msk [vmem:[#allocation2 + $0x130] sm:$0xff] %vm21_vm0, %v677_v59  ;;  %v1199_v17 = vpack.c.bf16 %v1135_v11, %v1135_v11  ;;  %v860_v19 = vmul.f32 %v1773_v45, %v792_v13  ;;  %v876_v32 = vmul.f32 %v1773_v45, %v808_v25  ;;  %v127_v11 = vld [vmem:[#allocation2 + $0x148] sm:$0xff] }
  0xd9   :  { %vm1023_vm7 = vcmp.gt.f32.partialorder %v959_v3, 0.0  ;;  %v1087_v12 = vmul.f32 0.2, %v959_v3  ;;  %758 = vst.msk [vmem:[#allocation2 + $0x1b0] sm:$0xff] %vm21_vm0, %v693_v63 }
  0xda   :  { %vm976_vm8 = vcmp.gt.f32.partialorder %v912_v5, 0.0  ;;  %v1040_v18 = vmul.f32 0.2, %v912_v5  ;;  %711 = vst.msk [vmem:[#allocation2 + $0x38] sm:$0xff] %vm21_vm0, %v646_v54  ;;  %v928_v31 = vadd.f32 %v1782_v50, %v860_v19  ;;  %v944_v41 = vadd.f32 %v1782_v50, %v876_v32 }
  0xdb   :  { %v1151_v24 = vsel %vm1023_vm7, %v959_v3, %v1087_v12  ;;  %727 = vst.msk [vmem:[#allocation2 + $0xb8] sm:$0xff] %vm21_vm0, %v662_v4 }
  0xdc   :  { %1264 = vst.msk [vmem:[%s2326_s4 + $0x90] sm:$0xf] %vm1227_vm2, %v1199_v17  ;;  %v1215_v29 = vpack.c.bf16 %v1151_v24, %v1151_v24  ;;  %v1104_v30 = vsel %vm976_vm8, %v912_v5, %v1040_v18  ;;  %v824_v33 = vld [vmem:[#allocation2 + $0x1a8] sm:$0xff]  ;;  %vm992_vm9 = vcmp.gt.f32.partialorder %v928_v31, 0.0  ;;  %v1056_v40 = vmul.f32 0.2, %v928_v31 }
  0xdd   :  { %v576_v51 = vpop.f32.mrf.mxu2  ;;  %v616_v52 = vpop.f32.mrf.mxu3  ;;  %v1168_v36 = vpack.c.bf16 %v1104_v30, %v1104_v30  ;;  %v892_v37 = vmul.f32 %v1773_v45, %v824_v33  ;;  %v777_v38 = vld [vmem:[#allocation2 + $0x30] sm:$0xff]  ;;  %vm1008_vm10 = vcmp.gt.f32.partialorder %v944_v41, 0.0  ;;  %v1072_v44 = vmul.f32 0.2, %v944_v41 }
  0xde   :  { %v499_v46 = vpop.f32.mrf.mxu0  ;;  %v539_v57 = vpop.f32.mrf.mxu1  ;;  %v678_v14 = vadd.f32 %v576_v51, %v125_v1  ;;  %v694_v26 = vadd.f32 %v616_v52, %v141_v6  ;;  %1280 = vst.msk [vmem:[%s2326_s4 + $0xd0] sm:$0xf] %vm1227_vm2, %v1215_v29  ;;  %v845_v16 = vmul.f32 %v1773_v45, %v777_v38  ;;  %v793_v42 = vld [vmem:[#allocation2 + $0xb0] sm:$0xff]  ;;  %v1120_v52 = vsel %vm992_vm9, %v928_v31, %v1056_v40 }
  0xdf   :  { %v647_v7 = vadd.f32 %v499_v46, %v94_v9  ;;  %v663_v8 = vadd.f32 %v539_v57, %v110_v10  ;;  %1233 = vst.msk [vmem:[%s2326_s4 + $0x14] sm:$0xf] %vm1227_vm2, %v1168_v36  ;;  %v960_v43 = vadd.f32 %v1782_v50, %v892_v37  ;;  %v861_v47 = vmul.f32 %v1773_v45, %v793_v42  ;;  %v809_v48 = vld [vmem:[#allocation2 + $0x130] sm:$0xff] }
  0xe0   :  { %743 = vst.msk [vmem:[#allocation2 + $0x138] sm:$0xff] %vm21_vm0, %v678_v14  ;;  %v913_v55 = vadd.f32 %v1782_v50, %v845_v16  ;;  %v1184_v56 = vpack.c.bf16 %v1120_v52, %v1120_v52  ;;  %v825_v58 = vld [vmem:[#allocation2 + $0x1b0] sm:$0xff]  ;;  %v1136_v59 = vsel %vm1008_vm10, %v944_v41, %v1072_v44  ;;  %v877_v60 = vmul.f32 %v1773_v45, %v809_v48  ;;  %v143_v16 = vld [vmem:[#allocation2 + $0x1c8] sm:$0xff] }
  0xe1   :  { %759 = vst.msk [vmem:[#allocation2 + $0x1b8] sm:$0xff] %vm21_vm0, %v694_v26  ;;  %vm1024_vm11 = vcmp.gt.f32.partialorder %v960_v43, 0.0  ;;  %v1088_v46 = vmul.f32 0.2, %v960_v43  ;;  %v929_v57 = vadd.f32 %v1782_v50, %v861_v47  ;;  %v778_v61 = vld [vmem:[#allocation2 + $0x38] sm:$0xff]  ;;  %v1200_v54 = vpack.c.bf16 %v1136_v59, %v1136_v59 }
  0xe2   :  { %712 = vst.msk [vmem:[#allocation2 + $0x40] sm:$0xff] %vm21_vm0, %v647_v7  ;;  %vm977_vm12 = vcmp.gt.f32.partialorder %v913_v55, 0.0  ;;  %v1041_v53 = vmul.f32 0.2, %v913_v55  ;;  %v794_v62 = vld [vmem:[#allocation2 + $0xb8] sm:$0xff]  ;;  %v945_v6 = vadd.f32 %v1782_v50, %v877_v60  ;;  %v893_v9 = vmul.f32 %v1773_v45, %v825_v58 }
  0xe3   :  { %728 = vst.msk [vmem:[#allocation2 + $0xc0] sm:$0xff] %vm21_vm0, %v663_v8  ;;  %v1152_v1 = vsel %vm1024_vm11, %v960_v43, %v1088_v46  ;;  %vm993_vm13 = vcmp.gt.f32.partialorder %v929_v57, 0.0  ;;  %v1057_v2 = vmul.f32 0.2, %v929_v57  ;;  %v846_v14 = vmul.f32 %v1773_v45, %v778_v61 }
  0xe4   :  { %1249 = vst.msk [vmem:[%s2326_s4 + $0x54] sm:$0xf] %vm1227_vm2, %v1184_v56  ;;  %v1216_v4 = vpack.c.bf16 %v1152_v1, %v1152_v1  ;;  %v1105_v5 = vsel %vm977_vm12, %v913_v55, %v1041_v53  ;;  %v862_v17 = vmul.f32 %v1773_v45, %v794_v62  ;;  %vm1009_vm14 = vcmp.gt.f32.partialorder %v945_v6, 0.0 }
  0xe5   :  { %v579_v21 = vpop.f32.mrf.mxu2  ;;  %v619_v23 = vpop.f32.mrf.mxu3  ;;  %1265 = vst.msk [vmem:[%s2326_s4 + $0x94] sm:$0xf] %vm1227_vm2, %v1200_v54  ;;  %v1169_v12 = vpack.c.bf16 %v1105_v5, %v1105_v5  ;;  %v1121_v13 = vsel %vm993_vm13, %v929_v57, %v1057_v2  ;;  %v96_v57 = vld [vmem:[#allocation2 + $0x50] sm:$0xff] }
  0xe6   :  { %v501_v27 = vpop.f32.mrf.mxu0  ;;  %v541_v28 = vpop.f32.mrf.mxu1  ;;  %v679_v15 = vadd.f32 %v579_v21, %v126_v20  ;;  %v1988_v39 = vadd.f32 %v619_v23, %v142_v22  ;;  %1281 = vst.msk [vmem:[%s2326_s4 + $0xd4] sm:$0xf] %vm1227_vm2, %v1216_v4  ;;  %v1185_v19 = vpack.c.bf16 %v1121_v13, %v1121_v13  ;;  %v1073_v20 = vmul.f32 0.2, %v945_v6  ;;  %v112_v5 = vld [vmem:[#allocation2 + $0xd0] sm:$0xff] }
  0xe7   :  { %v2002_v49 = vadd.f32 %v501_v27, %v95_v34  ;;  %v2004_v51 = vadd.f32 %v541_v28, %v111_v35  ;;  %v810_v10 = vld [vmem:[#allocation2 + $0x138] sm:$0xff]  ;;  %v961_v21 = vadd.f32 %v1782_v50, %v893_v9  ;;  %1234 = vst.msk [vmem:[%s2326_s4 + $0x18] sm:$0xf] %vm1227_vm2, %v1169_v12  ;;  %v914_v22 = vadd.f32 %v1782_v50, %v846_v14 }
  0xe8   :  { %744 = vst.msk [vmem:[#allocation2 + $0x140] sm:$0xff] %vm21_vm0, %v679_v15  ;;  %v930_v23 = vadd.f32 %v1782_v50, %v862_v17  ;;  %v878_v24 = vmul.f32 %v1773_v45, %v810_v10  ;;  %v826_v25 = vld [vmem:[#allocation2 + $0x1b8] sm:$0xff]  ;;  %v1137_v7 = vsel %vm1009_vm14, %v945_v6, %v1073_v20  ;;  %v128_v6 = vld [vmem:[#allocation2 + $0x150] sm:$0xff] }
  0xe9   :  { %1250 = vst.msk [vmem:[%s2326_s4 + $0x58] sm:$0xf] %vm1227_vm2, %v1185_v19  ;;  %vm1025_vm15 = vcmp.gt.f32.partialorder %v961_v21, 0.0  ;;  %v1089_v8 = vmul.f32 0.2, %v961_v21  ;;  %v894_v27 = vmul.f32 %v1773_v45, %v826_v25  ;;  %v779_v28 = vld [vmem:[#allocation2 + $0x40] sm:$0xff]  ;;  %v1201_v29 = vpack.c.bf16 %v1137_v7, %v1137_v7 }
  0xea   :  { %vm978_vm1 = vcmp.gt.f32.partialorder %v914_v22, 0.0  ;;  %v1042_v30 = vmul.f32 0.2, %v914_v22  ;;  %vm994_vm3 = vcmp.gt.f32.partialorder %v930_v23, 0.0  ;;  %v795_v31 = vld [vmem:[#allocation2 + $0xc0] sm:$0xff]  ;;  %760 = vst.msk [vmem:[#allocation2 + $0x1c0] sm:$0xff] %vm21_vm0, %v1988_v39  ;;  %v946_v34 = vadd.f32 %v1782_v50, %v878_v24 }
  0xeb   :  { %v1153_v32 = vsel %vm1025_vm15, %v961_v21, %v1089_v8  ;;  %v1058_v33 = vmul.f32 0.2, %v930_v23  ;;  %v962_v35 = vadd.f32 %v1782_v50, %v894_v27  ;;  %713 = vst.msk [vmem:[#allocation2 + $0x48] sm:$0xff] %vm21_vm0, %v2002_v49  ;;  %v847_v39 = vmul.f32 %v1773_v45, %v779_v28  ;;  %v97_v27 = vld [vmem:[#allocation2 + $0x58] sm:$0xff] }
  0xec   :  { %1266 = vst.msk [vmem:[%s2326_s4 + $0x98] sm:$0xf] %vm1227_vm2, %v1201_v29  ;;  %v1217_v38 = vpack.c.bf16 %v1153_v32, %v1153_v32  ;;  %v1106_v15 = vsel %vm978_vm1, %v914_v22, %v1042_v30  ;;  %v863_v40 = vmul.f32 %v1773_v45, %v795_v31  ;;  %vm1010_vm4 = vcmp.gt.f32.partialorder %v946_v34, 0.0 }
  0xed   :  { %v581_v63 = vpop.f32.mrf.mxu2  ;;  %v2012_v0 = vpop.f32.mrf.mxu3  ;;  %v1170_v42 = vpack.c.bf16 %v1106_v15, %v1106_v15  ;;  %v1122_v43 = vsel %vm994_vm3, %v930_v23, %v1058_v33  ;;  %v1074_v47 = vmul.f32 0.2, %v946_v34  ;;  %729 = vst.msk [vmem:[#allocation2 + $0xc8] sm:$0xff] %vm21_vm0, %v2004_v51  ;;  %vm1026_vm5 = vcmp.gt.f32.partialorder %v962_v35, 0.0  ;;  %v144_v23 = vld [vmem:[#allocation2 + $0x1d0] sm:$0xff] }
  0xee   :  { %v2019_v3 = vpop.f32.mrf.mxu0  ;;  %v2030_v18 = vpop.f32.mrf.mxu1  ;;  %v680_v26 = vadd.f32 %v581_v63, %v127_v11  ;;  %1282 = vst.msk [vmem:[%s2326_s4 + $0xd8] sm:$0xf] %vm1227_vm2, %v1217_v38  ;;  %v1186_v49 = vpack.c.bf16 %v1122_v43, %v1122_v43  ;;  %v1090_v52 = vmul.f32 0.2, %v962_v35  ;;  %v915_v44 = vadd.f32 %v1782_v50, %v847_v39  ;;  %v129_v38 = vld [vmem:[#allocation2 + $0x158] sm:$0xff] }
  0xef   :  { %v811_v41 = vld [vmem:[#allocation2 + $0x140] sm:$0xff]  ;;  %1235 = vst.msk [vmem:[%s2326_s4 + $0x1c] sm:$0xf] %vm1227_vm2, %v1170_v42  ;;  %v1138_v55 = vsel %vm1010_vm4, %v946_v34, %v1074_v47  ;;  %v931_v51 = vadd.f32 %v1782_v50, %v863_v40  ;;  %v696_v46 = vadd.f32 %v2012_v0, %v143_v16  ;;  %v649_v4 = vadd.f32 %v2019_v3, %v96_v57 }
  0xf0   :  { %v879_v56 = vmul.f32 %v1773_v45, %v811_v41  ;;  %1251 = vst.msk [vmem:[%s2326_s4 + $0x5c] sm:$0xf] %vm1227_vm2, %v1186_v49  ;;  %v1202_v58 = vpack.c.bf16 %v1138_v55, %v1138_v55  ;;  %v1154_v59 = vsel %vm1026_vm5, %v962_v35, %v1090_v52  ;;  %vm979_vm6 = vcmp.gt.f32.partialorder %v915_v44, 0.0  ;;  %v113_v35 = vld [vmem:[#allocation2 + $0xd8] sm:$0xff] }
  0xf1   :  { %v1043_v53 = vmul.f32 0.2, %v915_v44  ;;  %v1218_v61 = vpack.c.bf16 %v1154_v59, %v1154_v59  ;;  %vm995_vm7 = vcmp.gt.f32.partialorder %v931_v51, 0.0  ;;  %v1059_v62 = vmul.f32 0.2, %v931_v51  ;;  %v827_v54 = vld [vmem:[#allocation2 + $0x1c0] sm:$0xff] }
  0xf2   :  { %v947_v63 = vadd.f32 %v1782_v50, %v879_v56  ;;  %745 = vst.msk [vmem:[#allocation2 + $0x148] sm:$0xff] %vm21_vm0, %v680_v26  ;;  %v895_v1 = vmul.f32 %v1773_v45, %v827_v54  ;;  %v780_v2 = vld [vmem:[#allocation2 + $0x48] sm:$0xff]  ;;  %v665_v21 = vadd.f32 %v2030_v18, %v112_v5  ;;  %v145_v49 = vld [vmem:[#allocation2 + $0x1d8] sm:$0xff]  ;;  %v114_v59 = vld [vmem:[#allocation2 + $0xe0] sm:$0xff] }
  0xf3   :  { %1267 = vst.msk [vmem:[%s2326_s4 + $0x9c] sm:$0xf] %vm1227_vm2, %v1202_v58  ;;  %v1107_v0 = vsel %vm979_vm6, %v915_v44, %v1043_v53  ;;  %v1123_v10 = vsel %vm995_vm7, %v931_v51, %v1059_v62  ;;  %v848_v17 = vmul.f32 %v1773_v45, %v780_v2  ;;  %v98_v51 = vld [vmem:[#allocation2 + $0x60] sm:$0xff] }
  0xf4   :  { %1283 = vst.msk [vmem:[%s2326_s4 + $0xdc] sm:$0xf] %vm1227_vm2, %v1218_v61  ;;  %v1171_v9 = vpack.c.bf16 %v1107_v0, %v1107_v0  ;;  %vm1011_vm8 = vcmp.gt.f32.partialorder %v947_v63, 0.0  ;;  %v1075_v11 = vmul.f32 0.2, %v947_v63  ;;  %v1187_v13 = vpack.c.bf16 %v1123_v10, %v1123_v10  ;;  %v796_v19 = vld [vmem:[#allocation2 + $0xc8] sm:$0xff] }
  0xf5   :  { %v584_v36 = vpop.f32.mrf.mxu2  ;;  %v2055_v37 = vpop.f32.mrf.mxu3  ;;  %v963_v14 = vadd.f32 %v1782_v50, %v895_v1  ;;  %761 = vst.msk [vmem:[#allocation2 + $0x1c8] sm:$0xff] %vm21_vm0, %v696_v46  ;;  %v864_v20 = vmul.f32 %v1773_v45, %v796_v19  ;;  %v916_v7 = vadd.f32 %v1782_v50, %v848_v17  ;;  %v2143_v46 = vld [vmem:[%s2323_s2] ss:$0 sm:$0xff] }
  0xf6   :  { %v2066_v48 = vpop.f32.mrf.mxu0  ;;  %v2084_v60 = vpop.f32.mrf.mxu1  ;;  %1236 = vst.msk [vmem:[%s2326_s4 + $0x20] sm:$0xf] %vm1227_vm2, %v1171_v9  ;;  %v1139_v3 = vsel %vm1011_vm8, %v947_v63, %v1075_v11  ;;  %v681_v22 = vadd.f32 %v584_v36, %v128_v6  ;;  %v697_v31 = vadd.f32 %v2055_v37, %v144_v23  ;;  %v130_v53 = vld [vmem:[#allocation2 + $0x160] sm:$0xff] }
  0xf7   :  { %1252 = vst.msk [vmem:[%s2326_s4 + $0x60] sm:$0xf] %vm1227_vm2, %v1187_v13  ;;  %v1203_v25 = vpack.c.bf16 %v1139_v3, %v1139_v3  ;;  %vm1027_vm9 = vcmp.gt.f32.partialorder %v963_v14, 0.0  ;;  %v1091_v26 = vmul.f32 0.2, %v963_v14  ;;  %v932_v8 = vadd.f32 %v1782_v50, %v864_v20  ;;  %v146_v11 = vld [vmem:[#allocation2 + $0x1e0] sm:$0xff] }
  0xf8   :  { %714 = vst.msk [vmem:[#allocation2 + $0x50] sm:$0xff] %vm21_vm0, %v649_v4  ;;  %vm980_vm10 = vcmp.gt.f32.partialorder %v916_v7, 0.0  ;;  %v1044_v29 = vmul.f32 0.2, %v916_v7  ;;  %v650_v16 = vadd.f32 %v2066_v48, %v97_v27  ;;  %v666_v47 = vadd.f32 %v2084_v60, %v113_v35  ;;  %v2151_v54 = vld [vmem:[%s2324_s3] ss:$0 sm:$0xff] }
  0xf9   :  { %1268 = vst.msk [vmem:[%s2326_s4 + $0xa0] sm:$0xf] %vm1227_vm2, %v1203_v25  ;;  %v1155_v18 = vsel %vm1027_vm9, %v963_v14, %v1091_v26  ;;  %v812_v30 = vld [vmem:[#allocation2 + $0x148] sm:$0xff]  ;;  %vm996_vm11 = vcmp.gt.f32.partialorder %v932_v8, 0.0  ;;  %v1060_v33 = vmul.f32 0.2, %v932_v8 }
  0xfa   :  { %v1219_v32 = vpack.c.bf16 %v1155_v18, %v1155_v18  ;;  %v880_v34 = vmul.f32 %v1773_v45, %v812_v30  ;;  %730 = vst.msk [vmem:[#allocation2 + $0xd0] sm:$0xff] %vm21_vm0, %v665_v21  ;;  %v1108_v36 = vsel %vm980_vm10, %v916_v7, %v1044_v29  ;;  %v99_v20 = vld [vmem:[#allocation2 + $0x68] sm:$0xff] }
  0xfb   :  { %746 = vst.msk [vmem:[#allocation2 + $0x150] sm:$0xff] %vm21_vm0, %v681_v22  ;;  %v1172_v39 = vpack.c.bf16 %v1108_v36, %v1108_v36  ;;  %v1124_v37 = vsel %vm996_vm11, %v932_v8, %v1060_v33 }
  0xfc   :  { %1284 = vst.msk [vmem:[%s2326_s4 + $0xe0] sm:$0xf] %vm1227_vm2, %v1219_v32  ;;  %v948_v40 = vadd.f32 %v1782_v50, %v880_v34  ;;  %v828_v41 = vld [vmem:[#allocation2 + $0x1c8] sm:$0xff]  ;;  %v1188_v42 = vpack.c.bf16 %v1124_v37, %v1124_v37 }
  0xfd   :  { %v586_v12 = vpop.f32.mrf.mxu2  ;;  %v626_v24 = vpop.f32.mrf.mxu3  ;;  %v896_v43 = vmul.f32 %v1773_v45, %v828_v41  ;;  %762 = vst.msk [vmem:[#allocation2 + $0x1d0] sm:$0xff] %vm21_vm0, %v697_v31  ;;  %v115_v31 = vld [vmem:[#allocation2 + $0xe8] sm:$0xff] }
  0xfe   :  { %v509_v28 = vpop.f32.mrf.mxu0  ;;  %v549_v15 = vpop.f32.mrf.mxu1  ;;  %1237 = vst.msk [vmem:[%s2326_s4 + $0x24] sm:$0xf] %vm1227_vm2, %v1172_v39  ;;  %vm1012_vm12 = vcmp.gt.f32.partialorder %v948_v40, 0.0  ;;  %v1076_v44 = vmul.f32 0.2, %v948_v40  ;;  %v682_v55 = vadd.f32 %v586_v12, %v129_v38  ;;  %v698_v58 = vadd.f32 %v626_v24, %v145_v49  ;;  %v131_v32 = vld [vmem:[#allocation2 + $0x168] sm:$0xff] }
  0xff   :  { %1253 = vst.msk [vmem:[%s2326_s4 + $0x64] sm:$0xf] %vm1227_vm2, %v1188_v42  ;;  %v964_v45 = vadd.f32 %v1782_v50, %v896_v43  ;;  %v781_v48 = vld [vmem:[#allocation2 + $0x50] sm:$0xff]  ;;  %v651_v50 = vadd.f32 %v509_v28, %v98_v51  ;;  %v667_v9 = vadd.f32 %v549_v15, %v114_v59 }
 0x100   :  { %v1140_v56 = vsel %vm1012_vm12, %v948_v40, %v1076_v44  ;;  %v849_v57 = vmul.f32 %v2143_v46, %v781_v48  ;;  %715 = vst.msk [vmem:[#allocation2 + $0x58] sm:$0xff] %vm21_vm0, %v650_v16  ;;  %v147_v40 = vld [vmem:[#allocation2 + $0x1e8] sm:$0xff]  ;;  %v100_v49 = vld [vmem:[#allocation2 + $0x70] sm:$0xff] }
 0x101   :  { %v1204_v61 = vpack.c.bf16 %v1140_v56, %v1140_v56  ;;  %vm1028_vm13 = vcmp.gt.f32.partialorder %v964_v45, 0.0  ;;  %v1092_v62 = vmul.f32 0.2, %v964_v45  ;;  %v797_v63 = vld [vmem:[#allocation2 + $0xd0] sm:$0xff]  ;;  %731 = vst.msk [vmem:[#allocation2 + $0xd8] sm:$0xff] %vm21_vm0, %v666_v47 }
 0x102   :  { %v917_v0 = vadd.f32 %v2151_v54, %v849_v57  ;;  %v865_v1 = vmul.f32 %v2143_v46, %v797_v63  ;;  %v813_v2 = vld [vmem:[#allocation2 + $0x150] sm:$0xff]  ;;  %747 = vst.msk [vmem:[#allocation2 + $0x158] sm:$0xff] %vm21_vm0, %v682_v55 }
 0x103   :  { %1269 = vst.msk [vmem:[%s2326_s4 + $0xa4] sm:$0xf] %vm1227_vm2, %v1204_v61  ;;  %v1156_v5 = vsel %vm1028_vm13, %v964_v45, %v1092_v62  ;;  %v881_v6 = vmul.f32 %v2143_v46, %v813_v2 }
 0x104   :  { %v1220_v12 = vpack.c.bf16 %v1156_v5, %v1156_v5  ;;  %vm981_vm14 = vcmp.gt.f32.partialorder %v917_v0, 0.0  ;;  %v1045_v13 = vmul.f32 0.2, %v917_v0  ;;  %v933_v14 = vadd.f32 %v2151_v54, %v865_v1  ;;  %v829_v17 = vld [vmem:[#allocation2 + $0x1d0] sm:$0xff]  ;;  %763 = vst.msk [vmem:[#allocation2 + $0x1d8] sm:$0xff] %vm21_vm0, %v698_v58 }
 0x105   :  { %v589_v52 = vpop.f32.mrf.mxu2  ;;  %v629_v60 = vpop.f32.mrf.mxu3  ;;  %v949_v19 = vadd.f32 %v2151_v54, %v881_v6  ;;  %v897_v3 = vmul.f32 %v2143_v46, %v829_v17  ;;  %716 = vst.msk [vmem:[#allocation2 + $0x60] sm:$0xff] %vm21_vm0, %v651_v50 }
 0x106   :  { %v511_v4 = vpop.f32.mrf.mxu0  ;;  %v683_v10 = vadd.f32 %v589_v52, %v130_v53  ;;  %v551_v21 = vpop.f32.mrf.mxu1  ;;  %1285 = vst.msk [vmem:[%s2326_s4 + $0xe4] sm:$0xf] %vm1227_vm2, %v1220_v12  ;;  %v1109_v22 = vsel %vm981_vm14, %v917_v0, %v1045_v13  ;;  %vm997_vm15 = vcmp.gt.f32.partialorder %v933_v14, 0.0  ;;  %v1061_v23 = vmul.f32 0.2, %v933_v14 }
 0x107   :  { %v699_v24 = vadd.f32 %v629_v60, %v146_v11  ;;  %v1173_v25 = vpack.c.bf16 %v1109_v22, %v1109_v22  ;;  %vm1013_vm1 = vcmp.gt.f32.partialorder %v949_v19, 0.0  ;;  %v1077_v26 = vmul.f32 0.2, %v949_v19  ;;  %v782_v8 = vld [vmem:[#allocation2 + $0x58] sm:$0xff]  ;;  %732 = vst.msk [vmem:[#allocation2 + $0xe0] sm:$0xff] %vm21_vm0, %v667_v9  ;;  %v116_v9 = vld [vmem:[#allocation2 + $0xf0] sm:$0xff] }
 0x108   :  { %v965_v7 = vadd.f32 %v2151_v54, %v897_v3  ;;  %v1125_v28 = vsel %vm997_vm15, %v933_v14, %v1061_v23  ;;  %v850_v18 = vmul.f32 %v2143_v46, %v782_v8  ;;  %v798_v29 = vld [vmem:[#allocation2 + $0xd8] sm:$0xff]  ;;  %748 = vst.msk [vmem:[#allocation2 + $0x160] sm:$0xff] %vm21_vm0, %v683_v10  ;;  %v652_v30 = vadd.f32 %v511_v4, %v99_v20 }
 0x109   :  { %1238 = vst.msk [vmem:[%s2326_s4 + $0x28] sm:$0xf] %vm1227_vm2, %v1173_v25  ;;  %v1189_v33 = vpack.c.bf16 %v1125_v28, %v1125_v28  ;;  %v1141_v34 = vsel %vm1013_vm1, %v949_v19, %v1077_v26  ;;  %v814_v36 = vld [vmem:[#allocation2 + $0x158] sm:$0xff]  ;;  %v866_v39 = vmul.f32 %v2143_v46, %v798_v29  ;;  %v668_v43 = vadd.f32 %v551_v21, %v115_v31 }
 0x10a   :  { %vm1029_vm3 = vcmp.gt.f32.partialorder %v965_v7, 0.0  ;;  %v1093_v35 = vmul.f32 0.2, %v965_v7  ;;  %v1205_v38 = vpack.c.bf16 %v1141_v34, %v1141_v34  ;;  %v918_v15 = vadd.f32 %v2151_v54, %v850_v18  ;;  %764 = vst.msk [vmem:[#allocation2 + $0x1e0] sm:$0xff] %vm21_vm0, %v699_v24  ;;  %v132_v24 = vld [vmem:[#allocation2 + $0x170] sm:$0xff] }
 0x10b   :  { %v882_v37 = vmul.f32 %v2143_v46, %v814_v36  ;;  %1254 = vst.msk [vmem:[%s2326_s4 + $0x68] sm:$0xf] %vm1227_vm2, %v1189_v33  ;;  %v830_v42 = vld [vmem:[#allocation2 + $0x1d8] sm:$0xff]  ;;  %v934_v55 = vadd.f32 %v2151_v54, %v866_v39  ;;  %v148_v34 = vld [vmem:[#allocation2 + $0x1f0] sm:$0xff] }
 0x10c   :  { %v1157_v16 = vsel %vm1029_vm3, %v965_v7, %v1093_v35  ;;  %1270 = vst.msk [vmem:[%s2326_s4 + $0xa8] sm:$0xf] %vm1227_vm2, %v1205_v38  ;;  %vm982_vm4 = vcmp.gt.f32.partialorder %v918_v15, 0.0  ;;  %v1046_v44 = vmul.f32 0.2, %v918_v15  ;;  %v783_v51 = vld [vmem:[#allocation2 + $0x60] sm:$0xff]  ;;  %v898_v56 = vmul.f32 %v2143_v46, %v830_v42 }
 0x10d   :  { %v591_v27 = vpop.f32.mrf.mxu2  ;;  %v631_v41 = vpop.f32.mrf.mxu3  ;;  %v1221_v52 = vpack.c.bf16 %v1157_v16, %v1157_v16  ;;  %v950_v48 = vadd.f32 %v2151_v54, %v882_v37  ;;  %v851_v57 = vmul.f32 %v2143_v46, %v783_v51  ;;  %717 = vst.msk [vmem:[#allocation2 + $0x68] sm:$0xff] %vm21_vm0, %v652_v30  ;;  %vm998_vm5 = vcmp.gt.f32.partialorder %v934_v55, 0.0  ;;  %v101_v35 = vld [vmem:[#allocation2 + $0x78] sm:$0xff] }
 0x10e   :  { %v684_v47 = vadd.f32 %v591_v27, %v131_v32  ;;  %v514_v45 = vpop.f32.mrf.mxu0  ;;  %v700_v58 = vadd.f32 %v631_v41, %v147_v40  ;;  %v1110_v59 = vsel %vm982_vm4, %v918_v15, %v1046_v44  ;;  %v1062_v53 = vmul.f32 0.2, %v934_v55  ;;  %v799_v60 = vld [vmem:[#allocation2 + $0xe0] sm:$0xff]  ;;  %733 = vst.msk [vmem:[#allocation2 + $0xe8] sm:$0xff] %vm21_vm0, %v668_v43  ;;  %v554_v1 = vpop.f32.mrf.mxu1  ;;  %v117_v44 = vld [vmem:[#allocation2 + $0xf8] sm:$0xff] }
 0x10f   :  { %1286 = vst.msk [vmem:[%s2326_s4 + $0xe8] sm:$0xf] %vm1227_vm2, %v1221_v52  ;;  %v653_v61 = vadd.f32 %v514_v45, %v100_v49  ;;  %v1174_v62 = vpack.c.bf16 %v1110_v59, %v1110_v59  ;;  %vm1014_vm6 = vcmp.gt.f32.partialorder %v950_v48, 0.0  ;;  %v1078_v63 = vmul.f32 0.2, %v950_v48  ;;  %v815_v0 = vld [vmem:[#allocation2 + $0x160] sm:$0xff] }
 0x110   :  { %v966_v50 = vadd.f32 %v2151_v54, %v898_v56  ;;  %v1126_v2 = vsel %vm998_vm5, %v934_v55, %v1062_v53  ;;  %v919_v4 = vadd.f32 %v2151_v54, %v851_v57  ;;  %v867_v5 = vmul.f32 %v2143_v46, %v799_v60  ;;  %749 = vst.msk [vmem:[#allocation2 + $0x168] sm:$0xff] %vm21_vm0, %v684_v47 }
 0x111   :  { %v883_v6 = vmul.f32 %v2143_v46, %v815_v0  ;;  %1239 = vst.msk [vmem:[%s2326_s4 + $0x2c] sm:$0xf] %vm1227_vm2, %v1174_v62  ;;  %v1190_v10 = vpack.c.bf16 %v1126_v2, %v1126_v2  ;;  %v1142_v11 = vsel %vm1014_vm6, %v950_v48, %v1078_v63  ;;  %v831_v13 = vld [vmem:[#allocation2 + $0x1e0] sm:$0xff]  ;;  %v669_v23 = vadd.f32 %v554_v1, %v116_v9 }
 0x112   :  { %vm1030_vm7 = vcmp.gt.f32.partialorder %v966_v50, 0.0  ;;  %v1094_v12 = vmul.f32 0.2, %v966_v50  ;;  %v1206_v17 = vpack.c.bf16 %v1142_v11, %v1142_v11  ;;  %vm983_vm8 = vcmp.gt.f32.partialorder %v919_v4, 0.0  ;;  %765 = vst.msk [vmem:[#allocation2 + $0x1e8] sm:$0xff] %vm21_vm0, %v700_v58  ;;  %v133_v58 = vld [vmem:[#allocation2 + $0x178] sm:$0xff] }
 0x113   :  { %v1047_v19 = vmul.f32 0.2, %v919_v4  ;;  %v935_v3 = vadd.f32 %v2151_v54, %v867_v5  ;;  %1255 = vst.msk [vmem:[%s2326_s4 + $0x6c] sm:$0xf] %vm1227_vm2, %v1190_v10  ;;  %v951_v21 = vadd.f32 %v2151_v54, %v883_v6  ;;  %v899_v22 = vmul.f32 %v2143_v46, %v831_v13  ;;  %v149_v5 = vld [vmem:[#allocation2 + $0x1f8] sm:$0xff] }
 0x114   :  { %v1158_v20 = vsel %vm1030_vm7, %v966_v50, %v1094_v12  ;;  %1271 = vst.msk [vmem:[%s2326_s4 + $0xac] sm:$0xf] %vm1227_vm2, %v1206_v17  ;;  %v784_v8 = vld [vmem:[#allocation2 + $0x68] sm:$0xff] }
 0x115   :  { %v594_v14 = vpop.f32.mrf.mxu2  ;;  %v1222_v25 = vpack.c.bf16 %v1158_v20, %v1158_v20  ;;  %v1111_v26 = vsel %vm983_vm8, %v919_v4, %v1047_v19  ;;  %vm999_vm9 = vcmp.gt.f32.partialorder %v935_v3, 0.0  ;;  %v1063_v7 = vmul.f32 0.2, %v935_v3  ;;  %v634_v27 = vpop.f32.mrf.mxu3  ;;  %718 = vst.msk [vmem:[#allocation2 + $0x70] sm:$0xff] %vm21_vm0, %v653_v61  ;;  %v800_v32 = vld [vmem:[#allocation2 + $0xe8] sm:$0xff] }
 0x116   :  { %v1175_v28 = vpack.c.bf16 %v1111_v26, %v1111_v26  ;;  %vm1015_vm10 = vcmp.gt.f32.partialorder %v951_v21, 0.0  ;;  %v1079_v18 = vmul.f32 0.2, %v951_v21  ;;  %v967_v29 = vadd.f32 %v2151_v54, %v899_v22  ;;  %v516_v36 = vpop.f32.mrf.mxu0  ;;  %734 = vst.msk [vmem:[#allocation2 + $0xf0] sm:$0xff] %vm21_vm0, %v669_v23  ;;  %v556_v55 = vpop.f32.mrf.mxu1 }
 0x117   :  { %1287 = vst.msk [vmem:[%s2326_s4 + $0xec] sm:$0xf] %vm1227_vm2, %v1222_v25  ;;  %v1127_v30 = vsel %vm999_vm9, %v935_v3, %v1063_v7  ;;  %v852_v31 = vmul.f32 %v2143_v46, %v784_v8  ;;  %v685_v33 = vadd.f32 %v594_v14, %v132_v24  ;;  %v816_v37 = vld [vmem:[#allocation2 + $0x168] sm:$0xff]  ;;  %v868_v16 = vmul.f32 %v2143_v46, %v800_v32 }
 0x118   :  { %1240 = vst.msk [vmem:[%s2326_s4 + $0x30] sm:$0xf] %vm1227_vm2, %v1175_v28  ;;  %v1191_v38 = vpack.c.bf16 %v1127_v30, %v1127_v30  ;;  %v1143_v15 = vsel %vm1015_vm10, %v951_v21, %v1079_v18  ;;  %vm1031_vm11 = vcmp.gt.f32.partialorder %v967_v29, 0.0  ;;  %v1095_v39 = vmul.f32 0.2, %v967_v29 }
 0x119   :  { %v1207_v40 = vpack.c.bf16 %v1143_v15, %v1143_v15  ;;  %v920_v41 = vadd.f32 %v2151_v54, %v852_v31  ;;  %v884_v42 = vmul.f32 %v2143_v46, %v816_v37  ;;  %v832_v47 = vld [vmem:[#allocation2 + $0x1e8] sm:$0xff]  ;;  %v701_v49 = vadd.f32 %v634_v27, %v148_v34  ;;  %750 = vst.msk [vmem:[#allocation2 + $0x170] sm:$0xff] %vm21_vm0, %v685_v33 }
 0x11a   :  { %1256 = vst.msk [vmem:[%s2326_s4 + $0x70] sm:$0xf] %vm1227_vm2, %v1191_v38  ;;  %v1159_v43 = vsel %vm1031_vm11, %v967_v29, %v1095_v39  ;;  %v654_v52 = vadd.f32 %v516_v36, %v101_v35  ;;  %v936_v48 = vadd.f32 %v2151_v54, %v868_v16  ;;  %v900_v57 = vmul.f32 %v2143_v46, %v832_v47 }
 0x11b   :  { %1272 = vst.msk [vmem:[%s2326_s4 + $0xb0] sm:$0xf] %vm1227_vm2, %v1207_v40  ;;  %v1223_v51 = vpack.c.bf16 %v1159_v43, %v1159_v43  ;;  %vm984_vm12 = vcmp.gt.f32.partialorder %v920_v41, 0.0  ;;  %v1048_v45 = vmul.f32 0.2, %v920_v41  ;;  %v952_v56 = vadd.f32 %v2151_v54, %v884_v42 }
 0x11c   :  { %vm1000_vm13 = vcmp.gt.f32.partialorder %v936_v48, 0.0  ;;  %v1064_v60 = vmul.f32 0.2, %v936_v48  ;;  %v785_v61 = vld [vmem:[#allocation2 + $0x70] sm:$0xff]  ;;  %v670_v62 = vadd.f32 %v556_v55, %v117_v44  ;;  %v968_v0 = vadd.f32 %v2151_v54, %v900_v57  ;;  %766 = vst.msk [vmem:[#allocation2 + $0x1f0] sm:$0xff] %vm21_vm0, %v701_v49 }
 0x11d   :  { %v596_v59 = vpop.f32.mrf.mxu2  ;;  %1288 = vst.msk [vmem:[%s2326_s4 + $0xf0] sm:$0xf] %vm1227_vm2, %v1223_v51  ;;  %v1112_v53 = vsel %vm984_vm12, %v920_v41, %v1048_v45  ;;  %vm1016_vm14 = vcmp.gt.f32.partialorder %v952_v56, 0.0  ;;  %v1080_v50 = vmul.f32 0.2, %v952_v56  ;;  %v853_v2 = vmul.f32 %v2143_v46, %v785_v61  ;;  %v636_v6 = vpop.f32.mrf.mxu3  ;;  %v801_v12 = vld [vmem:[#allocation2 + $0xf0] sm:$0xff] }
 0x11e   :  { %v1176_v63 = vpack.c.bf16 %v1112_v53, %v1112_v53  ;;  %v1128_v1 = vsel %vm1000_vm13, %v936_v48, %v1064_v60  ;;  %719 = vst.msk [vmem:[#allocation2 + $0x78] sm:$0xff] %vm21_vm0, %v654_v52  ;;  %v686_v4 = vadd.f32 %v596_v59, %v133_v58  ;;  %vm1032_vm15 = vcmp.gt.f32.partialorder %v968_v0, 0.0 }
 0x11f   :  { %v1192_v9 = vpack.c.bf16 %v1128_v1, %v1128_v1  ;;  %v1144_v10 = vsel %vm1016_vm14, %v952_v56, %v1080_v50  ;;  %v1096_v11 = vmul.f32 0.2, %v968_v0  ;;  %v921_v14 = vadd.f32 %v2151_v54, %v853_v2  ;;  %735 = vst.msk [vmem:[#allocation2 + $0xf8] sm:$0xff] %vm21_vm0, %v670_v62 }
 0x120   :  { %1241 = vst.msk [vmem:[%s2326_s4 + $0x34] sm:$0xf] %vm1227_vm2, %v1176_v63  ;;  %v1208_v13 = vpack.c.bf16 %v1144_v10, %v1144_v10  ;;  %v869_v17 = vmul.f32 %v2143_v46, %v801_v12  ;;  %v702_v3 = vadd.f32 %v636_v6, %v149_v5  ;;  %v817_v23 = vld [vmem:[#allocation2 + $0x170] sm:$0xff] }
 0x121   :  { %1257 = vst.msk [vmem:[%s2326_s4 + $0x74] sm:$0xf] %vm1227_vm2, %v1192_v9  ;;  %v1160_v19 = vsel %vm1032_vm15, %v968_v0, %v1096_v11  ;;  %vm985_vm1 = vcmp.gt.f32.partialorder %v921_v14, 0.0  ;;  %v1049_v21 = vmul.f32 0.2, %v921_v14  ;;  %v885_v24 = vmul.f32 %v2143_v46, %v817_v23 }
 0x122   :  { %1273 = vst.msk [vmem:[%s2326_s4 + $0xb4] sm:$0xf] %vm1227_vm2, %v1208_v13  ;;  %v1224_v20 = vpack.c.bf16 %v1160_v19, %v1160_v19  ;;  %v937_v22 = vadd.f32 %v2151_v54, %v869_v17 }
 0x123   :  { %751 = vst.msk [vmem:[#allocation2 + $0x178] sm:$0xff] %vm21_vm0, %v686_v4  ;;  %v1113_v25 = vsel %vm985_vm1, %v921_v14, %v1049_v21  ;;  %v833_v7 = vld [vmem:[#allocation2 + $0x1f0] sm:$0xff]  ;;  %v953_v27 = vadd.f32 %v2151_v54, %v885_v24 }
 0x124   :  { %1289 = vst.msk [vmem:[%s2326_s4 + $0xf4] sm:$0xf] %vm1227_vm2, %v1224_v20  ;;  %vm1001_vm3 = vcmp.gt.f32.partialorder %v937_v22, 0.0  ;;  %v1065_v26 = vmul.f32 0.2, %v937_v22  ;;  %v1177_v8 = vpack.c.bf16 %v1113_v25, %v1113_v25  ;;  %v901_v28 = vmul.f32 %v2143_v46, %v833_v7 }
 0x125   :  { %v786_v18 = vld [vmem:[#allocation2 + $0x78] sm:$0xff]  ;;  %767 = vst.msk [vmem:[#allocation2 + $0x1f8] sm:$0xff] %vm21_vm0, %v702_v3  ;;  %vm1017_vm4 = vcmp.gt.f32.partialorder %v953_v27, 0.0  ;;  %v1081_v32 = vmul.f32 0.2, %v953_v27 }
 0x126   :  { %v1129_v29 = vsel %vm1001_vm3, %v937_v22, %v1065_v26  ;;  %v854_v30 = vmul.f32 %v2143_v46, %v786_v18  ;;  %1242 = vst.msk [vmem:[%s2326_s4 + $0x38] sm:$0xf] %vm1227_vm2, %v1177_v8  ;;  %v969_v33 = vadd.f32 %v2151_v54, %v901_v28  ;;  %v802_v34 = vld [vmem:[#allocation2 + $0xf8] sm:$0xff] }
 0x127   :  { %v1193_v31 = vpack.c.bf16 %v1129_v29, %v1129_v29  ;;  %v870_v36 = vmul.f32 %v2143_v46, %v802_v34  ;;  %v1145_v38 = vsel %vm1017_vm4, %v953_v27, %v1081_v32 }
 0x128   :  { %v922_v35 = vadd.f32 %v2151_v54, %v854_v30  ;;  %vm1033_vm0 = vcmp.gt.f32.partialorder %v969_v33, 0.0  ;;  %v1097_v15 = vmul.f32 0.2, %v969_v33  ;;  %v1209_v39 = vpack.c.bf16 %v1145_v38, %v1145_v38 }
 0x129   :  { %1258 = vst.msk [vmem:[%s2326_s4 + $0x78] sm:$0xf] %vm1227_vm2, %v1193_v31  ;;  %v938_v40 = vadd.f32 %v2151_v54, %v870_v36 }
 0x12a   :  { %vm986_vm5 = vcmp.gt.f32.partialorder %v922_v35, 0.0  ;;  %v1050_v37 = vmul.f32 0.2, %v922_v35  ;;  %v818_v41 = vld [vmem:[#allocation2 + $0x178] sm:$0xff]  ;;  %v1161_v16 = vsel %vm1033_vm0, %v969_v33, %v1097_v15  ;;  %1274 = vst.msk [vmem:[%s2326_s4 + $0xb8] sm:$0xf] %vm1227_vm2, %v1209_v39 }
 0x12b   :  { %v886_v42 = vmul.f32 %v2143_v46, %v818_v41  ;;  %v1225_v43 = vpack.c.bf16 %v1161_v16, %v1161_v16  ;;  %vm1002_vm6 = vcmp.gt.f32.partialorder %v938_v40, 0.0  ;;  %v1066_v49 = vmul.f32 0.2, %v938_v40 }
 0x12c   :  { %v1114_v47 = vsel %vm986_vm5, %v922_v35, %v1050_v37  ;;  %v834_v52 = vld [vmem:[#allocation2 + $0x1f8] sm:$0xff] }
 0x12d   :  { %v1178_v44 = vpack.c.bf16 %v1114_v47, %v1114_v47  ;;  %v954_v55 = vadd.f32 %v2151_v54, %v886_v42  ;;  %v902_v51 = vmul.f32 %v2143_v46, %v834_v52  ;;  %1290 = vst.msk [vmem:[%s2326_s4 + $0xf8] sm:$0xf] %vm1227_vm2, %v1225_v43  ;;  %v1130_v45 = vsel %vm1002_vm6, %v938_v40, %v1066_v49 }
 0x12e   :  { %v1194_v48 = vpack.c.bf16 %v1130_v45, %v1130_v45 }
 0x12f   :  { %1243 = vst.msk [vmem:[%s2326_s4 + $0x3c] sm:$0xf] %vm1227_vm2, %v1178_v44  ;;  %vm1018_vm7 = vcmp.gt.f32.partialorder %v954_v55, 0.0  ;;  %v1082_v56 = vmul.f32 0.2, %v954_v55  ;;  %v970_v57 = vadd.f32 %v2151_v54, %v902_v51 }
 0x130   :  { %1259 = vst.msk [vmem:[%s2326_s4 + $0x7c] sm:$0xf] %vm1227_vm2, %v1194_v48 }
 0x131   :  { %v1146_v46 = vsel %vm1018_vm7, %v954_v55, %v1082_v56  ;;  %vm1034_vm8 = vcmp.gt.f32.partialorder %v970_v57, 0.0  ;;  %v1098_v58 = vmul.f32 0.2, %v970_v57 }
 0x132   :  { %v1210_v59 = vpack.c.bf16 %v1146_v46, %v1146_v46 }
 0x133   :  { %v1162_v53 = vsel %vm1034_vm8, %v970_v57, %v1098_v58 }
 0x134   :  { %1275 = vst.msk [vmem:[%s2326_s4 + $0xbc] sm:$0xf] %vm1227_vm2, %v1210_v59  ;;  %v1226_v60 = vpack.c.bf16 %v1162_v53, %v1162_v53 }
 0x136   :  { %1291 = vst.msk [vmem:[%s2326_s4 + $0xfc] sm:$0xf] %vm1227_vm2, %v1226_v60 }

// kernel: netD_forward.7
= control target key start
LH: loop header
LB: loop body
LE: loop exit
PB: predicated region body
PF: predicated region fallthrough
CT: control target
= control target key end

     0   :  { %vm21_vm0 = vcmask 261120   ;;  %vm532_vm2 = vcmask 257024   ;;  %s1040_s1 = inlined_call_operand.vmem [shape: bf16[256,32], index: 1, kind: input, shape index: {}]   ;;  %s1041_s0 = inlined_call_operand.vmem [shape: bf16[128,256], index: 0, kind: input, shape index: {}]   ;;  %s1042_s2 = inlined_call_operand.vmem [shape: f32[1,32], index: 2, kind: input, shape index: {}]   ;;  %s1043_s3 = inlined_call_operand.vmem [shape: f32[1,32], index: 3, kind: input, shape index: {}]   ;;  %s1044_s4 = inlined_call_operand.vmem [shape: bf16[128,32], index: 4, kind: output, shape index: {}]  }
   0x1   :  { %v704_v0 = vld [vmem:[%s1040_s1 + $0x38] sm:$0xff]  ;;  %v703_v2 = vld [vmem:[%s1040_s1 + $0x30] sm:$0xff]  ;;  %v702_v4 = vld [vmem:[%s1040_s1 + $0x28] sm:$0xff] }
   0x2   :  { %v712_v1 = vld [vmem:[%s1040_s1 + $0x78] sm:$0xff]  ;;  %278 = vmatpush.bf16.msra.mxu0 %v704_v0  ;;  %713 = vmatpush.bf16.msra.mxu2 %v704_v0  ;;  %v711_v3 = vld [vmem:[%s1040_s1 + $0x70] sm:$0xff]  ;;  %v710_v5 = vld [vmem:[%s1040_s1 + $0x68] sm:$0xff]  ;;  %v732_v0 = vmov 0.0  }
   0x3   :  { %327 = vmatpush.bf16.msra.mxu1 %v712_v1  ;;  %721 = vmatpush.bf16.msra.mxu3 %v712_v1  ;;  %v701_v6 = vld [vmem:[%s1040_s1 + $0x20] sm:$0xff]  ;;  %v700_v8 = vld [vmem:[%s1040_s1 + $0x18] sm:$0xff]  ;;  %v699_v10 = vld [vmem:[%s1040_s1 + $0x10] sm:$0xff]  ;;  %22 = vst.msk [vmem:[#allocation2] sm:$0xff] %vm21_vm0, %v732_v0 }
   0x4   :  { %v709_v7 = vld [vmem:[%s1040_s1 + $0x60] sm:$0xff]  ;;  %v708_v9 = vld [vmem:[%s1040_s1 + $0x58] sm:$0xff]  ;;  %v707_v11 = vld [vmem:[%s1040_s1 + $0x50] sm:$0xff]  ;;  %23 = vst.msk [vmem:[#allocation2 + $0x8] sm:$0xff] %vm21_vm0, %v732_v0 }
   0x5   :  { %v698_v12 = vld [vmem:[%s1040_s1 + $0x8] sm:$0xff]  ;;  %v697_v14 = vld [vmem:[%s1040_s1] sm:$0xff]  ;;  %v563_v28 = vld [vmem:[%s1041_s0 + $0x10] sm:$0xf]  ;;  %24 = vst.msk [vmem:[#allocation2 + $0x10] sm:$0xff] %vm21_vm0, %v732_v0 }
   0x6   :  { %279 = vmatpush.bf16.msra.mxu0 %v703_v2  ;;  %714 = vmatpush.bf16.msra.mxu2 %v703_v2  ;;  %v706_v13 = vld [vmem:[%s1040_s1 + $0x48] sm:$0xff]  ;;  %v705_v15 = vld [vmem:[%s1040_s1 + $0x40] sm:$0xff]  ;;  %v684_v29 = vld [vmem:[%s1041_s0 + $0x14] sm:$0xf0]  ;;  %25 = vst.msk [vmem:[#allocation2 + $0x18] sm:$0xff] %vm21_vm0, %v732_v0 }
   0x7   :  { %328 = vmatpush.bf16.msra.mxu1 %v711_v3  ;;  %722 = vmatpush.bf16.msra.mxu3 %v711_v3  ;;  %v555_v16 = vld [vmem:[%s1041_s0] sm:$0xf]  ;;  %v682_v17 = vld [vmem:[%s1041_s0 + $0x4] sm:$0xf0]  ;;  %v681_v20 = vld [vmem:[%s1041_s0 + $0x4] sm:$0xf]  ;;  %v564_v36 = vor.u32 %v684_v29, %v563_v28 }
   0x8   :  { %v587_v18 = vld [vmem:[%s1041_s0 + $0x40] sm:$0xf]  ;;  %v690_v19 = vld [vmem:[%s1041_s0 + $0x44] sm:$0xf0]  ;;  %v557_v21 = vld [vmem:[%s1041_s0 + $0x8] sm:$0xf0]  ;;  %v556_v24 = vor.u32 %v682_v17, %v555_v16 }
   0x9   :  { %v689_v22 = vld [vmem:[%s1041_s0 + $0x44] sm:$0xf]  ;;  %v589_v23 = vld [vmem:[%s1041_s0 + $0x48] sm:$0xf0]  ;;  %v588_v25 = vor.u32 %v690_v19, %v587_v18  ;;  %v560_v26 = vor.u32 %v681_v20, %v557_v21  ;;  %v595_v30 = vld [vmem:[%s1041_s0 + $0x50] sm:$0xf] }
   0xa   :  { %280 = vmatpush.bf16.msra.mxu0 %v702_v4  ;;  %715 = vmatpush.bf16.msra.mxu2 %v702_v4  ;;  %v592_v27 = vor.u32 %v689_v22, %v589_v23  ;;  %v692_v31 = vld [vmem:[%s1041_s0 + $0x54] sm:$0xf0]  ;;  %v683_v32 = vld [vmem:[%s1041_s0 + $0x14] sm:$0xf]  ;;  %v565_v33 = vld [vmem:[%s1041_s0 + $0x18] sm:$0xf0] }
   0xb   :  { %329 = vmatpush.bf16.msra.mxu1 %v710_v5  ;;  %723 = vmatpush.bf16.msra.mxu3 %v710_v5  ;;  %v691_v34 = vld [vmem:[%s1041_s0 + $0x54] sm:$0xf]  ;;  %v597_v35 = vld [vmem:[%s1041_s0 + $0x58] sm:$0xf0]  ;;  %v596_v37 = vor.u32 %v692_v31, %v595_v30  ;;  %v568_v38 = vor.u32 %v683_v32, %v565_v33  ;;  %v571_v40 = vld [vmem:[%s1041_s0 + $0x20] sm:$0xf] }
   0xc   :  { %v600_v39 = vor.u32 %v691_v34, %v597_v35  ;;  %v686_v41 = vld [vmem:[%s1041_s0 + $0x24] sm:$0xf0]  ;;  %v603_v42 = vld [vmem:[%s1041_s0 + $0x60] sm:$0xf]  ;;  %v685_v44 = vld [vmem:[%s1041_s0 + $0x24] sm:$0xf] }
   0xd   :  { %v694_v43 = vld [vmem:[%s1041_s0 + $0x64] sm:$0xf0]  ;;  %v573_v45 = vld [vmem:[%s1041_s0 + $0x28] sm:$0xf0]  ;;  %v693_v46 = vld [vmem:[%s1041_s0 + $0x64] sm:$0xf]  ;;  %v572_v48 = vor.u32 %v686_v41, %v571_v40 }
   0xe   :  { %281 = vmatpush.bf16.msra.mxu0 %v701_v6  ;;  %716 = vmatpush.bf16.msra.mxu2 %v701_v6  ;;  %v605_v47 = vld [vmem:[%s1041_s0 + $0x68] sm:$0xf0]  ;;  %v604_v49 = vor.u32 %v694_v43, %v603_v42  ;;  %v576_v50 = vor.u32 %v685_v44, %v573_v45  ;;  %v579_v52 = vld [vmem:[%s1041_s0 + $0x30] sm:$0xf]  ;;  %v688_v53 = vld [vmem:[%s1041_s0 + $0x34] sm:$0xf0] }
   0xf   :  { %330 = vmatpush.bf16.msra.mxu1 %v709_v7  ;;  %724 = vmatpush.bf16.msra.mxu3 %v709_v7  ;;  %v608_v51 = vor.u32 %v693_v46, %v605_v47  ;;  %v611_v54 = vld [vmem:[%s1041_s0 + $0x70] sm:$0xf]  ;;  %v696_v55 = vld [vmem:[%s1041_s0 + $0x74] sm:$0xf0]  ;;  %v687_v56 = vld [vmem:[%s1041_s0 + $0x34] sm:$0xf]  ;;  %v580_v60 = vor.u32 %v688_v53, %v579_v52 }
  0x10   :  { %v581_v57 = vld [vmem:[%s1041_s0 + $0x38] sm:$0xf0]  ;;  %v695_v58 = vld [vmem:[%s1041_s0 + $0x74] sm:$0xf]  ;;  %v612_v61 = vor.u32 %v696_v55, %v611_v54  ;;  %26 = vst.msk [vmem:[#allocation2 + $0x20] sm:$0xff] %vm21_vm0, %v732_v0  ;;  %v38_v2 = vld [vmem:[#allocation2] sm:$0xff] }
  0x11   :  { %v613_v59 = vld [vmem:[%s1041_s0 + $0x78] sm:$0xf0]  ;;  %v584_v62 = vor.u32 %v687_v56, %v581_v57  ;;  %27 = vst.msk [vmem:[#allocation2 + $0x28] sm:$0xff] %vm21_vm0, %v732_v0  ;;  %v927_v16 = vld [vmem:[%s1043_s3] ss:$0 sm:$0xff] }
  0x12   :  { %282 = vmatpush.bf16.msra.mxu0 %v700_v8  ;;  %717 = vmatpush.bf16.msra.mxu2 %v700_v8  ;;  %v616_v63 = vor.u32 %v695_v58, %v613_v59  ;;  %28 = vst.msk [vmem:[#allocation2 + $0x30] sm:$0xff] %vm21_vm0, %v732_v0 }
  0x13   :  { %331 = vmatpush.bf16.msra.mxu1 %v708_v9  ;;  %725 = vmatpush.bf16.msra.mxu3 %v708_v9  ;;  %29 = vst.msk [vmem:[#allocation2 + $0x38] sm:$0xff] %vm21_vm0, %v732_v0 }
  0x14   :  { %30 = vst.msk [vmem:[#allocation2 + $0x40] sm:$0xff] %vm21_vm0, %v732_v0 }
  0x15   :  { %31 = vst.msk [vmem:[#allocation2 + $0x48] sm:$0xff] %vm21_vm0, %v732_v0 }
  0x16   :  { %283 = vmatpush.bf16.msra.mxu0 %v699_v10  ;;  %718 = vmatpush.bf16.msra.mxu2 %v699_v10  ;;  %32 = vst.msk [vmem:[#allocation2 + $0x50] sm:$0xff] %vm21_vm0, %v732_v0 }
  0x17   :  { %332 = vmatpush.bf16.msra.mxu1 %v707_v11  ;;  %726 = vmatpush.bf16.msra.mxu3 %v707_v11  ;;  %33 = vst.msk [vmem:[#allocation2 + $0x58] sm:$0xff] %vm21_vm0, %v732_v0  ;;  %v39_v11 = vld [vmem:[#allocation2 + $0x8] sm:$0xff] }
  0x18   :  { %34 = vst.msk [vmem:[#allocation2 + $0x60] sm:$0xff] %vm21_vm0, %v732_v0 }
  0x19   :  { %35 = vst.msk [vmem:[#allocation2 + $0x68] sm:$0xff] %vm21_vm0, %v732_v0 }
  0x1a   :  { %284 = vmatpush.bf16.msra.mxu0 %v698_v12  ;;  %719 = vmatpush.bf16.msra.mxu2 %v698_v12  ;;  %36 = vst.msk [vmem:[#allocation2 + $0x70] sm:$0xff] %vm21_vm0, %v732_v0 }
  0x1b   :  { %333 = vmatpush.bf16.msra.mxu1 %v706_v13  ;;  %727 = vmatpush.bf16.msra.mxu3 %v706_v13  ;;  %37 = vst.msk [vmem:[#allocation2 + $0x78] sm:$0xff] %vm21_vm0, %v732_v0  ;;  %v46_v7 = vld [vmem:[#allocation2 + $0x40] sm:$0xff] }
  0x1c   :  { %v922_v13 = vld [vmem:[%s1042_s2] ss:$0 sm:$0xff]  ;;  %v47_v21 = vld [vmem:[#allocation2 + $0x48] sm:$0xff] }
  0x1d   :  { %v48_v40 = vld [vmem:[#allocation2 + $0x50] sm:$0xff] }
  0x1e   :  { %285 = vmatpush.bf16.msra.mxu0 %v697_v14  ;;  %720 = vmatpush.bf16.msra.mxu2 %v697_v14 }
  0x1f   :  { %334 = vmatpush.bf16.msra.mxu1 %v705_v15  ;;  %728 = vmatpush.bf16.msra.mxu3 %v705_v15 }
  0x21   :  { %286 = vmatmul.bf16.vlgmr.msra.gmra.mxu0 %v556_v24  ;;  %306 = vmatmul.bf16.vlgmr.msra.gmra.mxu2 %v588_v25 }
  0x22   :  { %335 = vmatmul.bf16.vlgmr.msra.gmra.mxu1 %v560_v26  ;;  %355 = vmatmul.bf16.vlgmr.msra.gmra.mxu3 %v592_v27  ;;  %v40_v26 = vld [vmem:[#allocation2 + $0x10] sm:$0xff] }
  0x31   :  { %291 = vmatmul.bf16.gmra.mxu0 %v564_v36  ;;  %311 = vmatmul.bf16.gmra.mxu2 %v596_v37 }
  0x32   :  { %340 = vmatmul.bf16.gmra.mxu1 %v568_v38  ;;  %360 = vmatmul.bf16.gmra.mxu3 %v600_v39 }
  0x41   :  { %296 = vmatmul.bf16.gmra.mxu0 %v572_v48  ;;  %316 = vmatmul.bf16.gmra.mxu2 %v604_v49 }
  0x42   :  { %345 = vmatmul.bf16.gmra.mxu1 %v576_v50  ;;  %365 = vmatmul.bf16.gmra.mxu3 %v608_v51  ;;  %v41_v50 = vld [vmem:[#allocation2 + $0x18] sm:$0xff] }
  0x51   :  { %301 = vmatmul.bf16.gmra.mxu0 %v580_v60  ;;  %321 = vmatmul.bf16.gmra.mxu2 %v612_v61 }
  0x52   :  { %350 = vmatmul.bf16.gmra.mxu1 %v584_v62  ;;  %370 = vmatmul.bf16.gmra.mxu3 %v616_v63  ;;  %v49_v62 = vld [vmem:[#allocation2 + $0x58] sm:$0xff] }
  0x9e   :  { %v287_v1 = vpop.f32.mrf.mxu0 }
  0x9f   :  { %v336_v3 = vpop.f32.mrf.mxu1 }
  0xa0   :  { %v337_v4 = vadd.f32 %v336_v3, %v287_v1 }
  0xa2   :  { %v376_v5 = vadd.f32 %v337_v4, %v38_v2 }
  0xa4   :  { %393 = vst.msk [vmem:[#allocation2] sm:$0xff] %vm21_vm0, %v376_v5  ;;  %v307_v6 = vpop.f32.mrf.mxu2 }
  0xa5   :  { %v356_v8 = vpop.f32.mrf.mxu3 }
  0xa6   :  { %v357_v9 = vadd.f32 %v356_v8, %v307_v6  ;;  %v289_v10 = vpop.f32.mrf.mxu0  ;;  %v42_v8 = vld [vmem:[#allocation2 + $0x20] sm:$0xff] }
  0xa7   :  { %v338_v12 = vpop.f32.mrf.mxu1 }
  0xa8   :  { %v384_v14 = vadd.f32 %v357_v9, %v46_v7  ;;  %v339_v15 = vadd.f32 %v338_v12, %v289_v10 }
  0xaa   :  { %401 = vst.msk [vmem:[#allocation2 + $0x40] sm:$0xff] %vm21_vm0, %v384_v14  ;;  %v377_v17 = vadd.f32 %v339_v15, %v39_v11 }
  0xab   :  { %v412_v18 = vld [vmem:[#allocation2] sm:$0xff] }
  0xac   :  { %v432_v19 = vmul.f32 %v922_v13, %v412_v18  ;;  %394 = vst.msk [vmem:[#allocation2 + $0x8] sm:$0xff] %vm21_vm0, %v377_v17  ;;  %v309_v20 = vpop.f32.mrf.mxu2 }
  0xad   :  { %v358_v22 = vpop.f32.mrf.mxu3 }
  0xae   :  { %v452_v23 = vadd.f32 %v927_v16, %v432_v19  ;;  %v359_v24 = vadd.f32 %v358_v22, %v309_v20  ;;  %v292_v25 = vpop.f32.mrf.mxu0 }
  0xaf   :  { %v341_v27 = vpop.f32.mrf.mxu1 }
  0xb0   :  { %vm468_vm1 = vcmp.gt.f32.partialorder %v452_v23, 0.0  ;;  %v484_v28 = vmul.f32 0.2, %v452_v23  ;;  %v385_v29 = vadd.f32 %v359_v24, %v47_v21  ;;  %v342_v30 = vadd.f32 %v341_v27, %v292_v25  ;;  %v50_v21 = vld [vmem:[#allocation2 + $0x60] sm:$0xff]  ;;  %v43_v27 = vld [vmem:[#allocation2 + $0x28] sm:$0xff] }
  0xb1   :  { %v420_v31 = vld [vmem:[#allocation2 + $0x40] sm:$0xff] }
  0xb2   :  { %v500_v32 = vsel %vm468_vm1, %v452_v23, %v484_v28  ;;  %v440_v33 = vmul.f32 %v922_v13, %v420_v31  ;;  %402 = vst.msk [vmem:[#allocation2 + $0x48] sm:$0xff] %vm21_vm0, %v385_v29  ;;  %v378_v34 = vadd.f32 %v342_v30, %v40_v26 }
  0xb3   :  { %v516_v35 = vpack.c.bf16 %v500_v32, %v500_v32  ;;  %v413_v36 = vld [vmem:[#allocation2 + $0x8] sm:$0xff] }
  0xb4   :  { %v460_v37 = vadd.f32 %v927_v16, %v440_v33  ;;  %v433_v38 = vmul.f32 %v922_v13, %v413_v36  ;;  %395 = vst.msk [vmem:[#allocation2 + $0x10] sm:$0xff] %vm21_vm0, %v378_v34  ;;  %v312_v39 = vpop.f32.mrf.mxu2 }
  0xb5   :  { %533 = vst.msk [vmem:[%s1044_s4] sm:$0xf] %vm532_vm2, %v516_v35  ;;  %v361_v41 = vpop.f32.mrf.mxu3 }
  0xb6   :  { %vm476_vm3 = vcmp.gt.f32.partialorder %v460_v37, 0.0  ;;  %v492_v42 = vmul.f32 0.2, %v460_v37  ;;  %v453_v43 = vadd.f32 %v927_v16, %v433_v38  ;;  %v362_v44 = vadd.f32 %v361_v41, %v312_v39  ;;  %v294_v45 = vpop.f32.mrf.mxu0 }
  0xb7   :  { %v343_v46 = vpop.f32.mrf.mxu1 }
  0xb8   :  { %v508_v47 = vsel %vm476_vm3, %v460_v37, %v492_v42  ;;  %vm469_vm4 = vcmp.gt.f32.partialorder %v453_v43, 0.0  ;;  %v485_v48 = vmul.f32 0.2, %v453_v43  ;;  %v386_v49 = vadd.f32 %v362_v44, %v48_v40 }
  0xb9   :  { %v524_v51 = vpack.c.bf16 %v508_v47, %v508_v47  ;;  %v421_v52 = vld [vmem:[#allocation2 + $0x48] sm:$0xff]  ;;  %v344_v53 = vadd.f32 %v343_v46, %v294_v45 }
  0xba   :  { %v501_v54 = vsel %vm469_vm4, %v453_v43, %v485_v48  ;;  %v441_v55 = vmul.f32 %v922_v13, %v421_v52  ;;  %403 = vst.msk [vmem:[#allocation2 + $0x50] sm:$0xff] %vm21_vm0, %v386_v49  ;;  %v51_v43 = vld [vmem:[#allocation2 + $0x68] sm:$0xff]  ;;  %v44_v49 = vld [vmem:[#allocation2 + $0x30] sm:$0xff] }
  0xbb   :  { %541 = vst.msk [vmem:[%s1044_s4 + $0x20] sm:$0xf] %vm532_vm2, %v524_v51  ;;  %v517_v56 = vpack.c.bf16 %v501_v54, %v501_v54  ;;  %v414_v57 = vld [vmem:[#allocation2 + $0x10] sm:$0xff]  ;;  %v379_v58 = vadd.f32 %v344_v53, %v41_v50 }
  0xbc   :  { %v461_v59 = vadd.f32 %v927_v16, %v441_v55  ;;  %v434_v60 = vmul.f32 %v922_v13, %v414_v57  ;;  %v314_v61 = vpop.f32.mrf.mxu2 }
  0xbd   :  { %534 = vst.msk [vmem:[%s1044_s4 + $0x4] sm:$0xf] %vm532_vm2, %v517_v56  ;;  %v363_v63 = vpop.f32.mrf.mxu3 }
  0xbe   :  { %vm477_vm5 = vcmp.gt.f32.partialorder %v461_v59, 0.0  ;;  %v493_v0 = vmul.f32 0.2, %v461_v59  ;;  %v454_v1 = vadd.f32 %v927_v16, %v434_v60  ;;  %396 = vst.msk [vmem:[#allocation2 + $0x18] sm:$0xff] %vm21_vm0, %v379_v58  ;;  %v364_v2 = vadd.f32 %v363_v63, %v314_v61  ;;  %v297_v3 = vpop.f32.mrf.mxu0 }
  0xbf   :  { %v346_v4 = vpop.f32.mrf.mxu1 }
  0xc0   :  { %v509_v5 = vsel %vm477_vm5, %v461_v59, %v493_v0  ;;  %vm470_vm6 = vcmp.gt.f32.partialorder %v454_v1, 0.0  ;;  %v486_v6 = vmul.f32 0.2, %v454_v1  ;;  %v387_v7 = vadd.f32 %v364_v2, %v49_v62  ;;  %v52_v2 = vld [vmem:[#allocation2 + $0x70] sm:$0xff] }
  0xc1   :  { %v525_v9 = vpack.c.bf16 %v509_v5, %v509_v5  ;;  %v422_v10 = vld [vmem:[#allocation2 + $0x50] sm:$0xff]  ;;  %v347_v11 = vadd.f32 %v346_v4, %v297_v3 }
  0xc2   :  { %v502_v12 = vsel %vm470_vm6, %v454_v1, %v486_v6  ;;  %v442_v14 = vmul.f32 %v922_v13, %v422_v10  ;;  %404 = vst.msk [vmem:[#allocation2 + $0x58] sm:$0xff] %vm21_vm0, %v387_v7 }
  0xc3   :  { %542 = vst.msk [vmem:[%s1044_s4 + $0x24] sm:$0xf] %vm532_vm2, %v525_v9  ;;  %v518_v15 = vpack.c.bf16 %v502_v12, %v502_v12  ;;  %v380_v17 = vadd.f32 %v347_v11, %v42_v8  ;;  %v45_v12 = vld [vmem:[#allocation2 + $0x38] sm:$0xff] }
  0xc4   :  { %v462_v18 = vadd.f32 %v927_v16, %v442_v14  ;;  %v317_v19 = vpop.f32.mrf.mxu2 }
  0xc5   :  { %535 = vst.msk [vmem:[%s1044_s4 + $0x8] sm:$0xf] %vm532_vm2, %v518_v15  ;;  %v415_v20 = vld [vmem:[#allocation2 + $0x18] sm:$0xff]  ;;  %v366_v22 = vpop.f32.mrf.mxu3 }
  0xc6   :  { %vm478_vm7 = vcmp.gt.f32.partialorder %v462_v18, 0.0  ;;  %v494_v23 = vmul.f32 0.2, %v462_v18  ;;  %v435_v24 = vmul.f32 %v922_v13, %v415_v20  ;;  %397 = vst.msk [vmem:[#allocation2 + $0x20] sm:$0xff] %vm21_vm0, %v380_v17  ;;  %v367_v25 = vadd.f32 %v366_v22, %v317_v19  ;;  %v299_v26 = vpop.f32.mrf.mxu0 }
  0xc7   :  { %v348_v28 = vpop.f32.mrf.mxu1 }
  0xc8   :  { %v510_v29 = vsel %vm478_vm7, %v462_v18, %v494_v23  ;;  %v455_v30 = vadd.f32 %v927_v16, %v435_v24  ;;  %v388_v31 = vadd.f32 %v367_v25, %v50_v21  ;;  %v349_v32 = vadd.f32 %v348_v28, %v299_v26  ;;  %v53_v26 = vld [vmem:[#allocation2 + $0x78] sm:$0xff] }
  0xc9   :  { %v526_v33 = vpack.c.bf16 %v510_v29, %v510_v29  ;;  %v423_v34 = vld [vmem:[#allocation2 + $0x58] sm:$0xff] }
  0xca   :  { %vm471_vm8 = vcmp.gt.f32.partialorder %v455_v30, 0.0  ;;  %v487_v35 = vmul.f32 0.2, %v455_v30  ;;  %v443_v36 = vmul.f32 %v922_v13, %v423_v34  ;;  %405 = vst.msk [vmem:[#allocation2 + $0x60] sm:$0xff] %vm21_vm0, %v388_v31  ;;  %v381_v37 = vadd.f32 %v349_v32, %v43_v27 }
  0xcb   :  { %543 = vst.msk [vmem:[%s1044_s4 + $0x28] sm:$0xf] %vm532_vm2, %v526_v33 }
  0xcc   :  { %v503_v38 = vsel %vm471_vm8, %v455_v30, %v487_v35  ;;  %v463_v39 = vadd.f32 %v927_v16, %v443_v36  ;;  %398 = vst.msk [vmem:[#allocation2 + $0x28] sm:$0xff] %vm21_vm0, %v381_v37  ;;  %v319_v40 = vpop.f32.mrf.mxu2 }
  0xcd   :  { %v519_v41 = vpack.c.bf16 %v503_v38, %v503_v38  ;;  %v416_v42 = vld [vmem:[#allocation2 + $0x20] sm:$0xff]  ;;  %v368_v44 = vpop.f32.mrf.mxu3 }
  0xce   :  { %vm479_vm9 = vcmp.gt.f32.partialorder %v463_v39, 0.0  ;;  %v495_v45 = vmul.f32 0.2, %v463_v39  ;;  %v436_v46 = vmul.f32 %v922_v13, %v416_v42  ;;  %v369_v47 = vadd.f32 %v368_v44, %v319_v40  ;;  %v302_v48 = vpop.f32.mrf.mxu0 }
  0xcf   :  { %536 = vst.msk [vmem:[%s1044_s4 + $0xc] sm:$0xf] %vm532_vm2, %v519_v41  ;;  %v351_v50 = vpop.f32.mrf.mxu1 }
  0xd0   :  { %v511_v51 = vsel %vm479_vm9, %v463_v39, %v495_v45  ;;  %v456_v52 = vadd.f32 %v927_v16, %v436_v46  ;;  %v389_v53 = vadd.f32 %v369_v47, %v51_v43  ;;  %v352_v54 = vadd.f32 %v351_v50, %v302_v48 }
  0xd1   :  { %v527_v55 = vpack.c.bf16 %v511_v51, %v511_v51  ;;  %v424_v56 = vld [vmem:[#allocation2 + $0x60] sm:$0xff] }
  0xd2   :  { %vm472_vm10 = vcmp.gt.f32.partialorder %v456_v52, 0.0  ;;  %v488_v57 = vmul.f32 0.2, %v456_v52  ;;  %v444_v58 = vmul.f32 %v922_v13, %v424_v56  ;;  %406 = vst.msk [vmem:[#allocation2 + $0x68] sm:$0xff] %vm21_vm0, %v389_v53  ;;  %v382_v59 = vadd.f32 %v352_v54, %v44_v49 }
  0xd3   :  { %544 = vst.msk [vmem:[%s1044_s4 + $0x2c] sm:$0xf] %vm532_vm2, %v527_v55  ;;  %v417_v60 = vld [vmem:[#allocation2 + $0x28] sm:$0xff] }
  0xd4   :  { %v504_v61 = vsel %vm472_vm10, %v456_v52, %v488_v57  ;;  %v464_v62 = vadd.f32 %v927_v16, %v444_v58  ;;  %v437_v63 = vmul.f32 %v922_v13, %v417_v60  ;;  %399 = vst.msk [vmem:[#allocation2 + $0x30] sm:$0xff] %vm21_vm0, %v382_v59  ;;  %v322_v0 = vpop.f32.mrf.mxu2 }
  0xd5   :  { %v520_v1 = vpack.c.bf16 %v504_v61, %v504_v61  ;;  %v371_v3 = vpop.f32.mrf.mxu3 }
  0xd6   :  { %vm480_vm11 = vcmp.gt.f32.partialorder %v464_v62, 0.0  ;;  %v496_v4 = vmul.f32 0.2, %v464_v62  ;;  %v457_v5 = vadd.f32 %v927_v16, %v437_v63  ;;  %v372_v6 = vadd.f32 %v371_v3, %v322_v0  ;;  %v304_v7 = vpop.f32.mrf.mxu0 }
  0xd7   :  { %537 = vst.msk [vmem:[%s1044_s4 + $0x10] sm:$0xf] %vm532_vm2, %v520_v1  ;;  %v353_v8 = vpop.f32.mrf.mxu1 }
  0xd8   :  { %v512_v9 = vsel %vm480_vm11, %v464_v62, %v496_v4  ;;  %vm473_vm12 = vcmp.gt.f32.partialorder %v457_v5, 0.0  ;;  %v489_v10 = vmul.f32 0.2, %v457_v5  ;;  %v390_v11 = vadd.f32 %v372_v6, %v52_v2 }
  0xd9   :  { %v528_v14 = vpack.c.bf16 %v512_v9, %v512_v9  ;;  %v425_v15 = vld [vmem:[#allocation2 + $0x68] sm:$0xff]  ;;  %v354_v17 = vadd.f32 %v353_v8, %v304_v7 }
  0xda   :  { %v505_v18 = vsel %vm473_vm12, %v457_v5, %v489_v10  ;;  %v445_v19 = vmul.f32 %v922_v13, %v425_v15  ;;  %407 = vst.msk [vmem:[#allocation2 + $0x70] sm:$0xff] %vm21_vm0, %v390_v11 }
  0xdb   :  { %545 = vst.msk [vmem:[%s1044_s4 + $0x30] sm:$0xf] %vm532_vm2, %v528_v14  ;;  %v521_v20 = vpack.c.bf16 %v505_v18, %v505_v18  ;;  %v418_v21 = vld [vmem:[#allocation2 + $0x30] sm:$0xff]  ;;  %v383_v22 = vadd.f32 %v354_v17, %v45_v12 }
  0xdc   :  { %v465_v23 = vadd.f32 %v927_v16, %v445_v19  ;;  %v438_v24 = vmul.f32 %v922_v13, %v418_v21  ;;  %v324_v25 = vpop.f32.mrf.mxu2 }
  0xdd   :  { %538 = vst.msk [vmem:[%s1044_s4 + $0x14] sm:$0xf] %vm532_vm2, %v521_v20  ;;  %v373_v27 = vpop.f32.mrf.mxu3 }
  0xde   :  { %vm481_vm13 = vcmp.gt.f32.partialorder %v465_v23, 0.0  ;;  %v497_v28 = vmul.f32 0.2, %v465_v23  ;;  %v458_v29 = vadd.f32 %v927_v16, %v438_v24  ;;  %400 = vst.msk [vmem:[#allocation2 + $0x38] sm:$0xff] %vm21_vm0, %v383_v22  ;;  %v374_v30 = vadd.f32 %v373_v27, %v324_v25 }
  0xe0   :  { %v513_v31 = vsel %vm481_vm13, %v465_v23, %v497_v28  ;;  %vm474_vm14 = vcmp.gt.f32.partialorder %v458_v29, 0.0  ;;  %v490_v32 = vmul.f32 0.2, %v458_v29  ;;  %v391_v33 = vadd.f32 %v374_v30, %v53_v26 }
  0xe1   :  { %v529_v34 = vpack.c.bf16 %v513_v31, %v513_v31  ;;  %v426_v35 = vld [vmem:[#allocation2 + $0x70] sm:$0xff] }
  0xe2   :  { %v506_v36 = vsel %vm474_vm14, %v458_v29, %v490_v32  ;;  %v446_v37 = vmul.f32 %v922_v13, %v426_v35  ;;  %408 = vst.msk [vmem:[#allocation2 + $0x78] sm:$0xff] %vm21_vm0, %v391_v33 }
  0xe3   :  { %546 = vst.msk [vmem:[%s1044_s4 + $0x34] sm:$0xf] %vm532_vm2, %v529_v34  ;;  %v522_v38 = vpack.c.bf16 %v506_v36, %v506_v36 }
  0xe4   :  { %v466_v39 = vadd.f32 %v927_v16, %v446_v37 }
  0xe5   :  { %539 = vst.msk [vmem:[%s1044_s4 + $0x18] sm:$0xf] %vm532_vm2, %v522_v38  ;;  %v419_v40 = vld [vmem:[#allocation2 + $0x38] sm:$0xff] }
  0xe6   :  { %vm482_vm15 = vcmp.gt.f32.partialorder %v466_v39, 0.0  ;;  %v498_v41 = vmul.f32 0.2, %v466_v39  ;;  %v439_v42 = vmul.f32 %v922_v13, %v419_v40 }
  0xe8   :  { %v514_v43 = vsel %vm482_vm15, %v466_v39, %v498_v41  ;;  %v459_v44 = vadd.f32 %v927_v16, %v439_v42 }
  0xe9   :  { %v530_v45 = vpack.c.bf16 %v514_v43, %v514_v43  ;;  %v427_v46 = vld [vmem:[#allocation2 + $0x78] sm:$0xff] }
  0xea   :  { %vm475_vm0 = vcmp.gt.f32.partialorder %v459_v44, 0.0  ;;  %v491_v47 = vmul.f32 0.2, %v459_v44  ;;  %v447_v48 = vmul.f32 %v922_v13, %v427_v46 }
  0xeb   :  { %547 = vst.msk [vmem:[%s1044_s4 + $0x38] sm:$0xf] %vm532_vm2, %v530_v45 }
  0xec   :  { %v507_v49 = vsel %vm475_vm0, %v459_v44, %v491_v47  ;;  %v467_v50 = vadd.f32 %v927_v16, %v447_v48 }
  0xed   :  { %v523_v51 = vpack.c.bf16 %v507_v49, %v507_v49 }
  0xee   :  { %vm483_vm1 = vcmp.gt.f32.partialorder %v467_v50, 0.0  ;;  %v499_v52 = vmul.f32 0.2, %v467_v50 }
  0xef   :  { %540 = vst.msk [vmem:[%s1044_s4 + $0x1c] sm:$0xf] %vm532_vm2, %v523_v51 }
  0xf0   :  { %v515_v53 = vsel %vm483_vm1, %v467_v50, %v499_v52 }
  0xf1   :  { %v531_v54 = vpack.c.bf16 %v515_v53, %v515_v53 }
  0xf3   :  { %548 = vst.msk [vmem:[%s1044_s4 + $0x3c] sm:$0xf] %vm532_vm2, %v531_v54 }

// kernel: netD_forward.8
= control target key start
LH: loop header
LB: loop body
LE: loop exit
PB: predicated region body
PF: predicated region fallthrough
CT: control target
= control target key end

     0   :  { %vm21_vm0 = vcmask 523264   ;;  %v670_v56 = vmov 0.0   ;;  %vm458_vm2 = vcmask 519168   ;;  %s870_s1 = inlined_call_operand.vmem [shape: bf16[512,64], index: 1, kind: input, shape index: {}]   ;;  %s871_s0 = inlined_call_operand.vmem [shape: bf16[32,512], index: 0, kind: input, shape index: {}]   ;;  %s872_s2 = inlined_call_operand.vmem [shape: f32[1,64], index: 2, kind: input, shape index: {}]   ;;  %s873_s3 = inlined_call_operand.vmem [shape: f32[1,64], index: 3, kind: input, shape index: {}]   ;;  %s874_s4 = inlined_call_operand.vmem [shape: bf16[32,64], index: 4, kind: output, shape index: {}]  }
   0x1   :  { %v642_v0 = vld [vmem:[%s870_s1 + $0x38] sm:$0xff]  ;;  %v641_v4 = vld [vmem:[%s870_s1 + $0x30] sm:$0xff]  ;;  %v640_v8 = vld [vmem:[%s870_s1 + $0x28] sm:$0xff]  ;;  %22 = vst.msk [vmem:[#allocation2] sm:$0xff] %vm21_vm0, %v670_v56 }
   0x2   :  { %v650_v1 = vld [vmem:[%s870_s1 + $0x78] sm:$0xff]  ;;  %334 = vmatpush.bf16.msra.mxu0 %v642_v0  ;;  %v649_v5 = vld [vmem:[%s870_s1 + $0x70] sm:$0xff]  ;;  %v648_v9 = vld [vmem:[%s870_s1 + $0x68] sm:$0xff]  ;;  %23 = vst.msk [vmem:[#allocation2 + $0x8] sm:$0xff] %vm21_vm0, %v670_v56 }
   0x3   :  { %v658_v2 = vld [vmem:[%s870_s1 + $0xb8] sm:$0xff]  ;;  %353 = vmatpush.bf16.msra.mxu1 %v650_v1  ;;  %v657_v6 = vld [vmem:[%s870_s1 + $0xb0] sm:$0xff]  ;;  %v656_v10 = vld [vmem:[%s870_s1 + $0xa8] sm:$0xff]  ;;  %24 = vst.msk [vmem:[#allocation2 + $0x10] sm:$0xff] %vm21_vm0, %v670_v56 }
   0x4   :  { %v666_v3 = vld [vmem:[%s870_s1 + $0xf8] sm:$0xff]  ;;  %372 = vmatpush.bf16.msra.mxu2 %v658_v2  ;;  %v665_v7 = vld [vmem:[%s870_s1 + $0xf0] sm:$0xff]  ;;  %v664_v11 = vld [vmem:[%s870_s1 + $0xe8] sm:$0xff]  ;;  %25 = vst.msk [vmem:[#allocation2 + $0x18] sm:$0xff] %vm21_vm0, %v670_v56 }
   0x5   :  { %391 = vmatpush.bf16.msra.mxu3 %v666_v3  ;;  %v639_v12 = vld [vmem:[%s870_s1 + $0x20] sm:$0xff]  ;;  %v638_v16 = vld [vmem:[%s870_s1 + $0x18] sm:$0xff]  ;;  %v637_v20 = vld [vmem:[%s870_s1 + $0x10] sm:$0xff] }
   0x6   :  { %335 = vmatpush.bf16.msra.mxu0 %v641_v4  ;;  %v647_v13 = vld [vmem:[%s870_s1 + $0x60] sm:$0xff]  ;;  %v646_v17 = vld [vmem:[%s870_s1 + $0x58] sm:$0xff]  ;;  %v645_v21 = vld [vmem:[%s870_s1 + $0x50] sm:$0xff] }
   0x7   :  { %354 = vmatpush.bf16.msra.mxu1 %v649_v5  ;;  %v655_v14 = vld [vmem:[%s870_s1 + $0xa0] sm:$0xff]  ;;  %v654_v18 = vld [vmem:[%s870_s1 + $0x98] sm:$0xff]  ;;  %v653_v22 = vld [vmem:[%s870_s1 + $0x90] sm:$0xff] }
   0x8   :  { %373 = vmatpush.bf16.msra.mxu2 %v657_v6  ;;  %v663_v15 = vld [vmem:[%s870_s1 + $0xe0] sm:$0xff]  ;;  %v662_v19 = vld [vmem:[%s870_s1 + $0xd8] sm:$0xff]  ;;  %v661_v23 = vld [vmem:[%s870_s1 + $0xd0] sm:$0xff] }
   0x9   :  { %392 = vmatpush.bf16.msra.mxu3 %v665_v7  ;;  %v636_v24 = vld [vmem:[%s870_s1 + $0x8] sm:$0xff]  ;;  %v635_v28 = vld [vmem:[%s870_s1] sm:$0xff]  ;;  %v629_v33 = vld [vmem:[%s871_s0 + $0xc] sm:$0xf0] }
   0xa   :  { %336 = vmatpush.bf16.msra.mxu0 %v640_v8  ;;  %v644_v25 = vld [vmem:[%s870_s1 + $0x48] sm:$0xff]  ;;  %v643_v29 = vld [vmem:[%s870_s1 + $0x40] sm:$0xff]  ;;  %v471_v35 = vld [vmem:[%s871_s0 + $0x10] sm:$0xf0] }
   0xb   :  { %355 = vmatpush.bf16.msra.mxu1 %v648_v9  ;;  %v652_v26 = vld [vmem:[%s870_s1 + $0x88] sm:$0xff]  ;;  %v651_v30 = vld [vmem:[%s870_s1 + $0x80] sm:$0xff]  ;;  %v630_v37 = vld [vmem:[%s871_s0 + $0x14] sm:$0xf0] }
   0xc   :  { %374 = vmatpush.bf16.msra.mxu2 %v656_v10  ;;  %v660_v27 = vld [vmem:[%s870_s1 + $0xc8] sm:$0xff]  ;;  %v659_v31 = vld [vmem:[%s870_s1 + $0xc0] sm:$0xff]  ;;  %v479_v39 = vld [vmem:[%s871_s0 + $0x18] sm:$0xf0] }
   0xd   :  { %393 = vmatpush.bf16.msra.mxu3 %v664_v11  ;;  %v469_v32 = vld [vmem:[%s871_s0] sm:$0xf]  ;;  %v627_v34 = vld [vmem:[%s871_s0 + $0x4] sm:$0xf]  ;;  %v477_v36 = vld [vmem:[%s871_s0 + $0x8] sm:$0xf] }
   0xe   :  { %337 = vmatpush.bf16.msra.mxu0 %v639_v12  ;;  %v628_v38 = vld [vmem:[%s871_s0 + $0xc] sm:$0xf]  ;;  %v470_v40 = vor.u32 %v629_v33, %v469_v32  ;;  %v474_v41 = vor.u32 %v627_v34, %v471_v35  ;;  %v478_v42 = vor.u32 %v630_v37, %v477_v36  ;;  %v485_v44 = vld [vmem:[%s871_s0 + $0x20] sm:$0xf]  ;;  %v633_v45 = vld [vmem:[%s871_s0 + $0x2c] sm:$0xf0] }
   0xf   :  { %356 = vmatpush.bf16.msra.mxu1 %v647_v13  ;;  %v482_v43 = vor.u32 %v628_v38, %v479_v39  ;;  %v631_v46 = vld [vmem:[%s871_s0 + $0x24] sm:$0xf]  ;;  %v487_v47 = vld [vmem:[%s871_s0 + $0x30] sm:$0xf0]  ;;  %v493_v48 = vld [vmem:[%s871_s0 + $0x28] sm:$0xf]  ;;  %v486_v52 = vor.u32 %v633_v45, %v485_v44 }
  0x10   :  { %375 = vmatpush.bf16.msra.mxu2 %v655_v14  ;;  %v634_v49 = vld [vmem:[%s871_s0 + $0x34] sm:$0xf0]  ;;  %v632_v50 = vld [vmem:[%s871_s0 + $0x2c] sm:$0xf]  ;;  %v495_v51 = vld [vmem:[%s871_s0 + $0x38] sm:$0xf0]  ;;  %v490_v53 = vor.u32 %v631_v46, %v487_v47 }
  0x11   :  { %394 = vmatpush.bf16.msra.mxu3 %v663_v15  ;;  %v494_v54 = vor.u32 %v634_v49, %v493_v48  ;;  %v498_v55 = vor.u32 %v632_v50, %v495_v51  ;;  %v26_v1 = vld [vmem:[#allocation2] sm:$0xff]  ;;  %v27_v8 = vld [vmem:[#allocation2 + $0x8] sm:$0xff]  ;;  %v29_v36 = vld [vmem:[#allocation2 + $0x18] sm:$0xff] }
  0x12   :  { %338 = vmatpush.bf16.msra.mxu0 %v638_v16  ;;  %v668_v11 = vld [vmem:[%s872_s2] ss:$0 sm:$0xff] }
  0x13   :  { %357 = vmatpush.bf16.msra.mxu1 %v646_v17  ;;  %v669_v13 = vld [vmem:[%s873_s3] ss:$0 sm:$0xff] }
  0x14   :  { %376 = vmatpush.bf16.msra.mxu2 %v654_v18 }
  0x15   :  { %395 = vmatpush.bf16.msra.mxu3 %v662_v19 }
  0x16   :  { %339 = vmatpush.bf16.msra.mxu0 %v637_v20 }
  0x17   :  { %358 = vmatpush.bf16.msra.mxu1 %v645_v21 }
  0x18   :  { %377 = vmatpush.bf16.msra.mxu2 %v653_v22  ;;  %v28_v22 = vld [vmem:[#allocation2 + $0x10] sm:$0xff] }
  0x19   :  { %396 = vmatpush.bf16.msra.mxu3 %v661_v23 }
  0x1a   :  { %340 = vmatpush.bf16.msra.mxu0 %v636_v24 }
  0x1b   :  { %359 = vmatpush.bf16.msra.mxu1 %v644_v25 }
  0x1c   :  { %378 = vmatpush.bf16.msra.mxu2 %v652_v26 }
  0x1d   :  { %397 = vmatpush.bf16.msra.mxu3 %v660_v27 }
  0x1e   :  { %341 = vmatpush.bf16.msra.mxu0 %v635_v28 }
  0x1f   :  { %360 = vmatpush.bf16.msra.mxu1 %v643_v29 }
  0x20   :  { %379 = vmatpush.bf16.msra.mxu2 %v651_v30 }
  0x21   :  { %398 = vmatpush.bf16.msra.mxu3 %v659_v31  ;;  %342 = vmatmul.bf16.vlgmr.msra.gmra.mxu0 %v470_v40 }
  0x22   :  { %361 = vmatmul.bf16.vlgmr.msra.gmra.mxu1 %v474_v41 }
  0x23   :  { %380 = vmatmul.bf16.vlgmr.msra.gmra.mxu2 %v478_v42 }
  0x24   :  { %399 = vmatmul.bf16.vlgmr.msra.gmra.mxu3 %v482_v43 }
  0x31   :  { %347 = vmatmul.bf16.gmra.mxu0 %v486_v52 }
  0x32   :  { %366 = vmatmul.bf16.gmra.mxu1 %v490_v53 }
  0x33   :  { %385 = vmatmul.bf16.gmra.mxu2 %v494_v54 }
  0x34   :  { %404 = vmatmul.bf16.gmra.mxu3 %v498_v55 }
  0x9e   :  { %v343_v57 = vpop.f32.mrf.mxu0 }
  0x9f   :  { %v362_v58 = vpop.f32.mrf.mxu1 }
  0xa0   :  { %v363_v59 = vadd.f32 %v362_v58, %v343_v57 }
  0xa6   :  { %v381_v60 = vpop.f32.mrf.mxu2  ;;  %v345_v63 = vpop.f32.mrf.mxu0 }
  0xa7   :  { %v400_v61 = vpop.f32.mrf.mxu3  ;;  %v382_v62 = vadd.f32 %v381_v60, %v363_v59  ;;  %v364_v0 = vpop.f32.mrf.mxu1 }
  0xa8   :  { %v365_v4 = vadd.f32 %v364_v0, %v345_v63 }
  0xa9   :  { %v401_v2 = vadd.f32 %v400_v61, %v382_v62 }
  0xab   :  { %v410_v3 = vadd.f32 %v401_v2, %v26_v1 }
  0xad   :  { %415 = vst.msk [vmem:[#allocation2] sm:$0xff] %vm21_vm0, %v410_v3 }
  0xae   :  { %v383_v5 = vpop.f32.mrf.mxu2  ;;  %v348_v9 = vpop.f32.mrf.mxu0 }
  0xaf   :  { %v402_v6 = vpop.f32.mrf.mxu3  ;;  %v384_v7 = vadd.f32 %v383_v5, %v365_v4  ;;  %v367_v10 = vpop.f32.mrf.mxu1 }
  0xb0   :  { %v368_v15 = vadd.f32 %v367_v10, %v348_v9 }
  0xb1   :  { %v403_v12 = vadd.f32 %v402_v6, %v384_v7 }
  0xb3   :  { %v411_v14 = vadd.f32 %v403_v12, %v27_v8 }
  0xb4   :  { %v422_v16 = vld [vmem:[#allocation2] sm:$0xff] }
  0xb5   :  { %v430_v17 = vmul.f32 %v668_v11, %v422_v16  ;;  %416 = vst.msk [vmem:[#allocation2 + $0x8] sm:$0xff] %vm21_vm0, %v411_v14 }
  0xb6   :  { %v386_v18 = vpop.f32.mrf.mxu2  ;;  %v350_v25 = vpop.f32.mrf.mxu0 }
  0xb7   :  { %v405_v19 = vpop.f32.mrf.mxu3  ;;  %v438_v20 = vadd.f32 %v669_v13, %v430_v17  ;;  %v387_v21 = vadd.f32 %v386_v18, %v368_v15  ;;  %v369_v26 = vpop.f32.mrf.mxu1 }
  0xb8   :  { %v370_v32 = vadd.f32 %v369_v26, %v350_v25 }
  0xb9   :  { %vm442_vm1 = vcmp.gt.f32.partialorder %v438_v20, 0.0  ;;  %v446_v23 = vmul.f32 0.2, %v438_v20  ;;  %v406_v24 = vadd.f32 %v405_v19, %v387_v21 }
  0xbb   :  { %v450_v27 = vsel %vm442_vm1, %v438_v20, %v446_v23  ;;  %v412_v28 = vadd.f32 %v406_v24, %v28_v22 }
  0xbc   :  { %v454_v29 = vpack.c.bf16 %v450_v27, %v450_v27  ;;  %v423_v30 = vld [vmem:[#allocation2 + $0x8] sm:$0xff] }
  0xbd   :  { %v431_v31 = vmul.f32 %v668_v11, %v423_v30  ;;  %417 = vst.msk [vmem:[#allocation2 + $0x10] sm:$0xff] %vm21_vm0, %v412_v28 }
  0xbe   :  { %459 = vst.msk [vmem:[%s874_s4] sm:$0xf] %vm458_vm2, %v454_v29  ;;  %v388_v33 = vpop.f32.mrf.mxu2 }
  0xbf   :  { %v439_v34 = vadd.f32 %v669_v13, %v431_v31  ;;  %v389_v35 = vadd.f32 %v388_v33, %v370_v32  ;;  %v407_v37 = vpop.f32.mrf.mxu3 }
  0xc1   :  { %vm443_vm3 = vcmp.gt.f32.partialorder %v439_v34, 0.0  ;;  %v447_v38 = vmul.f32 0.2, %v439_v34  ;;  %v408_v39 = vadd.f32 %v407_v37, %v389_v35 }
  0xc3   :  { %v451_v40 = vsel %vm443_vm3, %v439_v34, %v447_v38  ;;  %v413_v41 = vadd.f32 %v408_v39, %v29_v36 }
  0xc4   :  { %v455_v42 = vpack.c.bf16 %v451_v40, %v451_v40  ;;  %v424_v43 = vld [vmem:[#allocation2 + $0x10] sm:$0xff] }
  0xc5   :  { %v432_v44 = vmul.f32 %v668_v11, %v424_v43  ;;  %418 = vst.msk [vmem:[#allocation2 + $0x18] sm:$0xff] %vm21_vm0, %v413_v41 }
  0xc6   :  { %460 = vst.msk [vmem:[%s874_s4 + $0x4] sm:$0xf] %vm458_vm2, %v455_v42 }
  0xc7   :  { %v440_v45 = vadd.f32 %v669_v13, %v432_v44 }
  0xc9   :  { %vm444_vm4 = vcmp.gt.f32.partialorder %v440_v45, 0.0  ;;  %v448_v46 = vmul.f32 0.2, %v440_v45 }
  0xcb   :  { %v452_v47 = vsel %vm444_vm4, %v440_v45, %v448_v46 }
  0xcc   :  { %v456_v48 = vpack.c.bf16 %v452_v47, %v452_v47  ;;  %v425_v49 = vld [vmem:[#allocation2 + $0x18] sm:$0xff] }
  0xcd   :  { %v433_v50 = vmul.f32 %v668_v11, %v425_v49 }
  0xce   :  { %461 = vst.msk [vmem:[%s874_s4 + $0x8] sm:$0xf] %vm458_vm2, %v456_v48 }
  0xcf   :  { %v441_v51 = vadd.f32 %v669_v13, %v433_v50 }
  0xd1   :  { %vm445_vm5 = vcmp.gt.f32.partialorder %v441_v51, 0.0  ;;  %v449_v52 = vmul.f32 0.2, %v441_v51 }
  0xd3   :  { %v453_v53 = vsel %vm445_vm5, %v441_v51, %v449_v52 }
  0xd4   :  { %v457_v54 = vpack.c.bf16 %v453_v53, %v453_v53 }
  0xd6   :  { %462 = vst.msk [vmem:[%s874_s4 + $0xc] sm:$0xf] %vm458_vm2, %v457_v54 }

// kernel: netD_forward.9
= control target key start
LH: loop header
LB: loop body
LE: loop exit
PB: predicated region body
PF: predicated region fallthrough
CT: control target
= control target key end

     0   :  { %s1384_s0 = inlined_call_operand.vmem [shape: bf16[2,1024], index: 0, kind: input, shape index: {}]   ;;  %s1385_s1 = inlined_call_operand.vmem [shape: bf16[1024,8], index: 1, kind: input, shape index: {}]   ;;  %s1386_s2 = inlined_call_operand.vmem [shape: f32[8,4], index: 2, kind: input, shape index: {}]   ;;  %s1387_s3 = inlined_call_operand.vmem [shape: f32[1,4], index: 3, kind: input, shape index: {}]   ;;  %s1388_s4 = inlined_call_operand.vmem [shape: f32[8,1], index: 4, kind: input, shape index: {}]   ;;  %s1389_s5 = inlined_call_operand.<no memory space> [shape: f32[1,1], index: 5, kind: input, shape index: {}]   ;;  %s1390_s6 = inlined_call_operand.vmem [shape: f32[2,1], index: 6, kind: output, shape index: {0}]   ;;  %s1391_s7 = inlined_call_operand.hbm [shape: f32[2,4], index: 7, kind: output, shape index: {1}]  }
   0x1   :  { %v13_v0 = vstv %s1389_s5 }
   0x2   :  { %14 = vst [vmem:[#allocation2] sm:$0x1] %v13_v0 }
   0x3   :  { %v1029_v1 = vld [vmem:[%s1385_s1 + $0x38] sm:$0xff]  ;;  %v1028_v5 = vld [vmem:[%s1385_s1 + $0x30] sm:$0xff]  ;;  %v1027_v9 = vld [vmem:[%s1385_s1 + $0x28] sm:$0xff] }
   0x4   :  { %v1037_v2 = vld [vmem:[%s1385_s1 + $0x78] sm:$0xff]  ;;  %559 = vmatpush.bf16.msra.mxu0 %v1029_v1  ;;  %v1036_v6 = vld [vmem:[%s1385_s1 + $0x70] sm:$0xff]  ;;  %v1035_v10 = vld [vmem:[%s1385_s1 + $0x68] sm:$0xff] }
   0x5   :  { %v1045_v3 = vld [vmem:[%s1385_s1 + $0xb8] sm:$0xff]  ;;  %572 = vmatpush.bf16.msra.mxu1 %v1037_v2  ;;  %v1044_v7 = vld [vmem:[%s1385_s1 + $0xb0] sm:$0xff]  ;;  %v1043_v11 = vld [vmem:[%s1385_s1 + $0xa8] sm:$0xff] }
   0x6   :  { %v1053_v4 = vld [vmem:[%s1385_s1 + $0xf8] sm:$0xff]  ;;  %585 = vmatpush.bf16.msra.mxu2 %v1045_v3  ;;  %v1052_v8 = vld [vmem:[%s1385_s1 + $0xf0] sm:$0xff]  ;;  %v1051_v12 = vld [vmem:[%s1385_s1 + $0xe8] sm:$0xff] }
   0x7   :  { %598 = vmatpush.bf16.msra.mxu3 %v1053_v4  ;;  %v1026_v13 = vld [vmem:[%s1385_s1 + $0x20] sm:$0xff]  ;;  %v1025_v18 = vld [vmem:[%s1385_s1 + $0x18] sm:$0xff]  ;;  %v1024_v22 = vld [vmem:[%s1385_s1 + $0x10] sm:$0xff] }
   0x8   :  { %560 = vmatpush.bf16.msra.mxu0 %v1028_v5  ;;  %v1034_v14 = vld [vmem:[%s1385_s1 + $0x60] sm:$0xff]  ;;  %v1033_v19 = vld [vmem:[%s1385_s1 + $0x58] sm:$0xff]  ;;  %v1032_v23 = vld [vmem:[%s1385_s1 + $0x50] sm:$0xff] }
   0x9   :  { %573 = vmatpush.bf16.msra.mxu1 %v1036_v6  ;;  %v1042_v15 = vld [vmem:[%s1385_s1 + $0xa0] sm:$0xff]  ;;  %v1041_v20 = vld [vmem:[%s1385_s1 + $0x98] sm:$0xff] }
   0xa   :  { %586 = vmatpush.bf16.msra.mxu2 %v1044_v7  ;;  %v1050_v16 = vld [vmem:[%s1385_s1 + $0xe0] sm:$0xff]  ;;  %v1049_v21 = vld [vmem:[%s1385_s1 + $0xd8] sm:$0xff] }
   0xb   :  { %599 = vmatpush.bf16.msra.mxu3 %v1052_v8  ;;  %v28_v17 = vld [vmem:[%s1384_s0] sm:$0xff] }
   0xc   :  { %561 = vmatpush.bf16.msra.mxu0 %v1027_v9  ;;  %158 = vst [vmem:[#allocation1] ss:$9 sm:$0xff] %v28_v17 }
   0xd   :  { %574 = vmatpush.bf16.msra.mxu1 %v1035_v10 }
   0xe   :  { %587 = vmatpush.bf16.msra.mxu2 %v1043_v11 }
   0xf   :  { %600 = vmatpush.bf16.msra.mxu3 %v1051_v12 }
  0x10   :  { %562 = vmatpush.bf16.msra.mxu0 %v1026_v13 }
  0x11   :  { %575 = vmatpush.bf16.msra.mxu1 %v1034_v14 }
  0x12   :  { %588 = vmatpush.bf16.msra.mxu2 %v1042_v15 }
  0x13   :  { %601 = vmatpush.bf16.msra.mxu3 %v1050_v16 }
  0x14   :  { %563 = vmatpush.bf16.msra.mxu0 %v1025_v18 }
  0x15   :  { %576 = vmatpush.bf16.msra.mxu1 %v1033_v19 }
  0x16   :  { %15 = vsyncpa [#allocation4], 0  ;;  %589 = vmatpush.bf16.msra.mxu2 %v1041_v20  ;;  %v1040_v24 = vld [vmem:[%s1385_s1 + $0x90] sm:$0xff]  ;;  %v1023_v26 = vld [vmem:[%s1385_s1 + $0x8] sm:$0xff]  ;;  %vm668_vm0 = vcmask 64512   ;;  %vm692_vm1 = vcmask 25600  }
  0x17   :  { %602 = vmatpush.bf16.msra.mxu3 %v1049_v21  ;;  %v1048_v25 = vld [vmem:[%s1385_s1 + $0xd0] sm:$0xff]  ;;  %v1031_v27 = vld [vmem:[%s1385_s1 + $0x48] sm:$0xff]  ;;  %v1022_v30 = vld [vmem:[%s1385_s1] sm:$0xff]  ;;  %vm742_vm2 = vcmask 1024   ;;  %s1127_s12 = smov [#allocation3]   ;;  %s753_s16 = sshll.u32 %s1391_s7, 4  ;;  %s754_s16 = int_to_ptr.hbm [resolvable:$true] %s753_s16 }
  0x18   :  { %564 = vmatpush.bf16.msra.mxu0 %v1024_v22  ;;  %v1039_v28 = vld [vmem:[%s1385_s1 + $0x88] sm:$0xff]  ;;  %v1030_v31 = vld [vmem:[%s1385_s1 + $0x40] sm:$0xff]  ;;  %v1061_v34 = vld [vmem:[%s1385_s1 + $0x138] sm:$0xff]  ;;  %s751_s13 = sshll.u32 %s1127_s12, 4  ;;  %s752_s13 = int_to_ptr.vmem [resolvable:$true] %s751_s13 }
  0x19   :  { %577 = vmatpush.bf16.msra.mxu1 %v1032_v23  ;;  %v1047_v29 = vld [vmem:[%s1385_s1 + $0xc8] sm:$0xff]  ;;  %v1038_v32 = vld [vmem:[%s1385_s1 + $0x80] sm:$0xff]  ;;  %v1069_v35 = vld [vmem:[%s1385_s1 + $0x178] sm:$0xff] }
  0x1a   :  { %590 = vmatpush.bf16.msra.mxu2 %v1040_v24  ;;  %v1046_v33 = vld [vmem:[%s1385_s1 + $0xc0] sm:$0xff]  ;;  %v1077_v36 = vld [vmem:[%s1385_s1 + $0x1b8] sm:$0xff]  ;;  %v1060_v38 = vld [vmem:[%s1385_s1 + $0x130] sm:$0xff] }
  0x1b   :  { %603 = vmatpush.bf16.msra.mxu3 %v1048_v25  ;;  %v1085_v37 = vld [vmem:[%s1385_s1 + $0x1f8] sm:$0xff]  ;;  %v159_v40 = vld [vmem:[#allocation1] sm:$0xff]  ;;  %v1068_v41 = vld [vmem:[%s1385_s1 + $0x170] sm:$0xff] }
  0x1c   :  { %565 = vmatpush.bf16.msra.mxu0 %v1023_v26  ;;  %v161_v39 = vld [vmem:[#allocation1 + $0x12] sm:$0xff]  ;;  %v162_v42 = vld [vmem:[#allocation1 + $0x1b] sm:$0xff]  ;;  %v160_v43 = vld [vmem:[#allocation1 + $0x9] sm:$0xff] }
  0x1d   :  { %578 = vmatpush.bf16.msra.mxu1 %v1031_v27  ;;  %v1076_v44 = vld [vmem:[%s1385_s1 + $0x1b0] sm:$0xff]  ;;  %v1059_v46 = vld [vmem:[%s1385_s1 + $0x128] sm:$0xff]  ;;  %v1058_v50 = vld [vmem:[%s1385_s1 + $0x120] sm:$0xff] }
  0x1e   :  { %591 = vmatpush.bf16.msra.mxu2 %v1039_v28  ;;  %v1084_v45 = vld [vmem:[%s1385_s1 + $0x1f0] sm:$0xff]  ;;  %v1067_v47 = vld [vmem:[%s1385_s1 + $0x168] sm:$0xff]  ;;  %v1066_v51 = vld [vmem:[%s1385_s1 + $0x160] sm:$0xff] }
  0x1f   :  { %604 = vmatpush.bf16.msra.mxu3 %v1047_v29  ;;  %v1075_v48 = vld [vmem:[%s1385_s1 + $0x1a8] sm:$0xff]  ;;  %v1074_v52 = vld [vmem:[%s1385_s1 + $0x1a0] sm:$0xff]  ;;  %v1057_v54 = vld [vmem:[%s1385_s1 + $0x118] sm:$0xff] }
  0x20   :  { %566 = vmatpush.bf16.msra.mxu0 %v1022_v30  ;;  %v1083_v49 = vld [vmem:[%s1385_s1 + $0x1e8] sm:$0xff]  ;;  %v1082_v53 = vld [vmem:[%s1385_s1 + $0x1e0] sm:$0xff]  ;;  %v1065_v55 = vld [vmem:[%s1385_s1 + $0x158] sm:$0xff] }
  0x21   :  { %579 = vmatpush.bf16.msra.mxu1 %v1030_v31  ;;  %v1073_v56 = vld [vmem:[%s1385_s1 + $0x198] sm:$0xff]  ;;  %v1056_v58 = vld [vmem:[%s1385_s1 + $0x110] sm:$0xff]  ;;  %v1055_v62 = vld [vmem:[%s1385_s1 + $0x108] sm:$0xff] }
  0x22   :  { %592 = vmatpush.bf16.msra.mxu2 %v1038_v32  ;;  %v1081_v57 = vld [vmem:[%s1385_s1 + $0x1d8] sm:$0xff]  ;;  %v1064_v59 = vld [vmem:[%s1385_s1 + $0x150] sm:$0xff]  ;;  %v1063_v63 = vld [vmem:[%s1385_s1 + $0x148] sm:$0xff] }
  0x23   :  { %605 = vmatpush.bf16.msra.mxu3 %v1046_v33  ;;  %567 = vmatmul.bf16.vlgmr.msra.gmra.mxu0 %v159_v40  ;;  %v1072_v60 = vld [vmem:[%s1385_s1 + $0x190] sm:$0xff]  ;;  %v1071_v0 = vld [vmem:[%s1385_s1 + $0x188] sm:$0xff]  ;;  %v1054_v2 = vld [vmem:[%s1385_s1 + $0x100] sm:$0xff] }
  0x24   :  { %611 = vmatpush.bf16.msrb.mxu0 %v1061_v34  ;;  %580 = vmatmul.bf16.vlgmr.msra.gmra.mxu1 %v160_v43  ;;  %v1080_v61 = vld [vmem:[%s1385_s1 + $0x1d0] sm:$0xff]  ;;  %v1079_v1 = vld [vmem:[%s1385_s1 + $0x1c8] sm:$0xff]  ;;  %v1062_v3 = vld [vmem:[%s1385_s1 + $0x140] sm:$0xff] }
  0x25   :  { %624 = vmatpush.bf16.msrb.mxu1 %v1069_v35  ;;  %593 = vmatmul.bf16.vlgmr.msra.gmra.mxu2 %v161_v39  ;;  %v1070_v4 = vld [vmem:[%s1385_s1 + $0x180] sm:$0xff]  ;;  %v164_v7 = vld [vmem:[#allocation1 + $0x2d] sm:$0xff]  ;;  %v165_v8 = vld [vmem:[#allocation1 + $0x36] sm:$0xff] }
  0x26   :  { %637 = vmatpush.bf16.msrb.mxu2 %v1077_v36  ;;  %606 = vmatmul.bf16.vlgmr.msra.gmra.mxu3 %v162_v42  ;;  %v1078_v5 = vld [vmem:[%s1385_s1 + $0x1c0] sm:$0xff]  ;;  %v1088_v36 = vld [vmem:[#allocation2] ss:$0 sm:$0xff] }
  0x27   :  { %650 = vmatpush.bf16.msrb.mxu3 %v1085_v37  ;;  %v163_v6 = vld [vmem:[#allocation1 + $0x24] sm:$0xff]  ;;  %v1087_v35 = vld [vmem:[%s1387_s3] ss:$0 sm:$0xff] }
  0x28   :  { %612 = vmatpush.bf16.msrb.mxu0 %v1060_v38  ;;  %v166_v9 = vld [vmem:[#allocation1 + $0x3f] sm:$0xff] }
  0x29   :  { %625 = vmatpush.bf16.msrb.mxu1 %v1068_v41  ;;  %v663_v10 = vld [vmem:[%s1386_s2] sm:$0xff] }
  0x2a   :  { %638 = vmatpush.bf16.msrb.mxu2 %v1076_v44  ;;  %v705_v15 = vld [vmem:[%s1388_s4] sm:$0xff] }
  0x2b   :  { %651 = vmatpush.bf16.msrb.mxu3 %v1084_v45 }
  0x2c   :  { %613 = vmatpush.bf16.msrb.mxu0 %v1059_v46 }
  0x2d   :  { %626 = vmatpush.bf16.msrb.mxu1 %v1067_v47 }
  0x2e   :  { %639 = vmatpush.bf16.msrb.mxu2 %v1075_v48 }
  0x2f   :  { %652 = vmatpush.bf16.msrb.mxu3 %v1083_v49 }
  0x30   :  { %614 = vmatpush.bf16.msrb.mxu0 %v1058_v50 }
  0x31   :  { %627 = vmatpush.bf16.msrb.mxu1 %v1066_v51 }
  0x32   :  { %640 = vmatpush.bf16.msrb.mxu2 %v1074_v52 }
  0x33   :  { %653 = vmatpush.bf16.msrb.mxu3 %v1082_v53 }
  0x34   :  { %615 = vmatpush.bf16.msrb.mxu0 %v1057_v54 }
  0x35   :  { %628 = vmatpush.bf16.msrb.mxu1 %v1065_v55 }
  0x36   :  { %641 = vmatpush.bf16.msrb.mxu2 %v1073_v56 }
  0x37   :  { %654 = vmatpush.bf16.msrb.mxu3 %v1081_v57 }
  0x38   :  { %616 = vmatpush.bf16.msrb.mxu0 %v1056_v58 }
  0x39   :  { %629 = vmatpush.bf16.msrb.mxu1 %v1064_v59 }
  0x3a   :  { %642 = vmatpush.bf16.msrb.mxu2 %v1072_v60 }
  0x3b   :  { %655 = vmatpush.bf16.msrb.mxu3 %v1080_v61 }
  0x3c   :  { %617 = vmatpush.bf16.msrb.mxu0 %v1055_v62 }
  0x3d   :  { %630 = vmatpush.bf16.msrb.mxu1 %v1063_v63 }
  0x3e   :  { %643 = vmatpush.bf16.msrb.mxu2 %v1071_v0 }
  0x3f   :  { %656 = vmatpush.bf16.msrb.mxu3 %v1079_v1 }
  0x40   :  { %618 = vmatpush.bf16.msrb.mxu0 %v1054_v2 }
  0x41   :  { %631 = vmatpush.bf16.msrb.mxu1 %v1062_v3 }
  0x42   :  { %644 = vmatpush.bf16.msrb.mxu2 %v1070_v4 }
  0x43   :  { %657 = vmatpush.bf16.msrb.mxu3 %v1078_v5  ;;  %619 = vmatmul.bf16.vlgmr.msrb.gmra.mxu0 %v163_v6 }
  0x44   :  { %632 = vmatmul.bf16.vlgmr.msrb.gmra.mxu1 %v164_v7  ;;  %687 = vmatpush.msra.mxu0 %v663_v10 }
  0x45   :  { %645 = vmatmul.bf16.vlgmr.msrb.gmra.mxu2 %v165_v8  ;;  %725 = vmatpush.msra.mxu1 %v705_v15 }
  0x46   :  { %658 = vmatmul.bf16.vlgmr.msrb.gmra.mxu3 %v166_v9 }
  0xa0   :  { %v568_v11 = vpop.f32.mrf.mxu0 }
  0xa1   :  { %v581_v12 = vpop.f32.mrf.mxu1 }
  0xa2   :  { %v582_v20 = vadd.f32 %v581_v12, %v568_v11 }
  0xa8   :  { %v594_v13 = vpop.f32.mrf.mxu2  ;;  %v570_v16 = vpop.f32.mrf.mxu0 }
  0xa9   :  { %v607_v14 = vpop.f32.mrf.mxu3  ;;  %v583_v17 = vpop.f32.mrf.mxu1  ;;  %v595_v21 = vadd.f32 %v594_v13, %v582_v20 }
  0xab   :  { %v608_v22 = vadd.f32 %v607_v14, %v595_v21 }
  0xb0   :  { %v596_v18 = vpop.f32.mrf.mxu2 }
  0xb1   :  { %v609_v19 = vpop.f32.mrf.mxu3 }
  0xc0   :  { %v620_v23 = vpop.f32.mrf.mxu0 }
  0xc1   :  { %v633_v24 = vpop.f32.mrf.mxu1  ;;  %v621_v25 = vadd.f32 %v620_v23, %v608_v22 }
  0xc3   :  { %v634_v26 = vadd.f32 %v633_v24, %v621_v25 }
  0xc8   :  { %v646_v27 = vpop.f32.mrf.mxu2  ;;  %v622_v30 = vpop.f32.mrf.mxu0 }
  0xc9   :  { %v659_v28 = vpop.f32.mrf.mxu3  ;;  %v647_v29 = vadd.f32 %v646_v27, %v634_v26  ;;  %v635_v31 = vpop.f32.mrf.mxu1 }
  0xcb   :  { %v660_v32 = vadd.f32 %v659_v28, %v647_v29 }
  0xcd   :  { %1020 = vmatmul.msk.f32.vlgmr.msra.gmra.mxu0 %vm668_vm0, %v660_v32  ;;  %1021 = vmatmul.msk.f32.vlgmr.msra.gmra.mxu1 %vm668_vm0, %v660_v32 }
  0xd0   :  { %v648_v33 = vpop.f32.mrf.mxu2 }
  0xd1   :  { %v661_v34 = vpop.f32.mrf.mxu3 }
 0x14a   :  { %v689_v37 = vpop.f32.mrf.mxu0  ;;  %v727_v38 = vpop.f32.mrf.mxu1 }
 0x14b   :  { %v690_v39 = vadd.f32 %v1087_v35, %v689_v37  ;;  %v728_v40 = vadd.f32 %v1088_v36, %v727_v38 }
 0x14d   :  { %v730_v41 = vsub.f32 0.0, %v728_v40  ;;  %v735_v42 = vmul.f32 1.442695, %v728_v40  ;;  %v693_v43 = vsel %vm692_vm1, %v690_v39, -inf  ;;  %vm740_vm3 = vcmp.ge.f32.partialorder %v728_v40, 0.0 }
 0x14e   :  { %694 = vmax.xlane.f32.xlu0 %v693_v43 }
 0x14f   :  { %v731_v44 = vmul.f32 1.442695, %v730_v41  ;;  %1089 = vpow2.f32 %v735_v42 }
 0x151   :  { %1091 = vpow2.f32 %v731_v44 }
 0x155   :  { %v1090_v45 = vpop.eup %1089 }
 0x156   :  { %v737_v46 = vadd.f32 1.0, %v1090_v45 }
 0x157   :  { %v1092_v47 = vpop.eup %1091 }
 0x158   :  { %v733_v48 = vadd.f32 1.0, %v1092_v47  ;;  %1093 = vrcp.f32 %v737_v46 }
 0x15a   :  { %1095 = vrcp.f32 %v733_v48 }
 0x15e   :  { %v1094_v49 = vpop.eup %1093 }
 0x15f   :  { %v739_v50 = vmul.f32 %v1094_v49, %v1090_v45 }
 0x160   :  { %v1096_v51 = vpop.eup %1095 }
 0x161   :  { %v741_v52 = vsel %vm740_vm3, %v1096_v51, %v739_v50 }
 0x162   :  { %743 = vst.msk [vmem:[%s1390_s6] sm:$0x3] %vm742_vm2, %v741_v52 }
 0x1c1   :  { %v695_v53 = vpop.xlane.xlu0 %694 }
 0x1c2   :  { %v696_v54 = vsub.f32 %v690_v39, %v695_v53 }
 0x1c4   :  { %v697_v55 = vmul.f32 1.442695, %v696_v54 }
 0x1c6   :  { %1097 = vpow2.f32 %v697_v55 }
 0x1cc   :  { %v1098_v56 = vpop.eup %1097 }
 0x1cd   :  { %v699_v57 = vsel %vm692_vm1, %v1098_v56, 0.0 }
 0x1ce   :  { %700 = vadd.xlane.f32.xlu0 %v699_v57 }
 0x241   :  { %v701_v58 = vpop.xlane.xlu0 %700 }
 0x242   :  { %1099 = vrcp.f32 %v701_v58 }
 0x248   :  { %v1100_v59 = vpop.eup %1099 }
 0x249   :  { %v703_v60 = vmul.f32 %v1100_v59, %v1098_v56 }
 0x24b   :  { %704 = vst.msk [vmem:[#allocation3] sm:$0x3] %vm692_vm1, %v703_v60 }
 0x24c   :  { %756 = dma.vmem_to_hbm [thread:$0]  %s752_s13, 32, %s754_s16, [#allocation4]  }
 0x24d   :  { %1125 = dma.done.wait [#allocation4], 32  }
 0x24e   :  { %1126 = vsyncadd [#allocation4], 4294967264 }
 0x24f   :  { %763 = vsyncpa [#allocation4], 1 }

</bundles_post_ra>
